<compile_context>
chip_gen: v6e
topology: v6e:2x2x1
jax: 0.10.0
libtpu: 0.0.40
codegen_flags: <defaults>
</compile_context>

<pallas_src>
import functools
import math

import jax
import jax.numpy as jnp
from jax.experimental import pallas as pl
from jax.experimental.pallas import tpu as pltpu


# --------------------------------------------------------------------------------------
# In-kernel helpers
# --------------------------------------------------------------------------------------

def _ln(x, g, b):
    # x: (T, C) f32, g/b: (1, C) f32
    mu = jnp.mean(x, axis=-1, keepdims=True)
    var = jnp.mean(jnp.square(x - mu), axis=-1, keepdims=True)
    return (x - mu) * jax.lax.rsqrt(var + 1e-5) * g + b


def _im2col(x, K):
    # x: (T, C) f32  ->  (T, K*C) with zero 'same' padding.
    # Shifted copies are built with tiny 0/1 shift-matrix matmuls (exact in f32),
    # avoiding unaligned sublane slices; the conv then becomes ONE matmul with
    # contraction dim K*C.
    T = x.shape[0]
    ri = jax.lax.broadcasted_iota(jnp.int32, (T, T), 0)
    ci = jax.lax.broadcasted_iota(jnp.int32, (T, T), 1)
    pad_l = (K - 1) // 2
    cols = []
    for k in range(K):
        s = k - pad_l
        if s == 0:
            cols.append(x)
        else:
            shift = (ci == ri + s).astype(x.dtype)        # (T, T) selection matrix
            cols.append(jnp.dot(shift, x, preferred_element_type=x.dtype))
    return jnp.concatenate(cols, axis=-1)


def _conv_same(x, w_ref, b_ref, K):
    # x: (T, Cin) f32, w_ref: (K*Cin, Cout) bf16, b_ref: (1, Cout) f32
    xc = _im2col(x, K).astype(jnp.bfloat16)
    return jnp.dot(xc, w_ref[...], preferred_element_type=jnp.float32) + b_ref[...]


# --------------------------------------------------------------------------------------
# Pallas kernels
# --------------------------------------------------------------------------------------

def _fused_layer_kernel(x_ref, mc_ref, mr_ref, rel_ref,
                        wqkv_ref, bqkv_ref, wo_ref, bo_ref,
                        g1_ref, be1_ref,
                        fw1_ref, fb1_ref, fw2_ref, fb2_ref,
                        g2_ref, be2_ref,
                        o_ref, *, n_heads, head_dim, conv_k):
    f32 = jnp.float32
    x = x_ref[0].astype(f32)                     # (T, H)
    mc = mc_ref[0].astype(f32)                   # (T, 1) padding mask
    mr = mr_ref[0].astype(f32)                   # (1, T) key mask
    T, H = x.shape

    # ---- fused QKV projection: single MXU pass with N-dim 3H ----
    qkv = (jnp.dot(x.astype(jnp.bfloat16), wqkv_ref[...],
                   preferred_element_type=f32) + bqkv_ref[...])          # (T, 3H)

    key_bias = (mr - 1.0) * 1e9                  # 0 where valid, -1e9 where masked
    scale = 1.0 / math.sqrt(head_dim)

    heads = []
    for h in range(n_heads):
        lo = h * head_dim
        qh = (qkv[:, lo:lo + head_dim] * scale).astype(jnp.bfloat16)
        kh = qkv[:, H + lo:H + lo + head_dim].astype(jnp.bfloat16)
        vh = qkv[:, 2 * H + lo:2 * H + lo + head_dim].astype(jnp.bfloat16)
        # scores without transposing k (contract last dims of q and k)
        s = jax.lax.dot_general(qh, kh, (((1,), (1,)), ((), ())),
                                preferred_element_type=f32)              # (T, T)
        s = s + rel_ref[h] + key_bias
        s = s - jnp.max(s, axis=-1, keepdims=True)
        p = jnp.exp(s)
        p = p * pl.reciprocal(jnp.sum(p, axis=-1, keepdims=True), approx=True)
        heads.append(jnp.dot(p.astype(jnp.bfloat16), vh,
                             preferred_element_type=f32))                # (T, Dh)
    a = jnp.concatenate(heads, axis=-1)                                  # (T, H)

    # output projection + mask + residual + LN (all fused, no HBM round-trip)
    a = (jnp.dot(a.astype(jnp.bfloat16), wo_ref[...],
                 preferred_element_type=f32) + bo_ref[...]) * mc
    h1 = _ln(x + a, g1_ref[...], be1_ref[...]) * mc                      # (T, H)

    # ---- conv FFN as im2col matmuls ----
    f = jax.nn.relu(_conv_same(h1, fw1_ref, fb1_ref, conv_k))            # (T, F)
    f = _conv_same(f * mc, fw2_ref, fb2_ref, conv_k) * mc                # (T, H)
    out = _ln(h1 + f, g2_ref[...], be2_ref[...]) * mc
    o_ref[0] = out.astype(o_ref.dtype)


def _prenet_kernel(x_ref, add_ref, mc_ref, w_ref, b_ref, g_ref, be_ref, o_ref, *, conv_k):
    # (scaled token emb + spk bias) -> mask -> conv -> relu -> mask -> LN -> mask
    f32 = jnp.float32
    mc = mc_ref[0].astype(f32)
    x = (x_ref[0].astype(f32) + add_ref[0]) * mc
    h = jax.nn.relu(_conv_same(x, w_ref, b_ref, conv_k)) * mc
    h = _ln(h, g_ref[...], be_ref[...]) * mc
    o_ref[0] = h.astype(o_ref.dtype)


def _vpred_kernel(x_ref, mc_ref,
                  w1_ref, b1_ref, g1_ref, be1_ref,
                  w2_ref, b2_ref, g2_ref, be2_ref,
                  wp_ref, bp_ref, o_ref, *, conv_k):
    # Fused variance predictor: conv->relu->LN->mask->conv->relu->LN->mask->proj->mask
    f32 = jnp.float32
    mc = mc_ref[0].astype(f32)
    x = x_ref[0].astype(f32) * mc
    h = jax.nn.relu(_conv_same(x, w1_ref, b1_ref, conv_k))
    h = _ln(h, g1_ref[...], be1_ref[...]) * mc
    h = jax.nn.relu(_conv_same(h, w2_ref, b2_ref, conv_k))
    h = _ln(h, g2_ref[...], be2_ref[...]) * mc
    out = (jnp.dot(h.astype(jnp.bfloat16), wp_ref[...],
                   preferred_element_type=f32) + bp_ref[...]) * mc       # (T, 1)
    o_ref[0] = out.astype(o_ref.dtype)


def _proj_kernel(x_ref, w_ref, b_ref, add_ref, mc_ref, o_ref):
    # y = (x @ w + b + add) * mask   (decoder input proj w/ spk bias, mel output proj)
    f32 = jnp.float32
    y = (jnp.dot(x_ref[0].astype(jnp.bfloat16), w_ref[...],
                 preferred_element_type=f32) + b_ref[...] + add_ref[0])
    o_ref[0] = (y * mc_ref[0].astype(f32)).astype(o_ref.dtype)


# --------------------------------------------------------------------------------------
# pallas_call wrappers (grid over batch -> "parallel" axis for megacore)
# --------------------------------------------------------------------------------------

def _idx_batch(b, nd):
    return (b,) + (0,) * (nd - 1)


def _idx_shared(b, nd):
    return (0,) * nd


def _run_batched(kernel, out_struct, inputs, batched):
    B = out_struct.shape[0]
    in_specs = []
    for a, bt in zip(inputs, batched):
        nd = a.ndim
        if bt:
            in_specs.append(pl.BlockSpec((1,) + tuple(a.shape[1:]),
                                         functools.partial(_idx_batch, nd=nd)))
        else:
            in_specs.append(pl.BlockSpec(tuple(a.shape),
                                         functools.partial(_idx_shared, nd=nd)))
    out_spec = pl.BlockSpec((1,) + tuple(out_struct.shape[1:]),
                            functools.partial(_idx_batch, nd=len(out_struct.shape)))
    return pl.pallas_call(
        kernel,
        out_shape=out_struct,
        grid=(B,),
        in_specs=in_specs,
        out_specs=out_spec,
        compiler_params=pltpu.CompilerParams(dimension_semantics=("parallel",)),
    )(*inputs)


def transformer_layer(lp, h, mask_col, mask_row, rel_bias, n_heads, conv_k):
    B, T, H = h.shape
    kernel = functools.partial(_fused_layer_kernel, n_heads=n_heads,
                               head_dim=H // n_heads, conv_k=conv_k)
    inputs = [h, mask_col, mask_row, rel_bias,
              lp["wqkv"], lp["bqkv"], lp["wo"], lp["bo"],
              lp["ln1_g"], lp["ln1_b"],
              lp["ff_w1"], lp["ff_b1"], lp["ff_w2"], lp["ff_b2"],
              lp["ln2_g"], lp["ln2_b"]]
    batched = [True, True, True] + [False] * 13
    out = jax.ShapeDtypeStruct((B, T, H), jnp.bfloat16)
    return _run_batched(kernel, out, inputs, batched)


def prenet(x, add, mask_col, w, b, g, be, conv_k):
    B, T, H = x.shape
    kernel = functools.partial(_prenet_kernel, conv_k=conv_k)
    out = jax.ShapeDtypeStruct((B, T, w.shape[1]), jnp.bfloat16)
    return _run_batched(kernel, out, [x, add, mask_col, w, b, g, be],
                        [True, True, True, False, False, False, False])


def variance_predictor(p, x, mask_col, conv_k):
    B, T, _ = x.shape
    kernel = functools.partial(_vpred_kernel, conv_k=conv_k)
    inputs = [x, mask_col,
              p["w1"], p["b1"], p["ln1_g"], p["ln1_b"],
              p["w2"], p["b2"], p["ln2_g"], p["ln2_b"],
              p["proj_w"], p["proj_b"]]
    batched = [True, True] + [False] * 10
    out = jax.ShapeDtypeStruct((B, T, 1), jnp.float32)
    return _run_batched(kernel, out, inputs, batched)[..., 0]            # (B, T)


def masked_projection(x, w, b, add, mask_col, out_dtype):
    B, T, _ = x.shape
    out = jax.ShapeDtypeStruct((B, T, w.shape[1]), out_dtype)
    return _run_batched(_proj_kernel, out, [x, w, b, add, mask_col],
                        [True, False, False, True, True])


# --------------------------------------------------------------------------------------
# Model blocks (JAX glue around the fused kernels)
# --------------------------------------------------------------------------------------

def _rel_index(T, window):
    idx = jnp.arange(T)
    return jnp.clip(idx[None, :] - idx[:, None], -window, window) + window   # (T, T)


def text_encoder(p, x_ids, x_lengths, spk_emb, cfg):
    B, T = x_ids.shape
    H = cfg["enc_hidden_dim"]
    mask = (jnp.arange(T)[None, :] < x_lengths[:, None]).astype(jnp.float32)
    mc = mask[:, :, None]
    mr = mask[:, None, :]

    h = (p["tok_emb"][x_ids] * math.sqrt(H)).astype(jnp.bfloat16)   # glue gather
    if spk_emb is not None:
        add = (spk_emb @ p["spk_proj_w"] + p["spk_proj_b"])[:, None, :]   # tiny glue matmul
    else:
        add = jnp.zeros((B, 1, H), jnp.float32)

    h = prenet(h, add, mc, p["pre_w"], p["pre_b"], p["pre_ln_g"], p["pre_ln_b"],
               cfg["enc_kernel"])

    rel_idx = _rel_index(T, cfg["enc_window"])
    for lp in p["layers"]:
        rel_bias = lp["rel_emb"][:, rel_idx]                        # (nH, T, T)
        h = transformer_layer(lp, h, mc, mr, rel_bias,
                              cfg["enc_n_heads"], cfg["enc_kernel"])
    return h, mask


def length_regulate(h, duration, max_dec_len):
    # Expand phoneme-level features to frame level (data-dependent gather; JAX glue).
    ends = jnp.cumsum(duration, axis=1)                             # (B, Tx)
    frame = jnp.arange(max_dec_len)
    tok = jnp.sum(frame[None, :, None] >= ends[:, None, :], axis=-1)
    tok = jnp.clip(tok, 0, h.shape[1] - 1)
    return jnp.take_along_axis(h, tok[:, :, None], axis=1)          # (B, Tmax, C)


def variance_adaptor(p, enc_out, x_type, duration, pitch, enc_mask, cfg, max_dec_len):
    # TODO(synk): x_type semantics unknown (VarianceAdaptor source unavailable); unused.
    del x_type
    mc = enc_mask[:, :, None]
    log_dur_pred = variance_predictor(p["dur"], enc_out, mc, cfg["va_kernel"])
    pitch_pred = variance_predictor(p["pitch"], enc_out, mc, cfg["va_kernel"])

    nbin = cfg["va_n_pitch_bin"]
    pitch_ids = jnp.clip(
        ((pitch - cfg["pitch_min"]) / (cfg["pitch_max"] - cfg["pitch_min"]) * nbin)
        .astype(jnp.int32), 0, nbin - 1)
    h = enc_out.astype(jnp.float32) + p["pitch_emb"][pitch_ids] * mc

    dur = (duration * enc_mask.astype(duration.dtype)).astype(jnp.int32)
    dec_len = jnp.sum(dur, axis=1)
    dec_input = length_regulate(h, dur, max_dec_len)
    frame_mask = (jnp.arange(max_dec_len)[None, :] < dec_len[:, None]).astype(jnp.float32)
    dec_input = (dec_input * frame_mask[:, :, None]).astype(jnp.bfloat16)
    return dec_input, dec_len, pitch_pred, log_dur_pred, enc_mask


def mel_decoder(p, dec_input, dec_len, spk_emb, cfg):
    B, T, _ = dec_input.shape
    Hd = cfg["dec_hidden_dim"]
    mask = (jnp.arange(T)[None, :] < dec_len[:, None]).astype(jnp.float32)
    mc = mask[:, :, None]
    mr = mask[:, None, :]

    if spk_emb is not None:
        add = (spk_emb @ p["spk_proj_w"] + p["spk_proj_b"])[:, None, :]
    else:
        add = jnp.zeros((B, 1, Hd), jnp.float32)
    h = masked_projection(dec_input, p["in_w"], p["in_b"], add, mc, jnp.bfloat16)

    rel_idx = _rel_index(T, cfg["dec_window"])
    for lp in p["layers"]:
        rel_bias = lp["rel_emb"][:, rel_idx]
        h = transformer_layer(lp, h, mc, mr, rel_bias,
                              cfg["dec_n_heads"], cfg["dec_kernel"])

    zero_add = jnp.zeros((B, 1, cfg["n_mel"]), jnp.float32)
    mel = masked_projection(h, p["out_w"], p["out_b"], zero_add, mc, jnp.float32)
    return mel, mask


def light_transformer_forward(params, x, x_lengths, x_type, duration, pitch, spk,
                              cfg, max_dec_len):
    spk_emb = params["spk_emb"][spk] if cfg["n_spks"] > 1 else None
    enc_out, enc_mask = text_encoder(params["encoder"], x, x_lengths, spk_emb, cfg)
    dec_input, dec_len, pitch_pred, log_dur_pred, va_mask = variance_adaptor(
        params["va"], enc_out, x_type, duration, pitch, enc_mask, cfg, max_dec_len)
    # torch: dec_input.permute(0, 2, 1) -> layout no-op here (we stay (B, T, C)).
    dec_out, dec_mask = mel_decoder(params["decoder"], dec_input, dec_len, spk_emb, cfg)
    return dec_out, dec_len, dec_mask, pitch_pred, log_dur_pred, va_mask


# --------------------------------------------------------------------------------------
# Deterministic parameter init (bf16 matmul weights, f32 biases / LN / embeddings)
# --------------------------------------------------------------------------------------

class KeyGen:
    def __init__(self, seed):
        self.key = jax.random.PRNGKey(seed)

    def __call__(self):
        self.key, sub = jax.random.split(self.key)
        return sub


def init_params(cfg, seed=0):
    kg = KeyGen(seed)
    H, Hd = cfg["enc_hidden_dim"], cfg["dec_hidden_dim"]
    bf16 = jnp.bfloat16

    def lin_w(fi, fo):
        return (jax.random.normal(kg(), (fi, fo), jnp.float32) / math.sqrt(fi)).astype(bf16)

    def conv_w(k, ci, co):
        # stored pre-reshaped for im2col: (k*ci, co)
        w = jax.random.normal(kg(), (k, ci, co), jnp.float32) / math.sqrt(k * ci)
        return w.reshape(k * ci, co).astype(bf16)

    def bias(n):
        return jnp.zeros((1, n), jnp.float32)

    def ln(c):
        return jnp.ones((1, c), jnp.float32), jnp.zeros((1, c), jnp.float32)

    def tlayer(h, filt, n_heads, kernel, window):
        p = {}
        p["wqkv"] = lin_w(h, 3 * h)                                  # fused Q,K,V weight
        p["bqkv"] = bias(3 * h)
        p["wo"] = lin_w(h, h)
        p["bo"] = bias(h)
        p["rel_emb"] = 0.02 * jax.random.normal(kg(), (n_heads, 2 * window + 1), jnp.float32)
        p["ff_w1"] = conv_w(kernel, h, filt); p["ff_b1"] = bias(filt)
        p["ff_w2"] = conv_w(kernel, filt, h); p["ff_b2"] = bias(h)
        p["ln1_g"], p["ln1_b"] = ln(h)
        p["ln2_g"], p["ln2_b"] = ln(h)
        return p

    params = {"spk_emb": 0.02 * jax.random.normal(
        kg(), (cfg["n_spks"], cfg["spk_emb_dim"]), jnp.float32)}

    enc = {"tok_emb": jax.random.normal(kg(), (cfg["n_vocab"], H), jnp.float32) / math.sqrt(H)}
    enc["spk_proj_w"] = jax.random.normal(kg(), (cfg["spk_emb_dim"], H), jnp.float32) \
        / math.sqrt(cfg["spk_emb_dim"])
    enc["spk_proj_b"] = jnp.zeros((H,), jnp.float32)
    enc["pre_w"] = conv_w(cfg["enc_kernel"], H, H)
    enc["pre_b"] = bias(H)
    enc["pre_ln_g"], enc["pre_ln_b"] = ln(H)
    enc["layers"] = [tlayer(H, cfg["enc_filter"], cfg["enc_n_heads"],
                            cfg["enc_kernel"], cfg["enc_window"])
                     for _ in range(cfg["enc_n_layers"])]
    params["encoder"] = enc

    def vpred():
        F = cfg["va_n_conv_filter"]
        p = {}
        p["w1"] = conv_w(cfg["va_kernel"], H, F); p["b1"] = bias(F)
        p["ln1_g"], p["ln1_b"] = ln(F)
        p["w2"] = conv_w(cfg["va_kernel"], F, F); p["b2"] = bias(F)
        p["ln2_g"], p["ln2_b"] = ln(F)
        p["proj_w"] = lin_w(F, 1); p["proj_b"] = bias(1)
        return p

    params["va"] = {
        "dur": vpred(),
        "pitch": vpred(),
        "pitch_emb": 0.02 * jax.random.normal(kg(), (cfg["va_n_pitch_bin"], H), jnp.float32),
    }

    dec = {}
    dec["in_w"] = lin_w(H, Hd); dec["in_b"] = bias(Hd)
    dec["spk_proj_w"] = jax.random.normal(kg(), (cfg["spk_emb_dim"], Hd), jnp.float32) \
        / math.sqrt(cfg["spk_emb_dim"])
    dec["spk_proj_b"] = jnp.zeros((Hd,), jnp.float32)
    dec["layers"] = [tlayer(Hd, cfg["dec_filter"], cfg["dec_n_heads"],
                            cfg["dec_kernel"], cfg["dec_window"])
                     for _ in range(cfg["dec_n_layers"])]
    # TODO(synk): n_mel is internal to MelDecoder in the original code; fixed to 80 here.
    dec["out_w"] = lin_w(Hd, cfg["n_mel"]); dec["out_b"] = bias(cfg["n_mel"])
    params["decoder"] = dec
    return params


# --------------------------------------------------------------------------------------
# Main
# --------------------------------------------------------------------------------------

if __name__ == "__main__":
    cfg = dict(
        n_vocab=40, n_spks=4, spk_emb_dim=16,
        enc_hidden_dim=32, enc_filter=64, enc_n_heads=2, enc_n_layers=2,
        enc_kernel=3, enc_window=4,
        dec_hidden_dim=32, dec_filter=64, dec_n_heads=2, dec_n_layers=2,
        dec_kernel=3, dec_window=4,
        va_n_conv_filter=32, va_kernel=3, va_n_pitch_bin=16,
        pitch_min=50.0, pitch_max=400.0,
        n_mel=80,
    )
    B, T_x = 2, 8
    MAX_DEC_LEN = 32

    params = init_params(cfg, seed=0)

    key = jax.random.PRNGKey(0)
    k1, k2, k3, k4 = jax.random.split(key, 4)
    x = jax.random.randint(k1, (B, T_x), 0, cfg["n_vocab"], dtype=jnp.int32)
    x_lengths = jnp.array([T_x, T_x - 2], dtype=jnp.int32)
    x_type = jnp.zeros((B, T_x), dtype=jnp.int32)
    duration = jax.random.randint(k2, (B, T_x), 1, 4, dtype=jnp.int32)
    pitch = jax.random.uniform(k3, (B, T_x), minval=60.0, maxval=350.0)
    spk = jax.random.randint(k4, (B,), 0, cfg["n_spks"], dtype=jnp.int32)

    fwd = jax.jit(functools.partial(light_transformer_forward,
                                    cfg=cfg, max_dec_len=MAX_DEC_LEN))
    outs = fwd(params, x, x_lengths, x_type, duration, pitch, spk)
    jax.block_until_ready(outs)

    dec_out, dec_len, dec_mask, pitch_pred, log_dur_pred, va_mask = outs
    assert dec_out.shape == (B, MAX_DEC_LEN, cfg["n_mel"])
    assert pitch_pred.shape == (B, T_x) and log_dur_pred.shape == (B, T_x)
    print("KERNEL_OK")
</pallas_src>

<mosaic_0001>
module attributes {stable_mosaic.version = 11 : i64} {
  func.func @_prenet_kernel(%arg0: i32, %arg1: memref<1x8x32xbf16, #tpu.memory_space<vmem>>, %arg2: memref<1x1x32xf32, #tpu.memory_space<vmem>>, %arg3: memref<1x8x1xf32, #tpu.memory_space<vmem>>, %arg4: memref<96x32xbf16, #tpu.memory_space<vmem>>, %arg5: memref<1x32xf32, #tpu.memory_space<vmem>>, %arg6: memref<1x32xf32, #tpu.memory_space<vmem>>, %arg7: memref<1x32xf32, #tpu.memory_space<vmem>>, %arg8: memref<1x8x32xbf16, #tpu.memory_space<vmem>>) attributes {dimension_semantics = [#tpu.dimension_semantics<parallel>], iteration_bounds = array<i64: 2>, scalar_prefetch = 0 : i64, scratch_operands = 0 : i64, tpu.core_type = #tpu.core_type<tc>, window_params = [{transform_indices = @transform_0, window_bounds = array<i64: 1, 8, 32>}, {transform_indices = @transform_1, window_bounds = array<i64: 1, 1, 32>}, {transform_indices = @transform_2, window_bounds = array<i64: 1, 8, 1>}, {pipeline_mode = #tpu.pipeline_mode<synchronous>, transform_indices = @transform_3, window_bounds = array<i64: 96, 32>}, {pipeline_mode = #tpu.pipeline_mode<synchronous>, transform_indices = @transform_4, window_bounds = array<i64: 1, 32>}, {pipeline_mode = #tpu.pipeline_mode<synchronous>, transform_indices = @transform_5, window_bounds = array<i64: 1, 32>}, {pipeline_mode = #tpu.pipeline_mode<synchronous>, transform_indices = @transform_6, window_bounds = array<i64: 1, 32>}, {transform_indices = @transform_7, window_bounds = array<i64: 1, 8, 32>}]} {
    %c0 = arith.constant 0 : index
    %c0_0 = arith.constant 0 : index
    %c0_1 = arith.constant 0 : index
    %0 = vector.load %arg3[%c0, %c0_0, %c0_1] : memref<1x8x1xf32, #tpu.memory_space<vmem>>, vector<1x8x1xf32>
    %1 = vector.shape_cast %0 : vector<1x8x1xf32> to vector<8x1xf32>
    %c0_2 = arith.constant 0 : index
    %c0_3 = arith.constant 0 : index
    %c0_4 = arith.constant 0 : index
    %2 = vector.load %arg1[%c0_2, %c0_3, %c0_4] : memref<1x8x32xbf16, #tpu.memory_space<vmem>>, vector<1x8x32xbf16>
    %3 = vector.shape_cast %2 : vector<1x8x32xbf16> to vector<8x32xbf16>
    %4 = arith.extf %3 : vector<8x32xbf16> to vector<8x32xf32>
    %c0_5 = arith.constant 0 : index
    %c0_6 = arith.constant 0 : index
    %c0_7 = arith.constant 0 : index
    %5 = vector.load %arg2[%c0_5, %c0_6, %c0_7] : memref<1x1x32xf32, #tpu.memory_space<vmem>>, vector<1x1x32xf32>
    %6 = vector.shape_cast %5 : vector<1x1x32xf32> to vector<1x32xf32>
    %7 = vector.broadcast %6 : vector<1x32xf32> to vector<8x32xf32>
    %8 = arith.addf %4, %7 : vector<8x32xf32>
    %9 = vector.broadcast %1 : vector<8x1xf32> to vector<8x32xf32>
    %10 = arith.mulf %8, %9 : vector<8x32xf32>
    %11 = tpu.iota {dimensions = array<i32: 0>} : vector<8x8xi32>
    %12 = tpu.iota {dimensions = array<i32: 1>} : vector<8x8xi32>
    %c-1_i32 = arith.constant -1 : i32
    %13 = vector.broadcast %c-1_i32 : i32 to vector<8x8xi32>
    %14 = arith.addi %11, %13 : vector<8x8xi32>
    %15 = arith.cmpi eq, %12, %14 : vector<8x8xi32>
    %16 = arith.extui %15 : vector<8x8xi1> to vector<8x8xi32>
    %17 = arith.sitofp %16 : vector<8x8xi32> to vector<8x8xf32>
    %cst = arith.constant dense<0.000000e+00> : vector<8x32xf32>
    %18 = tpu.matmul %17, %10, %cst {dimension_numbers = #tpu.dot_dimension_numbers<[1], [0], [0], [1], [0, 0, 1, 1], [], []>} : vector<8x8xf32>, vector<8x32xf32>, vector<8x32xf32> -> vector<8x32xf32>
    %c1_i32 = arith.constant 1 : i32
    %19 = vector.broadcast %c1_i32 : i32 to vector<8x8xi32>
    %20 = arith.addi %11, %19 : vector<8x8xi32>
    %21 = arith.cmpi eq, %12, %20 : vector<8x8xi32>
    %22 = arith.extui %21 : vector<8x8xi1> to vector<8x8xi32>
    %23 = arith.sitofp %22 : vector<8x8xi32> to vector<8x8xf32>
    %cst_8 = arith.constant dense<0.000000e+00> : vector<8x32xf32>
    %24 = tpu.matmul %23, %10, %cst_8 {dimension_numbers = #tpu.dot_dimension_numbers<[1], [0], [0], [1], [0, 0, 1, 1], [], []>} : vector<8x8xf32>, vector<8x32xf32>, vector<8x32xf32> -> vector<8x32xf32>
    %25 = tpu.concatenate %18, %10, %24 in 1 : vector<8x32xf32>, vector<8x32xf32>, vector<8x32xf32> -> vector<8x96xf32>
    %26 = arith.truncf %25 : vector<8x96xf32> to vector<8x96xbf16>
    %c0_9 = arith.constant 0 : index
    %c0_10 = arith.constant 0 : index
    %27 = vector.load %arg4[%c0_9, %c0_10] : memref<96x32xbf16, #tpu.memory_space<vmem>>, vector<96x32xbf16>
    %cst_11 = arith.constant dense<0.000000e+00> : vector<8x32xf32>
    %28 = tpu.matmul %26, %27, %cst_11 {dimension_numbers = #tpu.dot_dimension_numbers<[1], [0], [0], [1], [0, 0, 1, 1], [], []>} : vector<8x96xbf16>, vector<96x32xbf16>, vector<8x32xf32> -> vector<8x32xf32>
    %c0_12 = arith.constant 0 : index
    %c0_13 = arith.constant 0 : index
    %29 = vector.load %arg5[%c0_12, %c0_13] : memref<1x32xf32, #tpu.memory_space<vmem>>, vector<1x32xf32>
    %30 = vector.broadcast %29 : vector<1x32xf32> to vector<8x32xf32>
    %31 = arith.addf %28, %30 : vector<8x32xf32>
    %cst_14 = arith.constant 0.000000e+00 : f32
    %32 = vector.broadcast %cst_14 : f32 to vector<8x32xf32>
    %33 = arith.maximumf %31, %32 : vector<8x32xf32>
    %34 = vector.broadcast %1 : vector<8x1xf32> to vector<8x32xf32>
    %35 = arith.mulf %33, %34 : vector<8x32xf32>
    %c0_15 = arith.constant 0 : index
    %c0_16 = arith.constant 0 : index
    %36 = vector.load %arg6[%c0_15, %c0_16] : memref<1x32xf32, #tpu.memory_space<vmem>>, vector<1x32xf32>
    %c0_17 = arith.constant 0 : index
    %c0_18 = arith.constant 0 : index
    %37 = vector.load %arg7[%c0_17, %c0_18] : memref<1x32xf32, #tpu.memory_space<vmem>>, vector<1x32xf32>
    %cst_19 = arith.constant dense<0.000000e+00> : vector<8xf32>
    %38 = vector.multi_reduction <add>, %35, %cst_19 [1] : vector<8x32xf32> to vector<8xf32>
    %39 = vector.shape_cast %38 : vector<8xf32> to vector<8x1xf32>
    %cst_20 = arith.constant 3.200000e+01 : f32
    %40 = vector.broadcast %cst_20 : f32 to vector<8x1xf32>
    %41 = arith.divf %39, %40 : vector<8x1xf32>
    %42 = vector.broadcast %41 : vector<8x1xf32> to vector<8x32xf32>
    %43 = arith.subf %35, %42 : vector<8x32xf32>
    %44 = arith.mulf %43, %43 : vector<8x32xf32>
    %cst_21 = arith.constant dense<0.000000e+00> : vector<8xf32>
    %45 = vector.multi_reduction <add>, %44, %cst_21 [1] : vector<8x32xf32> to vector<8xf32>
    %46 = vector.shape_cast %45 : vector<8xf32> to vector<8x1xf32>
    %cst_22 = arith.constant 3.200000e+01 : f32
    %47 = vector.broadcast %cst_22 : f32 to vector<8x1xf32>
    %48 = arith.divf %46, %47 : vector<8x1xf32>
    %49 = vector.broadcast %41 : vector<8x1xf32> to vector<8x32xf32>
    %50 = arith.subf %35, %49 : vector<8x32xf32>
    %cst_23 = arith.constant 9.99999974E-6 : f32
    %51 = vector.broadcast %cst_23 : f32 to vector<8x1xf32>
    %52 = arith.addf %48, %51 : vector<8x1xf32>
    %53 = math.rsqrt %52 : vector<8x1xf32>
    %54 = vector.broadcast %53 : vector<8x1xf32> to vector<8x32xf32>
    %55 = arith.mulf %50, %54 : vector<8x32xf32>
    %56 = vector.broadcast %36 : vector<1x32xf32> to vector<8x32xf32>
    %57 = arith.mulf %55, %56 : vector<8x32xf32>
    %58 = vector.broadcast %37 : vector<1x32xf32> to vector<8x32xf32>
    %59 = arith.addf %57, %58 : vector<8x32xf32>
    %60 = vector.broadcast %1 : vector<8x1xf32> to vector<8x32xf32>
    %61 = arith.mulf %59, %60 : vector<8x32xf32>
    %62 = arith.truncf %61 : vector<8x32xf32> to vector<8x32xbf16>
    %c0_24 = arith.constant 0 : index
    %c0_25 = arith.constant 0 : index
    %c0_26 = arith.constant 0 : index
    %63 = vector.load %arg8[%c0_24, %c0_25, %c0_26] : memref<1x8x32xbf16, #tpu.memory_space<vmem>>, vector<1x8x32xbf16>
    %64 = vector.shape_cast %63 : vector<1x8x32xbf16> to vector<8x32xbf16>
    %65 = vector.shape_cast %62 : vector<8x32xbf16> to vector<1x8x32xbf16>
    tpu.vector_store %arg8[%c0_24, %c0_25, %c0_26], %65 {strides = array<i32>} : memref<1x8x32xbf16, #tpu.memory_space<vmem>>, vector<1x8x32xbf16>,
    return
  }
  func.func @transform_0(%arg0: i32) -> (i32, i32, i32) {
    %c0_i32 = arith.constant 0 : i32
    %c0_i32_0 = arith.constant 0 : i32
    %c0_i32_1 = arith.constant 0 : i32
    return %arg0, %c0_i32, %c0_i32_0 : i32, i32, i32
  }
  func.func @transform_1(%arg0: i32) -> (i32, i32, i32) {
    %c0_i32 = arith.constant 0 : i32
    %c0_i32_0 = arith.constant 0 : i32
    %c0_i32_1 = arith.constant 0 : i32
    return %arg0, %c0_i32, %c0_i32_0 : i32, i32, i32
  }
  func.func @transform_2(%arg0: i32) -> (i32, i32, i32) {
    %c0_i32 = arith.constant 0 : i32
    %c0_i32_0 = arith.constant 0 : i32
    %c0_i32_1 = arith.constant 0 : i32
    return %arg0, %c0_i32, %c0_i32_0 : i32, i32, i32
  }
  func.func @transform_3(%arg0: i32) -> (i32, i32) {
    %c0_i32 = arith.constant 0 : i32
    %c0_i32_0 = arith.constant 0 : i32
    %c0_i32_1 = arith.constant 0 : i32
    return %c0_i32, %c0_i32_0 : i32, i32
  }
  func.func @transform_4(%arg0: i32) -> (i32, i32) {
    %c0_i32 = arith.constant 0 : i32
    %c0_i32_0 = arith.constant 0 : i32
    %c0_i32_1 = arith.constant 0 : i32
    return %c0_i32, %c0_i32_0 : i32, i32
  }
  func.func @transform_5(%arg0: i32) -> (i32, i32) {
    %c0_i32 = arith.constant 0 : i32
    %c0_i32_0 = arith.constant 0 : i32
    %c0_i32_1 = arith.constant 0 : i32
    return %c0_i32, %c0_i32_0 : i32, i32
  }
  func.func @transform_6(%arg0: i32) -> (i32, i32) {
    %c0_i32 = arith.constant 0 : i32
    %c0_i32_0 = arith.constant 0 : i32
    %c0_i32_1 = arith.constant 0 : i32
    return %c0_i32, %c0_i32_0 : i32, i32
  }
  func.func @transform_7(%arg0: i32) -> (i32, i32, i32) {
    %c0_i32 = arith.constant 0 : i32
    %c0_i32_0 = arith.constant 0 : i32
    %c0_i32_1 = arith.constant 0 : i32
    return %arg0, %c0_i32, %c0_i32_0 : i32, i32, i32
  }
}

module attributes {stable_mosaic.version = 11 : i64} {
  func.func @_fused_layer_kernel(%arg0: i32, %arg1: memref<1x8x32xbf16, #tpu.memory_space<vmem>>, %arg2: memref<1x8x1xf32, #tpu.memory_space<vmem>>, %arg3: memref<1x1x8xf32, #tpu.memory_space<vmem>>, %arg4: memref<2x8x8xf32, #tpu.memory_space<vmem>>, %arg5: memref<32x96xbf16, #tpu.memory_space<vmem>>, %arg6: memref<1x96xf32, #tpu.memory_space<vmem>>, %arg7: memref<32x32xbf16, #tpu.memory_space<vmem>>, %arg8: memref<1x32xf32, #tpu.memory_space<vmem>>, %arg9: memref<1x32xf32, #tpu.memory_space<vmem>>, %arg10: memref<1x32xf32, #tpu.memory_space<vmem>>, %arg11: memref<96x64xbf16, #tpu.memory_space<vmem>>, %arg12: memref<1x64xf32, #tpu.memory_space<vmem>>, %arg13: memref<192x32xbf16, #tpu.memory_space<vmem>>, %arg14: memref<1x32xf32, #tpu.memory_space<vmem>>, %arg15: memref<1x32xf32, #tpu.memory_space<vmem>>, %arg16: memref<1x32xf32, #tpu.memory_space<vmem>>, %arg17: memref<1x8x32xbf16, #tpu.memory_space<vmem>>) attributes {dimension_semantics = [#tpu.dimension_semantics<parallel>], iteration_bounds = array<i64: 2>, scalar_prefetch = 0 : i64, scratch_operands = 0 : i64, tpu.core_type = #tpu.core_type<tc>, window_params = [{transform_indices = @transform_0, window_bounds = array<i64: 1, 8, 32>}, {transform_indices = @transform_1, window_bounds = array<i64: 1, 8, 1>}, {transform_indices = @transform_2, window_bounds = array<i64: 1, 1, 8>}, {pipeline_mode = #tpu.pipeline_mode<synchronous>, transform_indices = @transform_3, window_bounds = array<i64: 2, 8, 8>}, {pipeline_mode = #tpu.pipeline_mode<synchronous>, transform_indices = @transform_4, window_bounds = array<i64: 32, 96>}, {pipeline_mode = #tpu.pipeline_mode<synchronous>, transform_indices = @transform_5, window_bounds = array<i64: 1, 96>}, {pipeline_mode = #tpu.pipeline_mode<synchronous>, transform_indices = @transform_6, window_bounds = array<i64: 32, 32>}, {pipeline_mode = #tpu.pipeline_mode<synchronous>, transform_indices = @transform_7, window_bounds = array<i64: 1, 32>}, {pipeline_mode = #tpu.pipeline_mode<synchronous>, transform_indices = @transform_8, window_bounds = array<i64: 1, 32>}, {pipeline_mode = #tpu.pipeline_mode<synchronous>, transform_indices = @transform_9, window_bounds = array<i64: 1, 32>}, {pipeline_mode = #tpu.pipeline_mode<synchronous>, transform_indices = @transform_10, window_bounds = array<i64: 96, 64>}, {pipeline_mode = #tpu.pipeline_mode<synchronous>, transform_indices = @transform_11, window_bounds = array<i64: 1, 64>}, {pipeline_mode = #tpu.pipeline_mode<synchronous>, transform_indices = @transform_12, window_bounds = array<i64: 192, 32>}, {pipeline_mode = #tpu.pipeline_mode<synchronous>, transform_indices = @transform_13, window_bounds = array<i64: 1, 32>}, {pipeline_mode = #tpu.pipeline_mode<synchronous>, transform_indices = @transform_14, window_bounds = array<i64: 1, 32>}, {pipeline_mode = #tpu.pipeline_mode<synchronous>, transform_indices = @transform_15, window_bounds = array<i64: 1, 32>}, {transform_indices = @transform_16, window_bounds = array<i64: 1, 8, 32>}]} {
    %c0 = arith.constant 0 : index
    %c0_0 = arith.constant 0 : index
    %c0_1 = arith.constant 0 : index
    %0 = vector.load %arg1[%c0, %c0_0, %c0_1] : memref<1x8x32xbf16, #tpu.memory_space<vmem>>, vector<1x8x32xbf16>
    %1 = vector.shape_cast %0 : vector<1x8x32xbf16> to vector<8x32xbf16>
    %2 = arith.extf %1 : vector<8x32xbf16> to vector<8x32xf32>
    %c0_2 = arith.constant 0 : index
    %c0_3 = arith.constant 0 : index
    %c0_4 = arith.constant 0 : index
    %3 = vector.load %arg2[%c0_2, %c0_3, %c0_4] : memref<1x8x1xf32, #tpu.memory_space<vmem>>, vector<1x8x1xf32>
    %4 = vector.shape_cast %3 : vector<1x8x1xf32> to vector<8x1xf32>
    %c0_5 = arith.constant 0 : index
    %c0_6 = arith.constant 0 : index
    %c0_7 = arith.constant 0 : index
    %5 = vector.load %arg3[%c0_5, %c0_6, %c0_7] : memref<1x1x8xf32, #tpu.memory_space<vmem>>, vector<1x1x8xf32>
    %6 = vector.shape_cast %5 : vector<1x1x8xf32> to vector<1x8xf32>
    %7 = arith.truncf %2 : vector<8x32xf32> to vector<8x32xbf16>
    %c0_8 = arith.constant 0 : index
    %c0_9 = arith.constant 0 : index
    %8 = vector.load %arg5[%c0_8, %c0_9] : memref<32x96xbf16, #tpu.memory_space<vmem>>, vector<32x96xbf16>
    %cst = arith.constant dense<0.000000e+00> : vector<8x96xf32>
    %9 = tpu.matmul %7, %8, %cst {dimension_numbers = #tpu.dot_dimension_numbers<[1], [0], [0], [1], [0, 0, 1, 1], [], []>} : vector<8x32xbf16>, vector<32x96xbf16>, vector<8x96xf32> -> vector<8x96xf32>
    %c0_10 = arith.constant 0 : index
    %c0_11 = arith.constant 0 : index
    %10 = vector.load %arg6[%c0_10, %c0_11] : memref<1x96xf32, #tpu.memory_space<vmem>>, vector<1x96xf32>
    %11 = vector.broadcast %10 : vector<1x96xf32> to vector<8x96xf32>
    %12 = arith.addf %9, %11 : vector<8x96xf32>
    %cst_12 = arith.constant 1.000000e+00 : f32
    %13 = vector.broadcast %cst_12 : f32 to vector<1x8xf32>
    %14 = arith.subf %6, %13 : vector<1x8xf32>
    %cst_13 = arith.constant 1.000000e+09 : f32
    %15 = vector.broadcast %cst_13 : f32 to vector<1x8xf32>
    %16 = arith.mulf %14, %15 : vector<1x8xf32>
    %17 = vector.extract_strided_slice %12 {offsets = [0, 0], sizes = [8, 16], strides = [1, 1]} : vector<8x96xf32> to vector<8x16xf32>
    %cst_14 = arith.constant 2.500000e-01 : f32
    %18 = vector.broadcast %cst_14 : f32 to vector<8x16xf32>
    %19 = arith.mulf %17, %18 : vector<8x16xf32>
    %20 = arith.truncf %19 : vector<8x16xf32> to vector<8x16xbf16>
    %21 = vector.extract_strided_slice %12 {offsets = [0, 32], sizes = [8, 16], strides = [1, 1]} : vector<8x96xf32> to vector<8x16xf32>
    %22 = arith.truncf %21 : vector<8x16xf32> to vector<8x16xbf16>
    %23 = vector.extract_strided_slice %12 {offsets = [0, 64], sizes = [8, 16], strides = [1, 1]} : vector<8x96xf32> to vector<8x16xf32>
    %24 = arith.truncf %23 : vector<8x16xf32> to vector<8x16xbf16>
    %cst_15 = arith.constant dense<0.000000e+00> : vector<8x8xf32>
    %25 = tpu.matmul %20, %22, %cst_15 {dimension_numbers = #tpu.dot_dimension_numbers<[1], [1], [0], [0], [0, 0, 1, 0], [], []>} : vector<8x16xbf16>, vector<8x16xbf16>, vector<8x8xf32> -> vector<8x8xf32>
    %c0_16 = arith.constant 0 : index
    %c0_17 = arith.constant 0 : index
    %c0_18 = arith.constant 0 : index
    %26 = vector.load %arg4[%c0_16, %c0_17, %c0_18] : memref<2x8x8xf32, #tpu.memory_space<vmem>>, vector<1x8x8xf32>
    %27 = vector.shape_cast %26 : vector<1x8x8xf32> to vector<8x8xf32>
    %28 = arith.addf %25, %27 : vector<8x8xf32>
    %29 = vector.broadcast %16 : vector<1x8xf32> to vector<8x8xf32>
    %30 = arith.addf %28, %29 : vector<8x8xf32>
    %cst_19 = arith.constant dense<0xFF800000> : vector<8xf32>
    %31 = vector.multi_reduction <maximumf>, %30, %cst_19 [1] : vector<8x8xf32> to vector<8xf32>
    %32 = vector.shape_cast %31 : vector<8xf32> to vector<8x1xf32>
    %33 = vector.broadcast %32 : vector<8x1xf32> to vector<8x8xf32>
    %34 = arith.subf %30, %33 : vector<8x8xf32>
    %35 = math.exp %34 : vector<8x8xf32>
    %cst_20 = arith.constant dense<0.000000e+00> : vector<8xf32>
    %36 = vector.multi_reduction <add>, %35, %cst_20 [1] : vector<8x8xf32> to vector<8xf32>
    %37 = vector.shape_cast %36 : vector<8xf32> to vector<8x1xf32>
    %38 = tpu.reciprocal %37 {approx = true} : vector<8x1xf32> -> vector<8x1xf32>
    %39 = vector.broadcast %38 : vector<8x1xf32> to vector<8x8xf32>
    %40 = arith.mulf %35, %39 : vector<8x8xf32>
    %41 = arith.truncf %40 : vector<8x8xf32> to vector<8x8xbf16>
    %cst_21 = arith.constant dense<0.000000e+00> : vector<8x16xf32>
    %42 = tpu.matmul %41, %24, %cst_21 {dimension_numbers = #tpu.dot_dimension_numbers<[1], [0], [0], [1], [0, 0, 1, 1], [], []>} : vector<8x8xbf16>, vector<8x16xbf16>, vector<8x16xf32> -> vector<8x16xf32>
    %43 = vector.extract_strided_slice %12 {offsets = [0, 16], sizes = [8, 16], strides = [1, 1]} : vector<8x96xf32> to vector<8x16xf32>
    %cst_22 = arith.constant 2.500000e-01 : f32
    %44 = vector.broadcast %cst_22 : f32 to vector<8x16xf32>
    %45 = arith.mulf %43, %44 : vector<8x16xf32>
    %46 = arith.truncf %45 : vector<8x16xf32> to vector<8x16xbf16>
    %47 = vector.extract_strided_slice %12 {offsets = [0, 48], sizes = [8, 16], strides = [1, 1]} : vector<8x96xf32> to vector<8x16xf32>
    %48 = arith.truncf %47 : vector<8x16xf32> to vector<8x16xbf16>
    %49 = vector.extract_strided_slice %12 {offsets = [0, 80], sizes = [8, 16], strides = [1, 1]} : vector<8x96xf32> to vector<8x16xf32>
    %50 = arith.truncf %49 : vector<8x16xf32> to vector<8x16xbf16>
    %cst_23 = arith.constant dense<0.000000e+00> : vector<8x8xf32>
    %51 = tpu.matmul %46, %48, %cst_23 {dimension_numbers = #tpu.dot_dimension_numbers<[1], [1], [0], [0], [0, 0, 1, 0], [], []>} : vector<8x16xbf16>, vector<8x16xbf16>, vector<8x8xf32> -> vector<8x8xf32>
    %c1 = arith.constant 1 : index
    %c0_24 = arith.constant 0 : index
    %c0_25 = arith.constant 0 : index
    %52 = vector.load %arg4[%c1, %c0_24, %c0_25] : memref<2x8x8xf32, #tpu.memory_space<vmem>>, vector<1x8x8xf32>
    %53 = vector.shape_cast %52 : vector<1x8x8xf32> to vector<8x8xf32>
    %54 = arith.addf %51, %53 : vector<8x8xf32>
    %55 = vector.broadcast %16 : vector<1x8xf32> to vector<8x8xf32>
    %56 = arith.addf %54, %55 : vector<8x8xf32>
    %cst_26 = arith.constant dense<0xFF800000> : vector<8xf32>
    %57 = vector.multi_reduction <maximumf>, %56, %cst_26 [1] : vector<8x8xf32> to vector<8xf32>
    %58 = vector.shape_cast %57 : vector<8xf32> to vector<8x1xf32>
    %59 = vector.broadcast %58 : vector<8x1xf32> to vector<8x8xf32>
    %60 = arith.subf %56, %59 : vector<8x8xf32>
    %61 = math.exp %60 : vector<8x8xf32>
    %cst_27 = arith.constant dense<0.000000e+00> : vector<8xf32>
    %62 = vector.multi_reduction <add>, %61, %cst_27 [1] : vector<8x8xf32> to vector<8xf32>
    %63 = vector.shape_cast %62 : vector<8xf32> to vector<8x1xf32>
    %64 = tpu.reciprocal %63 {approx = true} : vector<8x1xf32> -> vector<8x1xf32>
    %65 = vector.broadcast %64 : vector<8x1xf32> to vector<8x8xf32>
    %66 = arith.mulf %61, %65 : vector<8x8xf32>
    %67 = arith.truncf %66 : vector<8x8xf32> to vector<8x8xbf16>
    %cst_28 = arith.constant dense<0.000000e+00> : vector<8x16xf32>
    %68 = tpu.matmul %67, %50, %cst_28 {dimension_numbers = #tpu.dot_dimension_numbers<[1], [0], [0], [1], [0, 0, 1, 1], [], []>} : vector<8x8xbf16>, vector<8x16xbf16>, vector<8x16xf32> -> vector<8x16xf32>
    %69 = tpu.concatenate %42, %68 in 1 : vector<8x16xf32>, vector<8x16xf32> -> vector<8x32xf32>
    %70 = arith.truncf %69 : vector<8x32xf32> to vector<8x32xbf16>
    %c0_29 = arith.constant 0 : index
    %c0_30 = arith.constant 0 : index
    %71 = vector.load %arg7[%c0_29, %c0_30] : memref<32x32xbf16, #tpu.memory_space<vmem>>, vector<32x32xbf16>
    %cst_31 = arith.constant dense<0.000000e+00> : vector<8x32xf32>
    %72 = tpu.matmul %70, %71, %cst_31 {dimension_numbers = #tpu.dot_dimension_numbers<[1], [0], [0], [1], [0, 0, 1, 1], [], []>} : vector<8x32xbf16>, vector<32x32xbf16>, vector<8x32xf32> -> vector<8x32xf32>
    %c0_32 = arith.constant 0 : index
    %c0_33 = arith.constant 0 : index
    %73 = vector.load %arg8[%c0_32, %c0_33] : memref<1x32xf32, #tpu.memory_space<vmem>>, vector<1x32xf32>
    %74 = vector.broadcast %73 : vector<1x32xf32> to vector<8x32xf32>
    %75 = arith.addf %72, %74 : vector<8x32xf32>
    %76 = vector.broadcast %4 : vector<8x1xf32> to vector<8x32xf32>
    %77 = arith.mulf %75, %76 : vector<8x32xf32>
    %78 = arith.addf %2, %77 : vector<8x32xf32>
    %c0_34 = arith.constant 0 : index
    %c0_35 = arith.constant 0 : index
    %79 = vector.load %arg9[%c0_34, %c0_35] : memref<1x32xf32, #tpu.memory_space<vmem>>, vector<1x32xf32>
    %c0_36 = arith.constant 0 : index
    %c0_37 = arith.constant 0 : index
    %80 = vector.load %arg10[%c0_36, %c0_37] : memref<1x32xf32, #tpu.memory_space<vmem>>, vector<1x32xf32>
    %cst_38 = arith.constant dense<0.000000e+00> : vector<8xf32>
    %81 = vector.multi_reduction <add>, %78, %cst_38 [1] : vector<8x32xf32> to vector<8xf32>
    %82 = vector.shape_cast %81 : vector<8xf32> to vector<8x1xf32>
    %cst_39 = arith.constant 3.200000e+01 : f32
    %83 = vector.broadcast %cst_39 : f32 to vector<8x1xf32>
    %84 = arith.divf %82, %83 : vector<8x1xf32>
    %85 = vector.broadcast %84 : vector<8x1xf32> to vector<8x32xf32>
    %86 = arith.subf %78, %85 : vector<8x32xf32>
    %87 = arith.mulf %86, %86 : vector<8x32xf32>
    %cst_40 = arith.constant dense<0.000000e+00> : vector<8xf32>
    %88 = vector.multi_reduction <add>, %87, %cst_40 [1] : vector<8x32xf32> to vector<8xf32>
    %89 = vector.shape_cast %88 : vector<8xf32> to vector<8x1xf32>
    %cst_41 = arith.constant 3.200000e+01 : f32
    %90 = vector.broadcast %cst_41 : f32 to vector<8x1xf32>
    %91 = arith.divf %89, %90 : vector<8x1xf32>
    %92 = vector.broadcast %84 : vector<8x1xf32> to vector<8x32xf32>
    %93 = arith.subf %78, %92 : vector<8x32xf32>
    %cst_42 = arith.constant 9.99999974E-6 : f32
    %94 = vector.broadcast %cst_42 : f32 to vector<8x1xf32>
    %95 = arith.addf %91, %94 : vector<8x1xf32>
    %96 = math.rsqrt %95 : vector<8x1xf32>
    %97 = vector.broadcast %96 : vector<8x1xf32> to vector<8x32xf32>
    %98 = arith.mulf %93, %97 : vector<8x32xf32>
    %99 = vector.broadcast %79 : vector<1x32xf32> to vector<8x32xf32>
    %100 = arith.mulf %98, %99 : vector<8x32xf32>
    %101 = vector.broadcast %80 : vector<1x32xf32> to vector<8x32xf32>
    %102 = arith.addf %100, %101 : vector<8x32xf32>
    %103 = vector.broadcast %4 : vector<8x1xf32> to vector<8x32xf32>
    %104 = arith.mulf %102, %103 : vector<8x32xf32>
    %105 = tpu.iota {dimensions = array<i32: 0>} : vector<8x8xi32>
    %106 = tpu.iota {dimensions = array<i32: 1>} : vector<8x8xi32>
    %c-1_i32 = arith.constant -1 : i32
    %107 = vector.broadcast %c-1_i32 : i32 to vector<8x8xi32>
    %108 = arith.addi %105, %107 : vector<8x8xi32>
    %109 = arith.cmpi eq, %106, %108 : vector<8x8xi32>
    %110 = arith.extui %109 : vector<8x8xi1> to vector<8x8xi32>
    %111 = arith.sitofp %110 : vector<8x8xi32> to vector<8x8xf32>
    %cst_43 = arith.constant dense<0.000000e+00> : vector<8x32xf32>
    %112 = tpu.matmul %111, %104, %cst_43 {dimension_numbers = #tpu.dot_dimension_numbers<[1], [0], [0], [1], [0, 0, 1, 1], [], []>} : vector<8x8xf32>, vector<8x32xf32>, vector<8x32xf32> -> vector<8x32xf32>
    %c1_i32 = arith.constant 1 : i32
    %113 = vector.broadcast %c1_i32 : i32 to vector<8x8xi32>
    %114 = arith.addi %105, %113 : vector<8x8xi32>
    %115 = arith.cmpi eq, %106, %114 : vector<8x8xi32>
    %116 = arith.extui %115 : vector<8x8xi1> to vector<8x8xi32>
    %117 = arith.sitofp %116 : vector<8x8xi32> to vector<8x8xf32>
    %cst_44 = arith.constant dense<0.000000e+00> : vector<8x32xf32>
    %118 = tpu.matmul %117, %104, %cst_44 {dimension_numbers = #tpu.dot_dimension_numbers<[1], [0], [0], [1], [0, 0, 1, 1], [], []>} : vector<8x8xf32>, vector<8x32xf32>, vector<8x32xf32> -> vector<8x32xf32>
    %119 = tpu.concatenate %112, %104, %118 in 1 : vector<8x32xf32>, vector<8x32xf32>, vector<8x32xf32> -> vector<8x96xf32>
    %120 = arith.truncf %119 : vector<8x96xf32> to vector<8x96xbf16>
    %c0_45 = arith.constant 0 : index
    %c0_46 = arith.constant 0 : index
    %121 = vector.load %arg11[%c0_45, %c0_46] : memref<96x64xbf16, #tpu.memory_space<vmem>>, vector<96x64xbf16>
    %cst_47 = arith.constant dense<0.000000e+00> : vector<8x64xf32>
    %122 = tpu.matmul %120, %121, %cst_47 {dimension_numbers = #tpu.dot_dimension_numbers<[1], [0], [0], [1], [0, 0, 1, 1], [], []>} : vector<8x96xbf16>, vector<96x64xbf16>, vector<8x64xf32> -> vector<8x64xf32>
    %c0_48 = arith.constant 0 : index
    %c0_49 = arith.constant 0 : index
    %123 = vector.load %arg12[%c0_48, %c0_49] : memref<1x64xf32, #tpu.memory_space<vmem>>, vector<1x64xf32>
    %124 = vector.broadcast %123 : vector<1x64xf32> to vector<8x64xf32>
    %125 = arith.addf %122, %124 : vector<8x64xf32>
    %cst_50 = arith.constant 0.000000e+00 : f32
    %126 = vector.broadcast %cst_50 : f32 to vector<8x64xf32>
    %127 = arith.maximumf %125, %126 : vector<8x64xf32>
    %128 = vector.broadcast %4 : vector<8x1xf32> to vector<8x64xf32>
    %129 = arith.mulf %127, %128 : vector<8x64xf32>
    %130 = tpu.iota {dimensions = array<i32: 0>} : vector<8x8xi32>
    %131 = tpu.iota {dimensions = array<i32: 1>} : vector<8x8xi32>
    %c-1_i32_51 = arith.constant -1 : i32
    %132 = vector.broadcast %c-1_i32_51 : i32 to vector<8x8xi32>
    %133 = arith.addi %130, %132 : vector<8x8xi32>
    %134 = arith.cmpi eq, %131, %133 : vector<8x8xi32>
    %135 = arith.extui %134 : vector<8x8xi1> to vector<8x8xi32>
    %136 = arith.sitofp %135 : vector<8x8xi32> to vector<8x8xf32>
    %cst_52 = arith.constant dense<0.000000e+00> : vector<8x64xf32>
    %137 = tpu.matmul %136, %129, %cst_52 {dimension_numbers = #tpu.dot_dimension_numbers<[1], [0], [0], [1], [0, 0, 1, 1], [], []>} : vector<8x8xf32>, vector<8x64xf32>, vector<8x64xf32> -> vector<8x64xf32>
    %c1_i32_53 = arith.constant 1 : i32
    %138 = vector.broadcast %c1_i32_53 : i32 to vector<8x8xi32>
    %139 = arith.addi %130, %138 : vector<8x8xi32>
    %140 = arith.cmpi eq, %131, %139 : vector<8x8xi32>
    %141 = arith.extui %140 : vector<8x8xi1> to vector<8x8xi32>
    %142 = arith.sitofp %141 : vector<8x8xi32> to vector<8x8xf32>
    %cst_54 = arith.constant dense<0.000000e+00> : vector<8x64xf32>
    %143 = tpu.matmul %142, %129, %cst_54 {dimension_numbers = #tpu.dot_dimension_numbers<[1], [0], [0], [1], [0, 0, 1, 1], [], []>} : vector<8x8xf32>, vector<8x64xf32>, vector<8x64xf32> -> vector<8x64xf32>
    %144 = tpu.concatenate %137, %129, %143 in 1 : vector<8x64xf32>, vector<8x64xf32>, vector<8x64xf32> -> vector<8x192xf32>
    %145 = arith.truncf %144 : vector<8x192xf32> to vector<8x192xbf16>
    %c0_55 = arith.constant 0 : index
    %c0_56 = arith.constant 0 : index
    %146 = vector.load %arg13[%c0_55, %c0_56] : memref<192x32xbf16, #tpu.memory_space<vmem>>, vector<192x32xbf16>
    %cst_57 = arith.constant dense<0.000000e+00> : vector<8x32xf32>
    %147 = tpu.matmul %145, %146, %cst_57 {dimension_numbers = #tpu.dot_dimension_numbers<[1], [0], [0], [1], [0, 0, 1, 1], [], []>} : vector<8x192xbf16>, vector<192x32xbf16>, vector<8x32xf32> -> vector<8x32xf32>
    %c0_58 = arith.constant 0 : index
    %c0_59 = arith.constant 0 : index
    %148 = vector.load %arg14[%c0_58, %c0_59] : memref<1x32xf32, #tpu.memory_space<vmem>>, vector<1x32xf32>
    %149 = vector.broadcast %148 : vector<1x32xf32> to vector<8x32xf32>
    %150 = arith.addf %147, %149 : vector<8x32xf32>
    %151 = vector.broadcast %4 : vector<8x1xf32> to vector<8x32xf32>
    %152 = arith.mulf %150, %151 : vector<8x32xf32>
    %153 = arith.addf %104, %152 : vector<8x32xf32>
    %c0_60 = arith.constant 0 : index
    %c0_61 = arith.constant 0 : index
    %154 = vector.load %arg15[%c0_60, %c0_61] : memref<1x32xf32, #tpu.memory_space<vmem>>, vector<1x32xf32>
    %c0_62 = arith.constant 0 : index
    %c0_63 = arith.constant 0 : index
    %155 = vector.load %arg16[%c0_62, %c0_63] : memref<1x32xf32, #tpu.memory_space<vmem>>, vector<1x32xf32>
    %cst_64 = arith.constant dense<0.000000e+00> : vector<8xf32>
    %156 = vector.multi_reduction <add>, %153, %cst_64 [1] : vector<8x32xf32> to vector<8xf32>
    %157 = vector.shape_cast %156 : vector<8xf32> to vector<8x1xf32>
    %cst_65 = arith.constant 3.200000e+01 : f32
    %158 = vector.broadcast %cst_65 : f32 to vector<8x1xf32>
    %159 = arith.divf %157, %158 : vector<8x1xf32>
    %160 = vector.broadcast %159 : vector<8x1xf32> to vector<8x32xf32>
    %161 = arith.subf %153, %160 : vector<8x32xf32>
    %162 = arith.mulf %161, %161 : vector<8x32xf32>
    %cst_66 = arith.constant dense<0.000000e+00> : vector<8xf32>
    %163 = vector.multi_reduction <add>, %162, %cst_66 [1] : vector<8x32xf32> to vector<8xf32>
    %164 = vector.shape_cast %163 : vector<8xf32> to vector<8x1xf32>
    %cst_67 = arith.constant 3.200000e+01 : f32
    %165 = vector.broadcast %cst_67 : f32 to vector<8x1xf32>
    %166 = arith.divf %164, %165 : vector<8x1xf32>
    %167 = vector.broadcast %159 : vector<8x1xf32> to vector<8x32xf32>
    %168 = arith.subf %153, %167 : vector<8x32xf32>
    %cst_68 = arith.constant 9.99999974E-6 : f32
    %169 = vector.broadcast %cst_68 : f32 to vector<8x1xf32>
    %170 = arith.addf %166, %169 : vector<8x1xf32>
    %171 = math.rsqrt %170 : vector<8x1xf32>
    %172 = vector.broadcast %171 : vector<8x1xf32> to vector<8x32xf32>
    %173 = arith.mulf %168, %172 : vector<8x32xf32>
    %174 = vector.broadcast %154 : vector<1x32xf32> to vector<8x32xf32>
    %175 = arith.mulf %173, %174 : vector<8x32xf32>
    %176 = vector.broadcast %155 : vector<1x32xf32> to vector<8x32xf32>
    %177 = arith.addf %175, %176 : vector<8x32xf32>
    %178 = vector.broadcast %4 : vector<8x1xf32> to vector<8x32xf32>
    %179 = arith.mulf %177, %178 : vector<8x32xf32>
    %180 = arith.truncf %179 : vector<8x32xf32> to vector<8x32xbf16>
    %c0_69 = arith.constant 0 : index
    %c0_70 = arith.constant 0 : index
    %c0_71 = arith.constant 0 : index
    %181 = vector.load %arg17[%c0_69, %c0_70, %c0_71] : memref<1x8x32xbf16, #tpu.memory_space<vmem>>, vector<1x8x32xbf16>
    %182 = vector.shape_cast %181 : vector<1x8x32xbf16> to vector<8x32xbf16>
    %183 = vector.shape_cast %180 : vector<8x32xbf16> to vector<1x8x32xbf16>
    tpu.vector_store %arg17[%c0_69, %c0_70, %c0_71], %183 {strides = array<i32>} : memref<1x8x32xbf16, #tpu.memory_space<vmem>>, vector<1x8x32xbf16>,
    return
  }
  func.func @transform_0(%arg0: i32) -> (i32, i32, i32) {
    %c0_i32 = arith.constant 0 : i32
    %c0_i32_0 = arith.constant 0 : i32
    %c0_i32_1 = arith.constant 0 : i32
    return %arg0, %c0_i32, %c0_i32_0 : i32, i32, i32
  }
  func.func @transform_1(%arg0: i32) -> (i32, i32, i32) {
    %c0_i32 = arith.constant 0 : i32
    %c0_i32_0 = arith.constant 0 : i32
    %c0_i32_1 = arith.constant 0 : i32
    return %arg0, %c0_i32, %c0_i32_0 : i32, i32, i32
  }
  func.func @transform_2(%arg0: i32) -> (i32, i32, i32) {
    %c0_i32 = arith.constant 0 : i32
    %c0_i32_0 = arith.constant 0 : i32
    %c0_i32_1 = arith.constant 0 : i32
    return %arg0, %c0_i32, %c0_i32_0 : i32, i32, i32
  }
  func.func @transform_3(%arg0: i32) -> (i32, i32, i32) {
    %c0_i32 = arith.constant 0 : i32
    %c0_i32_0 = arith.constant 0 : i32
    %c0_i32_1 = arith.constant 0 : i32
    %c0_i32_2 = arith.constant 0 : i32
    return %c0_i32, %c0_i32_0, %c0_i32_1 : i32, i32, i32
  }
  func.func @transform_4(%arg0: i32) -> (i32, i32) {
    %c0_i32 = arith.constant 0 : i32
    %c0_i32_0 = arith.constant 0 : i32
    %c0_i32_1 = arith.constant 0 : i32
    return %c0_i32, %c0_i32_0 : i32, i32
  }
  func.func @transform_5(%arg0: i32) -> (i32, i32) {
    %c0_i32 = arith.constant 0 : i32
    %c0_i32_0 = arith.constant 0 : i32
    %c0_i32_1 = arith.constant 0 : i32
    return %c0_i32, %c0_i32_0 : i32, i32
  }
  func.func @transform_6(%arg0: i32) -> (i32, i32) {
    %c0_i32 = arith.constant 0 : i32
    %c0_i32_0 = arith.constant 0 : i32
    %c0_i32_1 = arith.constant 0 : i32
    return %c0_i32, %c0_i32_0 : i32, i32
  }
  func.func @transform_7(%arg0: i32) -> (i32, i32) {
    %c0_i32 = arith.constant 0 : i32
    %c0_i32_0 = arith.constant 0 : i32
    %c0_i32_1 = arith.constant 0 : i32
    return %c0_i32, %c0_i32_0 : i32, i32
  }
  func.func @transform_8(%arg0: i32) -> (i32, i32) {
    %c0_i32 = arith.constant 0 : i32
    %c0_i32_0 = arith.constant 0 : i32
    %c0_i32_1 = arith.constant 0 : i32
    return %c0_i32, %c0_i32_0 : i32, i32
  }
  func.func @transform_9(%arg0: i32) -> (i32, i32) {
    %c0_i32 = arith.constant 0 : i32
    %c0_i32_0 = arith.constant 0 : i32
    %c0_i32_1 = arith.constant 0 : i32
    return %c0_i32, %c0_i32_0 : i32, i32
  }
  func.func @transform_10(%arg0: i32) -> (i32, i32) {
    %c0_i32 = arith.constant 0 : i32
    %c0_i32_0 = arith.constant 0 : i32
    %c0_i32_1 = arith.constant 0 : i32
    return %c0_i32, %c0_i32_0 : i32, i32
  }
  func.func @transform_11(%arg0: i32) -> (i32, i32) {
    %c0_i32 = arith.constant 0 : i32
    %c0_i32_0 = arith.constant 0 : i32
    %c0_i32_1 = arith.constant 0 : i32
    return %c0_i32, %c0_i32_0 : i32, i32
  }
  func.func @transform_12(%arg0: i32) -> (i32, i32) {
    %c0_i32 = arith.constant 0 : i32
    %c0_i32_0 = arith.constant 0 : i32
    %c0_i32_1 = arith.constant 0 : i32
    return %c0_i32, %c0_i32_0 : i32, i32
  }
  func.func @transform_13(%arg0: i32) -> (i32, i32) {
    %c0_i32 = arith.constant 0 : i32
    %c0_i32_0 = arith.constant 0 : i32
    %c0_i32_1 = arith.constant 0 : i32
    return %c0_i32, %c0_i32_0 : i32, i32
  }
  func.func @transform_14(%arg0: i32) -> (i32, i32) {
    %c0_i32 = arith.constant 0 : i32
    %c0_i32_0 = arith.constant 0 : i32
    %c0_i32_1 = arith.constant 0 : i32
    return %c0_i32, %c0_i32_0 : i32, i32
  }
  func.func @transform_15(%arg0: i32) -> (i32, i32) {
    %c0_i32 = arith.constant 0 : i32
    %c0_i32_0 = arith.constant 0 : i32
    %c0_i32_1 = arith.constant 0 : i32
    return %c0_i32, %c0_i32_0 : i32, i32
  }
  func.func @transform_16(%arg0: i32) -> (i32, i32, i32) {
    %c0_i32 = arith.constant 0 : i32
    %c0_i32_0 = arith.constant 0 : i32
    %c0_i32_1 = arith.constant 0 : i32
    return %arg0, %c0_i32, %c0_i32_0 : i32, i32, i32
  }
}

module attributes {stable_mosaic.version = 11 : i64} {
  func.func @_proj_kernel(%arg0: i32, %arg1: memref<1x32x32xbf16, #tpu.memory_space<vmem>>, %arg2: memref<32x32xbf16, #tpu.memory_space<vmem>>, %arg3: memref<1x32xf32, #tpu.memory_space<vmem>>, %arg4: memref<1x1x32xf32, #tpu.memory_space<vmem>>, %arg5: memref<1x32x1xf32, #tpu.memory_space<vmem>>, %arg6: memref<1x32x32xbf16, #tpu.memory_space<vmem>>) attributes {dimension_semantics = [#tpu.dimension_semantics<parallel>], iteration_bounds = array<i64: 2>, scalar_prefetch = 0 : i64, scratch_operands = 0 : i64, tpu.core_type = #tpu.core_type<tc>, window_params = [{transform_indices = @transform_0, window_bounds = array<i64: 1, 32, 32>}, {pipeline_mode = #tpu.pipeline_mode<synchronous>, transform_indices = @transform_1, window_bounds = array<i64: 32, 32>}, {pipeline_mode = #tpu.pipeline_mode<synchronous>, transform_indices = @transform_2, window_bounds = array<i64: 1, 32>}, {transform_indices = @transform_3, window_bounds = array<i64: 1, 1, 32>}, {transform_indices = @transform_4, window_bounds = array<i64: 1, 32, 1>}, {transform_indices = @transform_5, window_bounds = array<i64: 1, 32, 32>}]} {
    %c0 = arith.constant 0 : index
    %c0_0 = arith.constant 0 : index
    %c0_1 = arith.constant 0 : index
    %0 = vector.load %arg1[%c0, %c0_0, %c0_1] : memref<1x32x32xbf16, #tpu.memory_space<vmem>>, vector<1x32x32xbf16>
    %1 = vector.shape_cast %0 : vector<1x32x32xbf16> to vector<32x32xbf16>
    %c0_2 = arith.constant 0 : index
    %c0_3 = arith.constant 0 : index
    %2 = vector.load %arg2[%c0_2, %c0_3] : memref<32x32xbf16, #tpu.memory_space<vmem>>, vector<32x32xbf16>
    %cst = arith.constant dense<0.000000e+00> : vector<32x32xf32>
    %3 = tpu.matmul %1, %2, %cst {dimension_numbers = #tpu.dot_dimension_numbers<[1], [0], [0], [1], [0, 0, 1, 1], [], []>} : vector<32x32xbf16>, vector<32x32xbf16>, vector<32x32xf32> -> vector<32x32xf32>
    %c0_4 = arith.constant 0 : index
    %c0_5 = arith.constant 0 : index
    %4 = vector.load %arg3[%c0_4, %c0_5] : memref<1x32xf32, #tpu.memory_space<vmem>>, vector<1x32xf32>
    %5 = vector.broadcast %4 : vector<1x32xf32> to vector<32x32xf32>
    %6 = arith.addf %3, %5 : vector<32x32xf32>
    %c0_6 = arith.constant 0 : index
    %c0_7 = arith.constant 0 : index
    %c0_8 = arith.constant 0 : index
    %7 = vector.load %arg4[%c0_6, %c0_7, %c0_8] : memref<1x1x32xf32, #tpu.memory_space<vmem>>, vector<1x1x32xf32>
    %8 = vector.shape_cast %7 : vector<1x1x32xf32> to vector<1x32xf32>
    %9 = vector.broadcast %8 : vector<1x32xf32> to vector<32x32xf32>
    %10 = arith.addf %6, %9 : vector<32x32xf32>
    %c0_9 = arith.constant 0 : index
    %c0_10 = arith.constant 0 : index
    %c0_11 = arith.constant 0 : index
    %11 = vector.load %arg5[%c0_9, %c0_10, %c0_11] : memref<1x32x1xf32, #tpu.memory_space<vmem>>, vector<1x32x1xf32>
    %12 = vector.shape_cast %11 : vector<1x32x1xf32> to vector<32x1xf32>
    %13 = vector.broadcast %12 : vector<32x1xf32> to vector<32x32xf32>
    %14 = arith.mulf %10, %13 : vector<32x32xf32>
    %15 = arith.truncf %14 : vector<32x32xf32> to vector<32x32xbf16>
    %c0_12 = arith.constant 0 : index
    %c0_13 = arith.constant 0 : index
    %c0_14 = arith.constant 0 : index
    %16 = vector.load %arg6[%c0_12, %c0_13, %c0_14] : memref<1x32x32xbf16, #tpu.memory_space<vmem>>, vector<1x32x32xbf16>
    %17 = vector.shape_cast %16 : vector<1x32x32xbf16> to vector<32x32xbf16>
    %18 = vector.shape_cast %15 : vector<32x32xbf16> to vector<1x32x32xbf16>
    tpu.vector_store %arg6[%c0_12, %c0_13, %c0_14], %18 {strides = array<i32>} : memref<1x32x32xbf16, #tpu.memory_space<vmem>>, vector<1x32x32xbf16>,
    return
  }
  func.func @transform_0(%arg0: i32) -> (i32, i32, i32) {
    %c0_i32 = arith.constant 0 : i32
    %c0_i32_0 = arith.constant 0 : i32
    %c0_i32_1 = arith.constant 0 : i32
    return %arg0, %c0_i32, %c0_i32_0 : i32, i32, i32
  }
  func.func @transform_1(%arg0: i32) -> (i32, i32) {
    %c0_i32 = arith.constant 0 : i32
    %c0_i32_0 = arith.constant 0 : i32
    %c0_i32_1 = arith.constant 0 : i32
    return %c0_i32, %c0_i32_0 : i32, i32
  }
  func.func @transform_2(%arg0: i32) -> (i32, i32) {
    %c0_i32 = arith.constant 0 : i32
    %c0_i32_0 = arith.constant 0 : i32
    %c0_i32_1 = arith.constant 0 : i32
    return %c0_i32, %c0_i32_0 : i32, i32
  }
  func.func @transform_3(%arg0: i32) -> (i32, i32, i32) {
    %c0_i32 = arith.constant 0 : i32
    %c0_i32_0 = arith.constant 0 : i32
    %c0_i32_1 = arith.constant 0 : i32
    return %arg0, %c0_i32, %c0_i32_0 : i32, i32, i32
  }
  func.func @transform_4(%arg0: i32) -> (i32, i32, i32) {
    %c0_i32 = arith.constant 0 : i32
    %c0_i32_0 = arith.constant 0 : i32
    %c0_i32_1 = arith.constant 0 : i32
    return %arg0, %c0_i32, %c0_i32_0 : i32, i32, i32
  }
  func.func @transform_5(%arg0: i32) -> (i32, i32, i32) {
    %c0_i32 = arith.constant 0 : i32
    %c0_i32_0 = arith.constant 0 : i32
    %c0_i32_1 = arith.constant 0 : i32
    return %arg0, %c0_i32, %c0_i32_0 : i32, i32, i32
  }
}

module attributes {stable_mosaic.version = 11 : i64} {
  func.func @_proj_kernel(%arg0: i32, %arg1: memref<1x32x32xbf16, #tpu.memory_space<vmem>>, %arg2: memref<32x80xbf16, #tpu.memory_space<vmem>>, %arg3: memref<1x80xf32, #tpu.memory_space<vmem>>, %arg4: memref<1x1x80xf32, #tpu.memory_space<vmem>>, %arg5: memref<1x32x1xf32, #tpu.memory_space<vmem>>, %arg6: memref<1x32x80xf32, #tpu.memory_space<vmem>>) attributes {dimension_semantics = [#tpu.dimension_semantics<parallel>], iteration_bounds = array<i64: 2>, scalar_prefetch = 0 : i64, scratch_operands = 0 : i64, tpu.core_type = #tpu.core_type<tc>, window_params = [{transform_indices = @transform_0, window_bounds = array<i64: 1, 32, 32>}, {pipeline_mode = #tpu.pipeline_mode<synchronous>, transform_indices = @transform_1, window_bounds = array<i64: 32, 80>}, {pipeline_mode = #tpu.pipeline_mode<synchronous>, transform_indices = @transform_2, window_bounds = array<i64: 1, 80>}, {transform_indices = @transform_3, window_bounds = array<i64: 1, 1, 80>}, {transform_indices = @transform_4, window_bounds = array<i64: 1, 32, 1>}, {transform_indices = @transform_5, window_bounds = array<i64: 1, 32, 80>}]} {
    %c0 = arith.constant 0 : index
    %c0_0 = arith.constant 0 : index
    %c0_1 = arith.constant 0 : index
    %0 = vector.load %arg1[%c0, %c0_0, %c0_1] : memref<1x32x32xbf16, #tpu.memory_space<vmem>>, vector<1x32x32xbf16>
    %1 = vector.shape_cast %0 : vector<1x32x32xbf16> to vector<32x32xbf16>
    %c0_2 = arith.constant 0 : index
    %c0_3 = arith.constant 0 : index
    %2 = vector.load %arg2[%c0_2, %c0_3] : memref<32x80xbf16, #tpu.memory_space<vmem>>, vector<32x80xbf16>
    %cst = arith.constant dense<0.000000e+00> : vector<32x80xf32>
    %3 = tpu.matmul %1, %2, %cst {dimension_numbers = #tpu.dot_dimension_numbers<[1], [0], [0], [1], [0, 0, 1, 1], [], []>} : vector<32x32xbf16>, vector<32x80xbf16>, vector<32x80xf32> -> vector<32x80xf32>
    %c0_4 = arith.constant 0 : index
    %c0_5 = arith.constant 0 : index
    %4 = vector.load %arg3[%c0_4, %c0_5] : memref<1x80xf32, #tpu.memory_space<vmem>>, vector<1x80xf32>
    %5 = vector.broadcast %4 : vector<1x80xf32> to vector<32x80xf32>
    %6 = arith.addf %3, %5 : vector<32x80xf32>
    %c0_6 = arith.constant 0 : index
    %c0_7 = arith.constant 0 : index
    %c0_8 = arith.constant 0 : index
    %7 = vector.load %arg4[%c0_6, %c0_7, %c0_8] : memref<1x1x80xf32, #tpu.memory_space<vmem>>, vector<1x1x80xf32>
    %8 = vector.shape_cast %7 : vector<1x1x80xf32> to vector<1x80xf32>
    %9 = vector.broadcast %8 : vector<1x80xf32> to vector<32x80xf32>
    %10 = arith.addf %6, %9 : vector<32x80xf32>
    %c0_9 = arith.constant 0 : index
    %c0_10 = arith.constant 0 : index
    %c0_11 = arith.constant 0 : index
    %11 = vector.load %arg5[%c0_9, %c0_10, %c0_11] : memref<1x32x1xf32, #tpu.memory_space<vmem>>, vector<1x32x1xf32>
    %12 = vector.shape_cast %11 : vector<1x32x1xf32> to vector<32x1xf32>
    %13 = vector.broadcast %12 : vector<32x1xf32> to vector<32x80xf32>
    %14 = arith.mulf %10, %13 : vector<32x80xf32>
    %c0_12 = arith.constant 0 : index
    %c0_13 = arith.constant 0 : index
    %c0_14 = arith.constant 0 : index
    %15 = vector.load %arg6[%c0_12, %c0_13, %c0_14] : memref<1x32x80xf32, #tpu.memory_space<vmem>>, vector<1x32x80xf32>
    %16 = vector.shape_cast %15 : vector<1x32x80xf32> to vector<32x80xf32>
    %17 = vector.shape_cast %14 : vector<32x80xf32> to vector<1x32x80xf32>
    tpu.vector_store %arg6[%c0_12, %c0_13, %c0_14], %17 {strides = array<i32>} : memref<1x32x80xf32, #tpu.memory_space<vmem>>, vector<1x32x80xf32>,
    return
  }
  func.func @transform_0(%arg0: i32) -> (i32, i32, i32) {
    %c0_i32 = arith.constant 0 : i32
    %c0_i32_0 = arith.constant 0 : i32
    %c0_i32_1 = arith.constant 0 : i32
    return %arg0, %c0_i32, %c0_i32_0 : i32, i32, i32
  }
  func.func @transform_1(%arg0: i32) -> (i32, i32) {
    %c0_i32 = arith.constant 0 : i32
    %c0_i32_0 = arith.constant 0 : i32
    %c0_i32_1 = arith.constant 0 : i32
    return %c0_i32, %c0_i32_0 : i32, i32
  }
  func.func @transform_2(%arg0: i32) -> (i32, i32) {
    %c0_i32 = arith.constant 0 : i32
    %c0_i32_0 = arith.constant 0 : i32
    %c0_i32_1 = arith.constant 0 : i32
    return %c0_i32, %c0_i32_0 : i32, i32
  }
  func.func @transform_3(%arg0: i32) -> (i32, i32, i32) {
    %c0_i32 = arith.constant 0 : i32
    %c0_i32_0 = arith.constant 0 : i32
    %c0_i32_1 = arith.constant 0 : i32
    return %arg0, %c0_i32, %c0_i32_0 : i32, i32, i32
  }
  func.func @transform_4(%arg0: i32) -> (i32, i32, i32) {
    %c0_i32 = arith.constant 0 : i32
    %c0_i32_0 = arith.constant 0 : i32
    %c0_i32_1 = arith.constant 0 : i32
    return %arg0, %c0_i32, %c0_i32_0 : i32, i32, i32
  }
  func.func @transform_5(%arg0: i32) -> (i32, i32, i32) {
    %c0_i32 = arith.constant 0 : i32
    %c0_i32_0 = arith.constant 0 : i32
    %c0_i32_1 = arith.constant 0 : i32
    return %arg0, %c0_i32, %c0_i32_0 : i32, i32, i32
  }
}

module attributes {stable_mosaic.version = 11 : i64} {
  func.func @_fused_layer_kernel(%arg0: i32, %arg1: memref<1x32x32xbf16, #tpu.memory_space<vmem>>, %arg2: memref<1x32x1xf32, #tpu.memory_space<vmem>>, %arg3: memref<1x1x32xf32, #tpu.memory_space<vmem>>, %arg4: memref<2x32x32xf32, #tpu.memory_space<vmem>>, %arg5: memref<32x96xbf16, #tpu.memory_space<vmem>>, %arg6: memref<1x96xf32, #tpu.memory_space<vmem>>, %arg7: memref<32x32xbf16, #tpu.memory_space<vmem>>, %arg8: memref<1x32xf32, #tpu.memory_space<vmem>>, %arg9: memref<1x32xf32, #tpu.memory_space<vmem>>, %arg10: memref<1x32xf32, #tpu.memory_space<vmem>>, %arg11: memref<96x64xbf16, #tpu.memory_space<vmem>>, %arg12: memref<1x64xf32, #tpu.memory_space<vmem>>, %arg13: memref<192x32xbf16, #tpu.memory_space<vmem>>, %arg14: memref<1x32xf32, #tpu.memory_space<vmem>>, %arg15: memref<1x32xf32, #tpu.memory_space<vmem>>, %arg16: memref<1x32xf32, #tpu.memory_space<vmem>>, %arg17: memref<1x32x32xbf16, #tpu.memory_space<vmem>>) attributes {dimension_semantics = [#tpu.dimension_semantics<parallel>], iteration_bounds = array<i64: 2>, scalar_prefetch = 0 : i64, scratch_operands = 0 : i64, tpu.core_type = #tpu.core_type<tc>, window_params = [{transform_indices = @transform_0, window_bounds = array<i64: 1, 32, 32>}, {transform_indices = @transform_1, window_bounds = array<i64: 1, 32, 1>}, {transform_indices = @transform_2, window_bounds = array<i64: 1, 1, 32>}, {pipeline_mode = #tpu.pipeline_mode<synchronous>, transform_indices = @transform_3, window_bounds = array<i64: 2, 32, 32>}, {pipeline_mode = #tpu.pipeline_mode<synchronous>, transform_indices = @transform_4, window_bounds = array<i64: 32, 96>}, {pipeline_mode = #tpu.pipeline_mode<synchronous>, transform_indices = @transform_5, window_bounds = array<i64: 1, 96>}, {pipeline_mode = #tpu.pipeline_mode<synchronous>, transform_indices = @transform_6, window_bounds = array<i64: 32, 32>}, {pipeline_mode = #tpu.pipeline_mode<synchronous>, transform_indices = @transform_7, window_bounds = array<i64: 1, 32>}, {pipeline_mode = #tpu.pipeline_mode<synchronous>, transform_indices = @transform_8, window_bounds = array<i64: 1, 32>}, {pipeline_mode = #tpu.pipeline_mode<synchronous>, transform_indices = @transform_9, window_bounds = array<i64: 1, 32>}, {pipeline_mode = #tpu.pipeline_mode<synchronous>, transform_indices = @transform_10, window_bounds = array<i64: 96, 64>}, {pipeline_mode = #tpu.pipeline_mode<synchronous>, transform_indices = @transform_11, window_bounds = array<i64: 1, 64>}, {pipeline_mode = #tpu.pipeline_mode<synchronous>, transform_indices = @transform_12, window_bounds = array<i64: 192, 32>}, {pipeline_mode = #tpu.pipeline_mode<synchronous>, transform_indices = @transform_13, window_bounds = array<i64: 1, 32>}, {pipeline_mode = #tpu.pipeline_mode<synchronous>, transform_indices = @transform_14, window_bounds = array<i64: 1, 32>}, {pipeline_mode = #tpu.pipeline_mode<synchronous>, transform_indices = @transform_15, window_bounds = array<i64: 1, 32>}, {transform_indices = @transform_16, window_bounds = array<i64: 1, 32, 32>}]} {
    %c0 = arith.constant 0 : index
    %c0_0 = arith.constant 0 : index
    %c0_1 = arith.constant 0 : index
    %0 = vector.load %arg1[%c0, %c0_0, %c0_1] : memref<1x32x32xbf16, #tpu.memory_space<vmem>>, vector<1x32x32xbf16>
    %1 = vector.shape_cast %0 : vector<1x32x32xbf16> to vector<32x32xbf16>
    %2 = arith.extf %1 : vector<32x32xbf16> to vector<32x32xf32>
    %c0_2 = arith.constant 0 : index
    %c0_3 = arith.constant 0 : index
    %c0_4 = arith.constant 0 : index
    %3 = vector.load %arg2[%c0_2, %c0_3, %c0_4] : memref<1x32x1xf32, #tpu.memory_space<vmem>>, vector<1x32x1xf32>
    %4 = vector.shape_cast %3 : vector<1x32x1xf32> to vector<32x1xf32>
    %c0_5 = arith.constant 0 : index
    %c0_6 = arith.constant 0 : index
    %c0_7 = arith.constant 0 : index
    %5 = vector.load %arg3[%c0_5, %c0_6, %c0_7] : memref<1x1x32xf32, #tpu.memory_space<vmem>>, vector<1x1x32xf32>
    %6 = vector.shape_cast %5 : vector<1x1x32xf32> to vector<1x32xf32>
    %7 = arith.truncf %2 : vector<32x32xf32> to vector<32x32xbf16>
    %c0_8 = arith.constant 0 : index
    %c0_9 = arith.constant 0 : index
    %8 = vector.load %arg5[%c0_8, %c0_9] : memref<32x96xbf16, #tpu.memory_space<vmem>>, vector<32x96xbf16>
    %cst = arith.constant dense<0.000000e+00> : vector<32x96xf32>
    %9 = tpu.matmul %7, %8, %cst {dimension_numbers = #tpu.dot_dimension_numbers<[1], [0], [0], [1], [0, 0, 1, 1], [], []>} : vector<32x32xbf16>, vector<32x96xbf16>, vector<32x96xf32> -> vector<32x96xf32>
    %c0_10 = arith.constant 0 : index
    %c0_11 = arith.constant 0 : index
    %10 = vector.load %arg6[%c0_10, %c0_11] : memref<1x96xf32, #tpu.memory_space<vmem>>, vector<1x96xf32>
    %11 = vector.broadcast %10 : vector<1x96xf32> to vector<32x96xf32>
    %12 = arith.addf %9, %11 : vector<32x96xf32>
    %cst_12 = arith.constant 1.000000e+00 : f32
    %13 = vector.broadcast %cst_12 : f32 to vector<1x32xf32>
    %14 = arith.subf %6, %13 : vector<1x32xf32>
    %cst_13 = arith.constant 1.000000e+09 : f32
    %15 = vector.broadcast %cst_13 : f32 to vector<1x32xf32>
    %16 = arith.mulf %14, %15 : vector<1x32xf32>
    %17 = vector.extract_strided_slice %12 {offsets = [0, 0], sizes = [32, 16], strides = [1, 1]} : vector<32x96xf32> to vector<32x16xf32>
    %cst_14 = arith.constant 2.500000e-01 : f32
    %18 = vector.broadcast %cst_14 : f32 to vector<32x16xf32>
    %19 = arith.mulf %17, %18 : vector<32x16xf32>
    %20 = arith.truncf %19 : vector<32x16xf32> to vector<32x16xbf16>
    %21 = vector.extract_strided_slice %12 {offsets = [0, 32], sizes = [32, 16], strides = [1, 1]} : vector<32x96xf32> to vector<32x16xf32>
    %22 = arith.truncf %21 : vector<32x16xf32> to vector<32x16xbf16>
    %23 = vector.extract_strided_slice %12 {offsets = [0, 64], sizes = [32, 16], strides = [1, 1]} : vector<32x96xf32> to vector<32x16xf32>
    %24 = arith.truncf %23 : vector<32x16xf32> to vector<32x16xbf16>
    %cst_15 = arith.constant dense<0.000000e+00> : vector<32x32xf32>
    %25 = tpu.matmul %20, %22, %cst_15 {dimension_numbers = #tpu.dot_dimension_numbers<[1], [1], [0], [0], [0, 0, 1, 0], [], []>} : vector<32x16xbf16>, vector<32x16xbf16>, vector<32x32xf32> -> vector<32x32xf32>
    %c0_16 = arith.constant 0 : index
    %c0_17 = arith.constant 0 : index
    %c0_18 = arith.constant 0 : index
    %26 = vector.load %arg4[%c0_16, %c0_17, %c0_18] : memref<2x32x32xf32, #tpu.memory_space<vmem>>, vector<1x32x32xf32>
    %27 = vector.shape_cast %26 : vector<1x32x32xf32> to vector<32x32xf32>
    %28 = arith.addf %25, %27 : vector<32x32xf32>
    %29 = vector.broadcast %16 : vector<1x32xf32> to vector<32x32xf32>
    %30 = arith.addf %28, %29 : vector<32x32xf32>
    %cst_19 = arith.constant dense<0xFF800000> : vector<32xf32>
    %31 = vector.multi_reduction <maximumf>, %30, %cst_19 [1] : vector<32x32xf32> to vector<32xf32>
    %32 = vector.shape_cast %31 : vector<32xf32> to vector<32x1xf32>
    %33 = vector.broadcast %32 : vector<32x1xf32> to vector<32x32xf32>
    %34 = arith.subf %30, %33 : vector<32x32xf32>
    %35 = math.exp %34 : vector<32x32xf32>
    %cst_20 = arith.constant dense<0.000000e+00> : vector<32xf32>
    %36 = vector.multi_reduction <add>, %35, %cst_20 [1] : vector<32x32xf32> to vector<32xf32>
    %37 = vector.shape_cast %36 : vector<32xf32> to vector<32x1xf32>
    %38 = tpu.reciprocal %37 {approx = true} : vector<32x1xf32> -> vector<32x1xf32>
    %39 = vector.broadcast %38 : vector<32x1xf32> to vector<32x32xf32>
    %40 = arith.mulf %35, %39 : vector<32x32xf32>
    %41 = arith.truncf %40 : vector<32x32xf32> to vector<32x32xbf16>
    %cst_21 = arith.constant dense<0.000000e+00> : vector<32x16xf32>
    %42 = tpu.matmul %41, %24, %cst_21 {dimension_numbers = #tpu.dot_dimension_numbers<[1], [0], [0], [1], [0, 0, 1, 1], [], []>} : vector<32x32xbf16>, vector<32x16xbf16>, vector<32x16xf32> -> vector<32x16xf32>
    %43 = vector.extract_strided_slice %12 {offsets = [0, 16], sizes = [32, 16], strides = [1, 1]} : vector<32x96xf32> to vector<32x16xf32>
    %cst_22 = arith.constant 2.500000e-01 : f32
    %44 = vector.broadcast %cst_22 : f32 to vector<32x16xf32>
    %45 = arith.mulf %43, %44 : vector<32x16xf32>
    %46 = arith.truncf %45 : vector<32x16xf32> to vector<32x16xbf16>
    %47 = vector.extract_strided_slice %12 {offsets = [0, 48], sizes = [32, 16], strides = [1, 1]} : vector<32x96xf32> to vector<32x16xf32>
    %48 = arith.truncf %47 : vector<32x16xf32> to vector<32x16xbf16>
    %49 = vector.extract_strided_slice %12 {offsets = [0, 80], sizes = [32, 16], strides = [1, 1]} : vector<32x96xf32> to vector<32x16xf32>
    %50 = arith.truncf %49 : vector<32x16xf32> to vector<32x16xbf16>
    %cst_23 = arith.constant dense<0.000000e+00> : vector<32x32xf32>
    %51 = tpu.matmul %46, %48, %cst_23 {dimension_numbers = #tpu.dot_dimension_numbers<[1], [1], [0], [0], [0, 0, 1, 0], [], []>} : vector<32x16xbf16>, vector<32x16xbf16>, vector<32x32xf32> -> vector<32x32xf32>
    %c1 = arith.constant 1 : index
    %c0_24 = arith.constant 0 : index
    %c0_25 = arith.constant 0 : index
    %52 = vector.load %arg4[%c1, %c0_24, %c0_25] : memref<2x32x32xf32, #tpu.memory_space<vmem>>, vector<1x32x32xf32>
    %53 = vector.shape_cast %52 : vector<1x32x32xf32> to vector<32x32xf32>
    %54 = arith.addf %51, %53 : vector<32x32xf32>
    %55 = vector.broadcast %16 : vector<1x32xf32> to vector<32x32xf32>
    %56 = arith.addf %54, %55 : vector<32x32xf32>
    %cst_26 = arith.constant dense<0xFF800000> : vector<32xf32>
    %57 = vector.multi_reduction <maximumf>, %56, %cst_26 [1] : vector<32x32xf32> to vector<32xf32>
    %58 = vector.shape_cast %57 : vector<32xf32> to vector<32x1xf32>
    %59 = vector.broadcast %58 : vector<32x1xf32> to vector<32x32xf32>
    %60 = arith.subf %56, %59 : vector<32x32xf32>
    %61 = math.exp %60 : vector<32x32xf32>
    %cst_27 = arith.constant dense<0.000000e+00> : vector<32xf32>
    %62 = vector.multi_reduction <add>, %61, %cst_27 [1] : vector<32x32xf32> to vector<32xf32>
    %63 = vector.shape_cast %62 : vector<32xf32> to vector<32x1xf32>
    %64 = tpu.reciprocal %63 {approx = true} : vector<32x1xf32> -> vector<32x1xf32>
    %65 = vector.broadcast %64 : vector<32x1xf32> to vector<32x32xf32>
    %66 = arith.mulf %61, %65 : vector<32x32xf32>
    %67 = arith.truncf %66 : vector<32x32xf32> to vector<32x32xbf16>
    %cst_28 = arith.constant dense<0.000000e+00> : vector<32x16xf32>
    %68 = tpu.matmul %67, %50, %cst_28 {dimension_numbers = #tpu.dot_dimension_numbers<[1], [0], [0], [1], [0, 0, 1, 1], [], []>} : vector<32x32xbf16>, vector<32x16xbf16>, vector<32x16xf32> -> vector<32x16xf32>
    %69 = tpu.concatenate %42, %68 in 1 : vector<32x16xf32>, vector<32x16xf32> -> vector<32x32xf32>
    %70 = arith.truncf %69 : vector<32x32xf32> to vector<32x32xbf16>
    %c0_29 = arith.constant 0 : index
    %c0_30 = arith.constant 0 : index
    %71 = vector.load %arg7[%c0_29, %c0_30] : memref<32x32xbf16, #tpu.memory_space<vmem>>, vector<32x32xbf16>
    %cst_31 = arith.constant dense<0.000000e+00> : vector<32x32xf32>
    %72 = tpu.matmul %70, %71, %cst_31 {dimension_numbers = #tpu.dot_dimension_numbers<[1], [0], [0], [1], [0, 0, 1, 1], [], []>} : vector<32x32xbf16>, vector<32x32xbf16>, vector<32x32xf32> -> vector<32x32xf32>
    %c0_32 = arith.constant 0 : index
    %c0_33 = arith.constant 0 : index
    %73 = vector.load %arg8[%c0_32, %c0_33] : memref<1x32xf32, #tpu.memory_space<vmem>>, vector<1x32xf32>
    %74 = vector.broadcast %73 : vector<1x32xf32> to vector<32x32xf32>
    %75 = arith.addf %72, %74 : vector<32x32xf32>
    %76 = vector.broadcast %4 : vector<32x1xf32> to vector<32x32xf32>
    %77 = arith.mulf %75, %76 : vector<32x32xf32>
    %78 = arith.addf %2, %77 : vector<32x32xf32>
    %c0_34 = arith.constant 0 : index
    %c0_35 = arith.constant 0 : index
    %79 = vector.load %arg9[%c0_34, %c0_35] : memref<1x32xf32, #tpu.memory_space<vmem>>, vector<1x32xf32>
    %c0_36 = arith.constant 0 : index
    %c0_37 = arith.constant 0 : index
    %80 = vector.load %arg10[%c0_36, %c0_37] : memref<1x32xf32, #tpu.memory_space<vmem>>, vector<1x32xf32>
    %cst_38 = arith.constant dense<0.000000e+00> : vector<32xf32>
    %81 = vector.multi_reduction <add>, %78, %cst_38 [1] : vector<32x32xf32> to vector<32xf32>
    %82 = vector.shape_cast %81 : vector<32xf32> to vector<32x1xf32>
    %cst_39 = arith.constant 3.200000e+01 : f32
    %83 = vector.broadcast %cst_39 : f32 to vector<32x1xf32>
    %84 = arith.divf %82, %83 : vector<32x1xf32>
    %85 = vector.broadcast %84 : vector<32x1xf32> to vector<32x32xf32>
    %86 = arith.subf %78, %85 : vector<32x32xf32>
    %87 = arith.mulf %86, %86 : vector<32x32xf32>
    %cst_40 = arith.constant dense<0.000000e+00> : vector<32xf32>
    %88 = vector.multi_reduction <add>, %87, %cst_40 [1] : vector<32x32xf32> to vector<32xf32>
    %89 = vector.shape_cast %88 : vector<32xf32> to vector<32x1xf32>
    %cst_41 = arith.constant 3.200000e+01 : f32
    %90 = vector.broadcast %cst_41 : f32 to vector<32x1xf32>
    %91 = arith.divf %89, %90 : vector<32x1xf32>
    %92 = vector.broadcast %84 : vector<32x1xf32> to vector<32x32xf32>
    %93 = arith.subf %78, %92 : vector<32x32xf32>
    %cst_42 = arith.constant 9.99999974E-6 : f32
    %94 = vector.broadcast %cst_42 : f32 to vector<32x1xf32>
    %95 = arith.addf %91, %94 : vector<32x1xf32>
    %96 = math.rsqrt %95 : vector<32x1xf32>
    %97 = vector.broadcast %96 : vector<32x1xf32> to vector<32x32xf32>
    %98 = arith.mulf %93, %97 : vector<32x32xf32>
    %99 = vector.broadcast %79 : vector<1x32xf32> to vector<32x32xf32>
    %100 = arith.mulf %98, %99 : vector<32x32xf32>
    %101 = vector.broadcast %80 : vector<1x32xf32> to vector<32x32xf32>
    %102 = arith.addf %100, %101 : vector<32x32xf32>
    %103 = vector.broadcast %4 : vector<32x1xf32> to vector<32x32xf32>
    %104 = arith.mulf %102, %103 : vector<32x32xf32>
    %105 = tpu.iota {dimensions = array<i32: 0>} : vector<32x32xi32>
    %106 = tpu.iota {dimensions = array<i32: 1>} : vector<32x32xi32>
    %c-1_i32 = arith.constant -1 : i32
    %107 = vector.broadcast %c-1_i32 : i32 to vector<32x32xi32>
    %108 = arith.addi %105, %107 : vector<32x32xi32>
    %109 = arith.cmpi eq, %106, %108 : vector<32x32xi32>
    %110 = arith.extui %109 : vector<32x32xi1> to vector<32x32xi32>
    %111 = arith.sitofp %110 : vector<32x32xi32> to vector<32x32xf32>
    %cst_43 = arith.constant dense<0.000000e+00> : vector<32x32xf32>
    %112 = tpu.matmul %111, %104, %cst_43 {dimension_numbers = #tpu.dot_dimension_numbers<[1], [0], [0], [1], [0, 0, 1, 1], [], []>} : vector<32x32xf32>, vector<32x32xf32>, vector<32x32xf32> -> vector<32x32xf32>
    %c1_i32 = arith.constant 1 : i32
    %113 = vector.broadcast %c1_i32 : i32 to vector<32x32xi32>
    %114 = arith.addi %105, %113 : vector<32x32xi32>
    %115 = arith.cmpi eq, %106, %114 : vector<32x32xi32>
    %116 = arith.extui %115 : vector<32x32xi1> to vector<32x32xi32>
    %117 = arith.sitofp %116 : vector<32x32xi32> to vector<32x32xf32>
    %cst_44 = arith.constant dense<0.000000e+00> : vector<32x32xf32>
    %118 = tpu.matmul %117, %104, %cst_44 {dimension_numbers = #tpu.dot_dimension_numbers<[1], [0], [0], [1], [0, 0, 1, 1], [], []>} : vector<32x32xf32>, vector<32x32xf32>, vector<32x32xf32> -> vector<32x32xf32>
    %119 = tpu.concatenate %112, %104, %118 in 1 : vector<32x32xf32>, vector<32x32xf32>, vector<32x32xf32> -> vector<32x96xf32>
    %120 = arith.truncf %119 : vector<32x96xf32> to vector<32x96xbf16>
    %c0_45 = arith.constant 0 : index
    %c0_46 = arith.constant 0 : index
    %121 = vector.load %arg11[%c0_45, %c0_46] : memref<96x64xbf16, #tpu.memory_space<vmem>>, vector<96x64xbf16>
    %cst_47 = arith.constant dense<0.000000e+00> : vector<32x64xf32>
    %122 = tpu.matmul %120, %121, %cst_47 {dimension_numbers = #tpu.dot_dimension_numbers<[1], [0], [0], [1], [0, 0, 1, 1], [], []>} : vector<32x96xbf16>, vector<96x64xbf16>, vector<32x64xf32> -> vector<32x64xf32>
    %c0_48 = arith.constant 0 : index
    %c0_49 = arith.constant 0 : index
    %123 = vector.load %arg12[%c0_48, %c0_49] : memref<1x64xf32, #tpu.memory_space<vmem>>, vector<1x64xf32>
    %124 = vector.broadcast %123 : vector<1x64xf32> to vector<32x64xf32>
    %125 = arith.addf %122, %124 : vector<32x64xf32>
    %cst_50 = arith.constant 0.000000e+00 : f32
    %126 = vector.broadcast %cst_50 : f32 to vector<32x64xf32>
    %127 = arith.maximumf %125, %126 : vector<32x64xf32>
    %128 = vector.broadcast %4 : vector<32x1xf32> to vector<32x64xf32>
    %129 = arith.mulf %127, %128 : vector<32x64xf32>
    %130 = tpu.iota {dimensions = array<i32: 0>} : vector<32x32xi32>
    %131 = tpu.iota {dimensions = array<i32: 1>} : vector<32x32xi32>
    %c-1_i32_51 = arith.constant -1 : i32
    %132 = vector.broadcast %c-1_i32_51 : i32 to vector<32x32xi32>
    %133 = arith.addi %130, %132 : vector<32x32xi32>
    %134 = arith.cmpi eq, %131, %133 : vector<32x32xi32>
    %135 = arith.extui %134 : vector<32x32xi1> to vector<32x32xi32>
    %136 = arith.sitofp %135 : vector<32x32xi32> to vector<32x32xf32>
    %cst_52 = arith.constant dense<0.000000e+00> : vector<32x64xf32>
    %137 = tpu.matmul %136, %129, %cst_52 {dimension_numbers = #tpu.dot_dimension_numbers<[1], [0], [0], [1], [0, 0, 1, 1], [], []>} : vector<32x32xf32>, vector<32x64xf32>, vector<32x64xf32> -> vector<32x64xf32>
    %c1_i32_53 = arith.constant 1 : i32
    %138 = vector.broadcast %c1_i32_53 : i32 to vector<32x32xi32>
    %139 = arith.addi %130, %138 : vector<32x32xi32>
    %140 = arith.cmpi eq, %131, %139 : vector<32x32xi32>
    %141 = arith.extui %140 : vector<32x32xi1> to vector<32x32xi32>
    %142 = arith.sitofp %141 : vector<32x32xi32> to vector<32x32xf32>
    %cst_54 = arith.constant dense<0.000000e+00> : vector<32x64xf32>
    %143 = tpu.matmul %142, %129, %cst_54 {dimension_numbers = #tpu.dot_dimension_numbers<[1], [0], [0], [1], [0, 0, 1, 1], [], []>} : vector<32x32xf32>, vector<32x64xf32>, vector<32x64xf32> -> vector<32x64xf32>
    %144 = tpu.concatenate %137, %129, %143 in 1 : vector<32x64xf32>, vector<32x64xf32>, vector<32x64xf32> -> vector<32x192xf32>
    %145 = arith.truncf %144 : vector<32x192xf32> to vector<32x192xbf16>
    %c0_55 = arith.constant 0 : index
    %c0_56 = arith.constant 0 : index
    %146 = vector.load %arg13[%c0_55, %c0_56] : memref<192x32xbf16, #tpu.memory_space<vmem>>, vector<192x32xbf16>
    %cst_57 = arith.constant dense<0.000000e+00> : vector<32x32xf32>
    %147 = tpu.matmul %145, %146, %cst_57 {dimension_numbers = #tpu.dot_dimension_numbers<[1], [0], [0], [1], [0, 0, 1, 1], [], []>} : vector<32x192xbf16>, vector<192x32xbf16>, vector<32x32xf32> -> vector<32x32xf32>
    %c0_58 = arith.constant 0 : index
    %c0_59 = arith.constant 0 : index
    %148 = vector.load %arg14[%c0_58, %c0_59] : memref<1x32xf32, #tpu.memory_space<vmem>>, vector<1x32xf32>
    %149 = vector.broadcast %148 : vector<1x32xf32> to vector<32x32xf32>
    %150 = arith.addf %147, %149 : vector<32x32xf32>
    %151 = vector.broadcast %4 : vector<32x1xf32> to vector<32x32xf32>
    %152 = arith.mulf %150, %151 : vector<32x32xf32>
    %153 = arith.addf %104, %152 : vector<32x32xf32>
    %c0_60 = arith.constant 0 : index
    %c0_61 = arith.constant 0 : index
    %154 = vector.load %arg15[%c0_60, %c0_61] : memref<1x32xf32, #tpu.memory_space<vmem>>, vector<1x32xf32>
    %c0_62 = arith.constant 0 : index
    %c0_63 = arith.constant 0 : index
    %155 = vector.load %arg16[%c0_62, %c0_63] : memref<1x32xf32, #tpu.memory_space<vmem>>, vector<1x32xf32>
    %cst_64 = arith.constant dense<0.000000e+00> : vector<32xf32>
    %156 = vector.multi_reduction <add>, %153, %cst_64 [1] : vector<32x32xf32> to vector<32xf32>
    %157 = vector.shape_cast %156 : vector<32xf32> to vector<32x1xf32>
    %cst_65 = arith.constant 3.200000e+01 : f32
    %158 = vector.broadcast %cst_65 : f32 to vector<32x1xf32>
    %159 = arith.divf %157, %158 : vector<32x1xf32>
    %160 = vector.broadcast %159 : vector<32x1xf32> to vector<32x32xf32>
    %161 = arith.subf %153, %160 : vector<32x32xf32>
    %162 = arith.mulf %161, %161 : vector<32x32xf32>
    %cst_66 = arith.constant dense<0.000000e+00> : vector<32xf32>
    %163 = vector.multi_reduction <add>, %162, %cst_66 [1] : vector<32x32xf32> to vector<32xf32>
    %164 = vector.shape_cast %163 : vector<32xf32> to vector<32x1xf32>
    %cst_67 = arith.constant 3.200000e+01 : f32
    %165 = vector.broadcast %cst_67 : f32 to vector<32x1xf32>
    %166 = arith.divf %164, %165 : vector<32x1xf32>
    %167 = vector.broadcast %159 : vector<32x1xf32> to vector<32x32xf32>
    %168 = arith.subf %153, %167 : vector<32x32xf32>
    %cst_68 = arith.constant 9.99999974E-6 : f32
    %169 = vector.broadcast %cst_68 : f32 to vector<32x1xf32>
    %170 = arith.addf %166, %169 : vector<32x1xf32>
    %171 = math.rsqrt %170 : vector<32x1xf32>
    %172 = vector.broadcast %171 : vector<32x1xf32> to vector<32x32xf32>
    %173 = arith.mulf %168, %172 : vector<32x32xf32>
    %174 = vector.broadcast %154 : vector<1x32xf32> to vector<32x32xf32>
    %175 = arith.mulf %173, %174 : vector<32x32xf32>
    %176 = vector.broadcast %155 : vector<1x32xf32> to vector<32x32xf32>
    %177 = arith.addf %175, %176 : vector<32x32xf32>
    %178 = vector.broadcast %4 : vector<32x1xf32> to vector<32x32xf32>
    %179 = arith.mulf %177, %178 : vector<32x32xf32>
    %180 = arith.truncf %179 : vector<32x32xf32> to vector<32x32xbf16>
    %c0_69 = arith.constant 0 : index
    %c0_70 = arith.constant 0 : index
    %c0_71 = arith.constant 0 : index
    %181 = vector.load %arg17[%c0_69, %c0_70, %c0_71] : memref<1x32x32xbf16, #tpu.memory_space<vmem>>, vector<1x32x32xbf16>
    %182 = vector.shape_cast %181 : vector<1x32x32xbf16> to vector<32x32xbf16>
    %183 = vector.shape_cast %180 : vector<32x32xbf16> to vector<1x32x32xbf16>
    tpu.vector_store %arg17[%c0_69, %c0_70, %c0_71], %183 {strides = array<i32>} : memref<1x32x32xbf16, #tpu.memory_space<vmem>>, vector<1x32x32xbf16>,
    return
  }
  func.func @transform_0(%arg0: i32) -> (i32, i32, i32) {
    %c0_i32 = arith.constant 0 : i32
    %c0_i32_0 = arith.constant 0 : i32
    %c0_i32_1 = arith.constant 0 : i32
    return %arg0, %c0_i32, %c0_i32_0 : i32, i32, i32
  }
  func.func @transform_1(%arg0: i32) -> (i32, i32, i32) {
    %c0_i32 = arith.constant 0 : i32
    %c0_i32_0 = arith.constant 0 : i32
    %c0_i32_1 = arith.constant 0 : i32
    return %arg0, %c0_i32, %c0_i32_0 : i32, i32, i32
  }
  func.func @transform_2(%arg0: i32) -> (i32, i32, i32) {
    %c0_i32 = arith.constant 0 : i32
    %c0_i32_0 = arith.constant 0 : i32
    %c0_i32_1 = arith.constant 0 : i32
    return %arg0, %c0_i32, %c0_i32_0 : i32, i32, i32
  }
  func.func @transform_3(%arg0: i32) -> (i32, i32, i32) {
    %c0_i32 = arith.constant 0 : i32
    %c0_i32_0 = arith.constant 0 : i32
    %c0_i32_1 = arith.constant 0 : i32
    %c0_i32_2 = arith.constant 0 : i32
    return %c0_i32, %c0_i32_0, %c0_i32_1 : i32, i32, i32
  }
  func.func @transform_4(%arg0: i32) -> (i32, i32) {
    %c0_i32 = arith.constant 0 : i32
    %c0_i32_0 = arith.constant 0 : i32
    %c0_i32_1 = arith.constant 0 : i32
    return %c0_i32, %c0_i32_0 : i32, i32
  }
  func.func @transform_5(%arg0: i32) -> (i32, i32) {
    %c0_i32 = arith.constant 0 : i32
    %c0_i32_0 = arith.constant 0 : i32
    %c0_i32_1 = arith.constant 0 : i32
    return %c0_i32, %c0_i32_0 : i32, i32
  }
  func.func @transform_6(%arg0: i32) -> (i32, i32) {
    %c0_i32 = arith.constant 0 : i32
    %c0_i32_0 = arith.constant 0 : i32
    %c0_i32_1 = arith.constant 0 : i32
    return %c0_i32, %c0_i32_0 : i32, i32
  }
  func.func @transform_7(%arg0: i32) -> (i32, i32) {
    %c0_i32 = arith.constant 0 : i32
    %c0_i32_0 = arith.constant 0 : i32
    %c0_i32_1 = arith.constant 0 : i32
    return %c0_i32, %c0_i32_0 : i32, i32
  }
  func.func @transform_8(%arg0: i32) -> (i32, i32) {
    %c0_i32 = arith.constant 0 : i32
    %c0_i32_0 = arith.constant 0 : i32
    %c0_i32_1 = arith.constant 0 : i32
    return %c0_i32, %c0_i32_0 : i32, i32
  }
  func.func @transform_9(%arg0: i32) -> (i32, i32) {
    %c0_i32 = arith.constant 0 : i32
    %c0_i32_0 = arith.constant 0 : i32
    %c0_i32_1 = arith.constant 0 : i32
    return %c0_i32, %c0_i32_0 : i32, i32
  }
  func.func @transform_10(%arg0: i32) -> (i32, i32) {
    %c0_i32 = arith.constant 0 : i32
    %c0_i32_0 = arith.constant 0 : i32
    %c0_i32_1 = arith.constant 0 : i32
    return %c0_i32, %c0_i32_0 : i32, i32
  }
  func.func @transform_11(%arg0: i32) -> (i32, i32) {
    %c0_i32 = arith.constant 0 : i32
    %c0_i32_0 = arith.constant 0 : i32
    %c0_i32_1 = arith.constant 0 : i32
    return %c0_i32, %c0_i32_0 : i32, i32
  }
  func.func @transform_12(%arg0: i32) -> (i32, i32) {
    %c0_i32 = arith.constant 0 : i32
    %c0_i32_0 = arith.constant 0 : i32
    %c0_i32_1 = arith.constant 0 : i32
    return %c0_i32, %c0_i32_0 : i32, i32
  }
  func.func @transform_13(%arg0: i32) -> (i32, i32) {
    %c0_i32 = arith.constant 0 : i32
    %c0_i32_0 = arith.constant 0 : i32
    %c0_i32_1 = arith.constant 0 : i32
    return %c0_i32, %c0_i32_0 : i32, i32
  }
  func.func @transform_14(%arg0: i32) -> (i32, i32) {
    %c0_i32 = arith.constant 0 : i32
    %c0_i32_0 = arith.constant 0 : i32
    %c0_i32_1 = arith.constant 0 : i32
    return %c0_i32, %c0_i32_0 : i32, i32
  }
  func.func @transform_15(%arg0: i32) -> (i32, i32) {
    %c0_i32 = arith.constant 0 : i32
    %c0_i32_0 = arith.constant 0 : i32
    %c0_i32_1 = arith.constant 0 : i32
    return %c0_i32, %c0_i32_0 : i32, i32
  }
  func.func @transform_16(%arg0: i32) -> (i32, i32, i32) {
    %c0_i32 = arith.constant 0 : i32
    %c0_i32_0 = arith.constant 0 : i32
    %c0_i32_1 = arith.constant 0 : i32
    return %arg0, %c0_i32, %c0_i32_0 : i32, i32, i32
  }
}

module attributes {stable_mosaic.version = 11 : i64} {
  func.func @_vpred_kernel(%arg0: i32, %arg1: memref<1x8x32xbf16, #tpu.memory_space<vmem>>, %arg2: memref<1x8x1xf32, #tpu.memory_space<vmem>>, %arg3: memref<96x32xbf16, #tpu.memory_space<vmem>>, %arg4: memref<1x32xf32, #tpu.memory_space<vmem>>, %arg5: memref<1x32xf32, #tpu.memory_space<vmem>>, %arg6: memref<1x32xf32, #tpu.memory_space<vmem>>, %arg7: memref<96x32xbf16, #tpu.memory_space<vmem>>, %arg8: memref<1x32xf32, #tpu.memory_space<vmem>>, %arg9: memref<1x32xf32, #tpu.memory_space<vmem>>, %arg10: memref<1x32xf32, #tpu.memory_space<vmem>>, %arg11: memref<32x1xbf16, #tpu.memory_space<vmem>>, %arg12: memref<1x1xf32, #tpu.memory_space<vmem>>, %arg13: memref<1x8x1xf32, #tpu.memory_space<vmem>>) attributes {dimension_semantics = [#tpu.dimension_semantics<parallel>], iteration_bounds = array<i64: 2>, scalar_prefetch = 0 : i64, scratch_operands = 0 : i64, tpu.core_type = #tpu.core_type<tc>, window_params = [{transform_indices = @transform_0, window_bounds = array<i64: 1, 8, 32>}, {transform_indices = @transform_1, window_bounds = array<i64: 1, 8, 1>}, {pipeline_mode = #tpu.pipeline_mode<synchronous>, transform_indices = @transform_2, window_bounds = array<i64: 96, 32>}, {pipeline_mode = #tpu.pipeline_mode<synchronous>, transform_indices = @transform_3, window_bounds = array<i64: 1, 32>}, {pipeline_mode = #tpu.pipeline_mode<synchronous>, transform_indices = @transform_4, window_bounds = array<i64: 1, 32>}, {pipeline_mode = #tpu.pipeline_mode<synchronous>, transform_indices = @transform_5, window_bounds = array<i64: 1, 32>}, {pipeline_mode = #tpu.pipeline_mode<synchronous>, transform_indices = @transform_6, window_bounds = array<i64: 96, 32>}, {pipeline_mode = #tpu.pipeline_mode<synchronous>, transform_indices = @transform_7, window_bounds = array<i64: 1, 32>}, {pipeline_mode = #tpu.pipeline_mode<synchronous>, transform_indices = @transform_8, window_bounds = array<i64: 1, 32>}, {pipeline_mode = #tpu.pipeline_mode<synchronous>, transform_indices = @transform_9, window_bounds = array<i64: 1, 32>}, {pipeline_mode = #tpu.pipeline_mode<synchronous>, transform_indices = @transform_10, window_bounds = array<i64: 32, 1>}, {pipeline_mode = #tpu.pipeline_mode<synchronous>, transform_indices = @transform_11, window_bounds = array<i64: 1, 1>}, {transform_indices = @transform_12, window_bounds = array<i64: 1, 8, 1>}]} {
    %c0 = arith.constant 0 : index
    %c0_0 = arith.constant 0 : index
    %c0_1 = arith.constant 0 : index
    %0 = vector.load %arg2[%c0, %c0_0, %c0_1] : memref<1x8x1xf32, #tpu.memory_space<vmem>>, vector<1x8x1xf32>
    %1 = vector.shape_cast %0 : vector<1x8x1xf32> to vector<8x1xf32>
    %c0_2 = arith.constant 0 : index
    %c0_3 = arith.constant 0 : index
    %c0_4 = arith.constant 0 : index
    %2 = vector.load %arg1[%c0_2, %c0_3, %c0_4] : memref<1x8x32xbf16, #tpu.memory_space<vmem>>, vector<1x8x32xbf16>
    %3 = vector.shape_cast %2 : vector<1x8x32xbf16> to vector<8x32xbf16>
    %4 = arith.extf %3 : vector<8x32xbf16> to vector<8x32xf32>
    %5 = vector.broadcast %1 : vector<8x1xf32> to vector<8x32xf32>
    %6 = arith.mulf %4, %5 : vector<8x32xf32>
    %7 = tpu.iota {dimensions = array<i32: 0>} : vector<8x8xi32>
    %8 = tpu.iota {dimensions = array<i32: 1>} : vector<8x8xi32>
    %c-1_i32 = arith.constant -1 : i32
    %9 = vector.broadcast %c-1_i32 : i32 to vector<8x8xi32>
    %10 = arith.addi %7, %9 : vector<8x8xi32>
    %11 = arith.cmpi eq, %8, %10 : vector<8x8xi32>
    %12 = arith.extui %11 : vector<8x8xi1> to vector<8x8xi32>
    %13 = arith.sitofp %12 : vector<8x8xi32> to vector<8x8xf32>
    %cst = arith.constant dense<0.000000e+00> : vector<8x32xf32>
    %14 = tpu.matmul %13, %6, %cst {dimension_numbers = #tpu.dot_dimension_numbers<[1], [0], [0], [1], [0, 0, 1, 1], [], []>} : vector<8x8xf32>, vector<8x32xf32>, vector<8x32xf32> -> vector<8x32xf32>
    %c1_i32 = arith.constant 1 : i32
    %15 = vector.broadcast %c1_i32 : i32 to vector<8x8xi32>
    %16 = arith.addi %7, %15 : vector<8x8xi32>
    %17 = arith.cmpi eq, %8, %16 : vector<8x8xi32>
    %18 = arith.extui %17 : vector<8x8xi1> to vector<8x8xi32>
    %19 = arith.sitofp %18 : vector<8x8xi32> to vector<8x8xf32>
    %cst_5 = arith.constant dense<0.000000e+00> : vector<8x32xf32>
    %20 = tpu.matmul %19, %6, %cst_5 {dimension_numbers = #tpu.dot_dimension_numbers<[1], [0], [0], [1], [0, 0, 1, 1], [], []>} : vector<8x8xf32>, vector<8x32xf32>, vector<8x32xf32> -> vector<8x32xf32>
    %21 = tpu.concatenate %14, %6, %20 in 1 : vector<8x32xf32>, vector<8x32xf32>, vector<8x32xf32> -> vector<8x96xf32>
    %22 = arith.truncf %21 : vector<8x96xf32> to vector<8x96xbf16>
    %c0_6 = arith.constant 0 : index
    %c0_7 = arith.constant 0 : index
    %23 = vector.load %arg3[%c0_6, %c0_7] : memref<96x32xbf16, #tpu.memory_space<vmem>>, vector<96x32xbf16>
    %cst_8 = arith.constant dense<0.000000e+00> : vector<8x32xf32>
    %24 = tpu.matmul %22, %23, %cst_8 {dimension_numbers = #tpu.dot_dimension_numbers<[1], [0], [0], [1], [0, 0, 1, 1], [], []>} : vector<8x96xbf16>, vector<96x32xbf16>, vector<8x32xf32> -> vector<8x32xf32>
    %c0_9 = arith.constant 0 : index
    %c0_10 = arith.constant 0 : index
    %25 = vector.load %arg4[%c0_9, %c0_10] : memref<1x32xf32, #tpu.memory_space<vmem>>, vector<1x32xf32>
    %26 = vector.broadcast %25 : vector<1x32xf32> to vector<8x32xf32>
    %27 = arith.addf %24, %26 : vector<8x32xf32>
    %cst_11 = arith.constant 0.000000e+00 : f32
    %28 = vector.broadcast %cst_11 : f32 to vector<8x32xf32>
    %29 = arith.maximumf %27, %28 : vector<8x32xf32>
    %c0_12 = arith.constant 0 : index
    %c0_13 = arith.constant 0 : index
    %30 = vector.load %arg5[%c0_12, %c0_13] : memref<1x32xf32, #tpu.memory_space<vmem>>, vector<1x32xf32>
    %c0_14 = arith.constant 0 : index
    %c0_15 = arith.constant 0 : index
    %31 = vector.load %arg6[%c0_14, %c0_15] : memref<1x32xf32, #tpu.memory_space<vmem>>, vector<1x32xf32>
    %cst_16 = arith.constant dense<0.000000e+00> : vector<8xf32>
    %32 = vector.multi_reduction <add>, %29, %cst_16 [1] : vector<8x32xf32> to vector<8xf32>
    %33 = vector.shape_cast %32 : vector<8xf32> to vector<8x1xf32>
    %cst_17 = arith.constant 3.200000e+01 : f32
    %34 = vector.broadcast %cst_17 : f32 to vector<8x1xf32>
    %35 = arith.divf %33, %34 : vector<8x1xf32>
    %36 = vector.broadcast %35 : vector<8x1xf32> to vector<8x32xf32>
    %37 = arith.subf %29, %36 : vector<8x32xf32>
    %38 = arith.mulf %37, %37 : vector<8x32xf32>
    %cst_18 = arith.constant dense<0.000000e+00> : vector<8xf32>
    %39 = vector.multi_reduction <add>, %38, %cst_18 [1] : vector<8x32xf32> to vector<8xf32>
    %40 = vector.shape_cast %39 : vector<8xf32> to vector<8x1xf32>
    %cst_19 = arith.constant 3.200000e+01 : f32
    %41 = vector.broadcast %cst_19 : f32 to vector<8x1xf32>
    %42 = arith.divf %40, %41 : vector<8x1xf32>
    %43 = vector.broadcast %35 : vector<8x1xf32> to vector<8x32xf32>
    %44 = arith.subf %29, %43 : vector<8x32xf32>
    %cst_20 = arith.constant 9.99999974E-6 : f32
    %45 = vector.broadcast %cst_20 : f32 to vector<8x1xf32>
    %46 = arith.addf %42, %45 : vector<8x1xf32>
    %47 = math.rsqrt %46 : vector<8x1xf32>
    %48 = vector.broadcast %47 : vector<8x1xf32> to vector<8x32xf32>
    %49 = arith.mulf %44, %48 : vector<8x32xf32>
    %50 = vector.broadcast %30 : vector<1x32xf32> to vector<8x32xf32>
    %51 = arith.mulf %49, %50 : vector<8x32xf32>
    %52 = vector.broadcast %31 : vector<1x32xf32> to vector<8x32xf32>
    %53 = arith.addf %51, %52 : vector<8x32xf32>
    %54 = vector.broadcast %1 : vector<8x1xf32> to vector<8x32xf32>
    %55 = arith.mulf %53, %54 : vector<8x32xf32>
    %56 = tpu.iota {dimensions = array<i32: 0>} : vector<8x8xi32>
    %57 = tpu.iota {dimensions = array<i32: 1>} : vector<8x8xi32>
    %c-1_i32_21 = arith.constant -1 : i32
    %58 = vector.broadcast %c-1_i32_21 : i32 to vector<8x8xi32>
    %59 = arith.addi %56, %58 : vector<8x8xi32>
    %60 = arith.cmpi eq, %57, %59 : vector<8x8xi32>
    %61 = arith.extui %60 : vector<8x8xi1> to vector<8x8xi32>
    %62 = arith.sitofp %61 : vector<8x8xi32> to vector<8x8xf32>
    %cst_22 = arith.constant dense<0.000000e+00> : vector<8x32xf32>
    %63 = tpu.matmul %62, %55, %cst_22 {dimension_numbers = #tpu.dot_dimension_numbers<[1], [0], [0], [1], [0, 0, 1, 1], [], []>} : vector<8x8xf32>, vector<8x32xf32>, vector<8x32xf32> -> vector<8x32xf32>
    %c1_i32_23 = arith.constant 1 : i32
    %64 = vector.broadcast %c1_i32_23 : i32 to vector<8x8xi32>
    %65 = arith.addi %56, %64 : vector<8x8xi32>
    %66 = arith.cmpi eq, %57, %65 : vector<8x8xi32>
    %67 = arith.extui %66 : vector<8x8xi1> to vector<8x8xi32>
    %68 = arith.sitofp %67 : vector<8x8xi32> to vector<8x8xf32>
    %cst_24 = arith.constant dense<0.000000e+00> : vector<8x32xf32>
    %69 = tpu.matmul %68, %55, %cst_24 {dimension_numbers = #tpu.dot_dimension_numbers<[1], [0], [0], [1], [0, 0, 1, 1], [], []>} : vector<8x8xf32>, vector<8x32xf32>, vector<8x32xf32> -> vector<8x32xf32>
    %70 = tpu.concatenate %63, %55, %69 in 1 : vector<8x32xf32>, vector<8x32xf32>, vector<8x32xf32> -> vector<8x96xf32>
    %71 = arith.truncf %70 : vector<8x96xf32> to vector<8x96xbf16>
    %c0_25 = arith.constant 0 : index
    %c0_26 = arith.constant 0 : index
    %72 = vector.load %arg7[%c0_25, %c0_26] : memref<96x32xbf16, #tpu.memory_space<vmem>>, vector<96x32xbf16>
    %cst_27 = arith.constant dense<0.000000e+00> : vector<8x32xf32>
    %73 = tpu.matmul %71, %72, %cst_27 {dimension_numbers = #tpu.dot_dimension_numbers<[1], [0], [0], [1], [0, 0, 1, 1], [], []>} : vector<8x96xbf16>, vector<96x32xbf16>, vector<8x32xf32> -> vector<8x32xf32>
    %c0_28 = arith.constant 0 : index
    %c0_29 = arith.constant 0 : index
    %74 = vector.load %arg8[%c0_28, %c0_29] : memref<1x32xf32, #tpu.memory_space<vmem>>, vector<1x32xf32>
    %75 = vector.broadcast %74 : vector<1x32xf32> to vector<8x32xf32>
    %76 = arith.addf %73, %75 : vector<8x32xf32>
    %cst_30 = arith.constant 0.000000e+00 : f32
    %77 = vector.broadcast %cst_30 : f32 to vector<8x32xf32>
    %78 = arith.maximumf %76, %77 : vector<8x32xf32>
    %c0_31 = arith.constant 0 : index
    %c0_32 = arith.constant 0 : index
    %79 = vector.load %arg9[%c0_31, %c0_32] : memref<1x32xf32, #tpu.memory_space<vmem>>, vector<1x32xf32>
    %c0_33 = arith.constant 0 : index
    %c0_34 = arith.constant 0 : index
    %80 = vector.load %arg10[%c0_33, %c0_34] : memref<1x32xf32, #tpu.memory_space<vmem>>, vector<1x32xf32>
    %cst_35 = arith.constant dense<0.000000e+00> : vector<8xf32>
    %81 = vector.multi_reduction <add>, %78, %cst_35 [1] : vector<8x32xf32> to vector<8xf32>
    %82 = vector.shape_cast %81 : vector<8xf32> to vector<8x1xf32>
    %cst_36 = arith.constant 3.200000e+01 : f32
    %83 = vector.broadcast %cst_36 : f32 to vector<8x1xf32>
    %84 = arith.divf %82, %83 : vector<8x1xf32>
    %85 = vector.broadcast %84 : vector<8x1xf32> to vector<8x32xf32>
    %86 = arith.subf %78, %85 : vector<8x32xf32>
    %87 = arith.mulf %86, %86 : vector<8x32xf32>
    %cst_37 = arith.constant dense<0.000000e+00> : vector<8xf32>
    %88 = vector.multi_reduction <add>, %87, %cst_37 [1] : vector<8x32xf32> to vector<8xf32>
    %89 = vector.shape_cast %88 : vector<8xf32> to vector<8x1xf32>
    %cst_38 = arith.constant 3.200000e+01 : f32
    %90 = vector.broadcast %cst_38 : f32 to vector<8x1xf32>
    %91 = arith.divf %89, %90 : vector<8x1xf32>
    %92 = vector.broadcast %84 : vector<8x1xf32> to vector<8x32xf32>
    %93 = arith.subf %78, %92 : vector<8x32xf32>
    %cst_39 = arith.constant 9.99999974E-6 : f32
    %94 = vector.broadcast %cst_39 : f32 to vector<8x1xf32>
    %95 = arith.addf %91, %94 : vector<8x1xf32>
    %96 = math.rsqrt %95 : vector<8x1xf32>
    %97 = vector.broadcast %96 : vector<8x1xf32> to vector<8x32xf32>
    %98 = arith.mulf %93, %97 : vector<8x32xf32>
    %99 = vector.broadcast %79 : vector<1x32xf32> to vector<8x32xf32>
    %100 = arith.mulf %98, %99 : vector<8x32xf32>
    %101 = vector.broadcast %80 : vector<1x32xf32> to vector<8x32xf32>
    %102 = arith.addf %100, %101 : vector<8x32xf32>
    %103 = vector.broadcast %1 : vector<8x1xf32> to vector<8x32xf32>
    %104 = arith.mulf %102, %103 : vector<8x32xf32>
    %105 = arith.truncf %104 : vector<8x32xf32> to vector<8x32xbf16>
    %c0_40 = arith.constant 0 : index
    %c0_41 = arith.constant 0 : index
    %106 = vector.load %arg11[%c0_40, %c0_41] : memref<32x1xbf16, #tpu.memory_space<vmem>>, vector<32x1xbf16>
    %cst_42 = arith.constant dense<0.000000e+00> : vector<8x1xf32>
    %107 = tpu.matmul %105, %106, %cst_42 {dimension_numbers = #tpu.dot_dimension_numbers<[1], [0], [0], [1], [0, 0, 1, 1], [], []>} : vector<8x32xbf16>, vector<32x1xbf16>, vector<8x1xf32> -> vector<8x1xf32>
    %c0_43 = arith.constant 0 : index
    %c0_44 = arith.constant 0 : index
    %108 = vector.load %arg12[%c0_43, %c0_44] : memref<1x1xf32, #tpu.memory_space<vmem>>, vector<1x1xf32>
    %109 = vector.broadcast %108 : vector<1x1xf32> to vector<8x1xf32>
    %110 = arith.addf %107, %109 : vector<8x1xf32>
    %111 = arith.mulf %110, %1 : vector<8x1xf32>
    %c0_45 = arith.constant 0 : index
    %c0_46 = arith.constant 0 : index
    %c0_47 = arith.constant 0 : index
    %112 = vector.load %arg13[%c0_45, %c0_46, %c0_47] : memref<1x8x1xf32, #tpu.memory_space<vmem>>, vector<1x8x1xf32>
    %113 = vector.shape_cast %112 : vector<1x8x1xf32> to vector<8x1xf32>
    %114 = vector.shape_cast %111 : vector<8x1xf32> to vector<1x8x1xf32>
    tpu.vector_store %arg13[%c0_45, %c0_46, %c0_47], %114 {strides = array<i32>} : memref<1x8x1xf32, #tpu.memory_space<vmem>>, vector<1x8x1xf32>,
    return
  }
  func.func @transform_0(%arg0: i32) -> (i32, i32, i32) {
    %c0_i32 = arith.constant 0 : i32
    %c0_i32_0 = arith.constant 0 : i32
    %c0_i32_1 = arith.constant 0 : i32
    return %arg0, %c0_i32, %c0_i32_0 : i32, i32, i32
  }
  func.func @transform_1(%arg0: i32) -> (i32, i32, i32) {
    %c0_i32 = arith.constant 0 : i32
    %c0_i32_0 = arith.constant 0 : i32
    %c0_i32_1 = arith.constant 0 : i32
    return %arg0, %c0_i32, %c0_i32_0 : i32, i32, i32
  }
  func.func @transform_2(%arg0: i32) -> (i32, i32) {
    %c0_i32 = arith.constant 0 : i32
    %c0_i32_0 = arith.constant 0 : i32
    %c0_i32_1 = arith.constant 0 : i32
    return %c0_i32, %c0_i32_0 : i32, i32
  }
  func.func @transform_3(%arg0: i32) -> (i32, i32) {
    %c0_i32 = arith.constant 0 : i32
    %c0_i32_0 = arith.constant 0 : i32
    %c0_i32_1 = arith.constant 0 : i32
    return %c0_i32, %c0_i32_0 : i32, i32
  }
  func.func @transform_4(%arg0: i32) -> (i32, i32) {
    %c0_i32 = arith.constant 0 : i32
    %c0_i32_0 = arith.constant 0 : i32
    %c0_i32_1 = arith.constant 0 : i32
    return %c0_i32, %c0_i32_0 : i32, i32
  }
  func.func @transform_5(%arg0: i32) -> (i32, i32) {
    %c0_i32 = arith.constant 0 : i32
    %c0_i32_0 = arith.constant 0 : i32
    %c0_i32_1 = arith.constant 0 : i32
    return %c0_i32, %c0_i32_0 : i32, i32
  }
  func.func @transform_6(%arg0: i32) -> (i32, i32) {
    %c0_i32 = arith.constant 0 : i32
    %c0_i32_0 = arith.constant 0 : i32
    %c0_i32_1 = arith.constant 0 : i32
    return %c0_i32, %c0_i32_0 : i32, i32
  }
  func.func @transform_7(%arg0: i32) -> (i32, i32) {
    %c0_i32 = arith.constant 0 : i32
    %c0_i32_0 = arith.constant 0 : i32
    %c0_i32_1 = arith.constant 0 : i32
    return %c0_i32, %c0_i32_0 : i32, i32
  }
  func.func @transform_8(%arg0: i32) -> (i32, i32) {
    %c0_i32 = arith.constant 0 : i32
    %c0_i32_0 = arith.constant 0 : i32
    %c0_i32_1 = arith.constant 0 : i32
    return %c0_i32, %c0_i32_0 : i32, i32
  }
  func.func @transform_9(%arg0: i32) -> (i32, i32) {
    %c0_i32 = arith.constant 0 : i32
    %c0_i32_0 = arith.constant 0 : i32
    %c0_i32_1 = arith.constant 0 : i32
    return %c0_i32, %c0_i32_0 : i32, i32
  }
  func.func @transform_10(%arg0: i32) -> (i32, i32) {
    %c0_i32 = arith.constant 0 : i32
    %c0_i32_0 = arith.constant 0 : i32
    %c0_i32_1 = arith.constant 0 : i32
    return %c0_i32, %c0_i32_0 : i32, i32
  }
  func.func @transform_11(%arg0: i32) -> (i32, i32) {
    %c0_i32 = arith.constant 0 : i32
    %c0_i32_0 = arith.constant 0 : i32
    %c0_i32_1 = arith.constant 0 : i32
    return %c0_i32, %c0_i32_0 : i32, i32
  }
  func.func @transform_12(%arg0: i32) -> (i32, i32, i32) {
    %c0_i32 = arith.constant 0 : i32
    %c0_i32_0 = arith.constant 0 : i32
    %c0_i32_1 = arith.constant 0 : i32
    return %arg0, %c0_i32, %c0_i32_0 : i32, i32, i32
  }
}

</mosaic_0001>

<bundles_post_ra>
// kernel: light_transformer_forward.9
= control target key start
LH: loop header
LB: loop body
LE: loop exit
PB: predicated region body
PF: predicated region fallthrough
CT: control target
= control target key end

     0   :  { %s841_s24 = smov 0   ;;  %s911_s0 = inlined_call_operand.vmem [shape: bf16[2,8,32], index: 0, kind: input, shape index: {}]   ;;  %s912_s1 = inlined_call_operand.vmem [shape: f32[2,1,32], index: 1, kind: input, shape index: {}]   ;;  %s913_s2 = inlined_call_operand.vmem [shape: f32[2,8,1], index: 2, kind: input, shape index: {}]   ;;  %s914_s3 = inlined_call_operand.vmem [shape: bf16[96,32], index: 3, kind: input, shape index: {}]   ;;  %s915_s4 = inlined_call_operand.vmem [shape: f32[1,32], index: 4, kind: input, shape index: {}]   ;;  %s916_s5 = inlined_call_operand.vmem [shape: f32[1,32], index: 5, kind: input, shape index: {}]   ;;  %s917_s6 = inlined_call_operand.vmem [shape: f32[1,32], index: 6, kind: input, shape index: {}]   ;;  %s918_s7 = inlined_call_operand.vmem [shape: bf16[2,8,32], index: 7, kind: output, shape index: {}]  }
   0x1 LB: > { %s704_s25 = sadd.s32 4294967295, %s794_s24   ;;  %p708_p0 = scmp.ge.s32.totalorder %s794_s24, 1  ;;  %s794_s24 = sphi %s841_s24, %s17_s24  }
   0x2   : > { %p253_p1 = scmp.lt.s32.totalorder %s794_s24, 3 }
   0x4   : > { %p254_p2 = pnand %p708_p0, %p253_p1 }
   0x5   : > { %p290_p3 = scmp.lt.s32.totalorder (!%p254_p2), %s704_s25, 1  ;;  %s799_s14 = smov (!%p254_p2), 32  }
   0x6   : > { %257 = sbr.rel (%p254_p2) target bundleno = 969 (0x3c9), region = 48 }
   0xb   : > { %v796_v0 = vmov 0   ;;  %s920_s25 = smov (!%p290_p3, %s704_s25), 1  ;;  %v797_v1 = vmov 0.0   ;;  %vm798_vm0 = vmmov 0   ;;  %v323_v3 = vlaneseq  ;;  %v780_v16 = vld [vmem:[%s914_s3 + $0x28] sm:$0xff]   ;;  %v781_v17 = vld [vmem:[%s914_s3 + $0x20] sm:$0xff]  }
   0xc   : > { %779 = vset.pattern.permute.xlu0 %v796_v0  ;;  %s710_s26 = sshll.u32 %s920_s25, 3  ;;  %740 = vmatprep.subr.mxu1 %v797_v1  ;;  %s709_s30 = sshll.u32 %s920_s25, 2  ;;  %vm331_vm2 = vcmask 64512   ;;  %v782_v18 = vld [vmem:[%s914_s3 + $0x18] sm:$0xff]   ;;  %v783_v19 = vld [vmem:[%s914_s3 + $0x10] sm:$0xff]   ;;  %v784_v20 = vld [vmem:[%s914_s3 + $0x8] sm:$0xff]  }
   0xd   : > { %742 = vmatprep.mubr.msk.f32.mxu1 %vm798_vm0, %v797_v1  ;;  %s300_s29 = scalar_lea.vmem %s913_s2, %s710_s26  ;;  %750 = vmatprep.subr.bf16.mxu0 %v797_v1  ;;  %s293_s10 = scalar_lea.vmem %s911_s0, %s709_s30  ;;  %v324_v5 = vshrl.u32 %v323_v3, 7  ;;  %v326_v8 = vand.u32 127, %v323_v3  ;;  %v785_v21 = vld [vmem:[%s914_s3] sm:$0xff]   ;;  %vm490_vm4 = vcmask 261120   ;;  %vm492_vm5 = vcmask 523264  }
   0xe   : > { %762 = vmatprep.mubr.msk.bf16.mxu0 %vm798_vm0, %v797_v1  ;;  %v306_v2 = vld [vmem:[%s300_s29] sm:$0xff]  ;;  %s296_s13 = scalar_lea.vmem %s912_s1, %s920_s25  ;;  %751 = vmatpush3.bf16.msra.mxu0 %v780_v16  ;;  %s800_s29 = smov 64   ;;  %vm550_vm6 = vcmask 785408   ;;  %vm628_vm7 = vcmask 257024  }
   0xf   : > { %319 = vperm.xlu0 %779, %v306_v2   ;;  %v307_v4 = vld [vmem:[%s293_s10] sm:$0xf]  ;;  %v327_v9 = vadd.s32 4294967295, %v324_v5  ;;  %v405_v11 = vadd.s32 1, %v324_v5  ;;  %752 = vmatprep.subr.bf16.mxu0 %v797_v1  ;;  %s304_s16 = scalar_lea.vmem %s918_s7, %s709_s30 }
  0x10   : > { %v308_v6 = vunpack.c.l.bf16 %v307_v4  ;;  %v712_v7 = vld [vmem:[%s296_s13] ss:$0 sm:$0xff] }
  0x11   : > { %vm328_vm1 = vcmp.eq.s32.totalorder %v326_v8, %v327_v9  ;;  %vm406_vm3 = vcmp.eq.s32.totalorder %v326_v8, %v405_v11  ;;  %v717_v31 = vld [vmem:[%s915_s4] ss:$0 sm:$0xff] }
  0x12   : > { %v316_v10 = vadd.f32 %v712_v7, %v308_v6  ;;  %v713_v14 = vsel %vm328_vm1, 1.0, %v797_v1  ;;  %v715_v15 = vsel %vm406_vm3, 1.0, %v797_v1  ;;  %753 = vmatpush3.bf16.msra.mxu0 %v781_v17  ;;  %v725_v49 = vld [vmem:[%s916_s5] ss:$0 sm:$0xff] }
  0x13   : > { %754 = vmatprep.subr.bf16.mxu0 %v797_v1  ;;  %v726_v51 = vld [vmem:[%s917_s6] ss:$0 sm:$0xff] }
  0x16   : > { %755 = vmatpush3.bf16.msra.mxu0 %v782_v18 }
  0x17   : > { %756 = vmatprep.subr.bf16.mxu0 %v797_v1 }
  0x1a   : > { %757 = vmatpush3.bf16.msra.mxu0 %v783_v19 }
  0x1b   : > { %758 = vmatprep.subr.bf16.mxu0 %v797_v1 }
  0x1e   : > { %759 = vmatpush3.bf16.msra.mxu0 %v784_v20 }
  0x1f   : > { %760 = vmatprep.subr.bf16.mxu0 %v797_v1 }
  0x22   : > { %761 = vmatpush3.bf16.msra.mxu0 %v785_v21 }
  0x8a   : > { %v867_v12 = vpop.permute.xlu0 %319 }
  0x8b   : > { %v322_v13 = vmul.f32 %v867_v12, %v316_v10 }
  0x8d   : > { %483 = vrot.lane.b32.xlu0 %v322_v13, %s799_s14  ;;  %741 = vmatpush3.msra.mxu1 %v322_v13 }
  0x8e   : > { %743 = vmatmul.mubr.msk.f32.vlgmr.msra.gmra.mxu1 %vm331_vm2, %v713_v14  ;;  %745 = vmatprep.subr.mxu1 %v797_v1 }
  0x8f   : > { %746 = vmatpush3.msra.mxu1 %v322_v13  ;;  %747 = vmatprep.mubr.msk.f32.mxu1 %vm798_vm0, %v797_v1 }
  0x92   : > { %748 = vmatmul.mubr.msk.f32.vlgmr.msra.gmra.mxu1 %vm331_vm2, %v715_v15 }
  0xff   : > { %v484_v26 = vpop.permute.xlu0 %483 }
 0x14e   : > { %v401_v22 = vpop.f32.mrf.mxu1 }
 0x14f   : > { %v491_v27 = vsel %vm490_vm4, %v401_v22, %v484_v26 }
 0x150   : > { %v744_v23 = vpop.f32.mrf.mxu1 }
 0x152   : > { %v478_v24 = vpop.f32.mrf.mxu1 }
 0x153   : > { %487 = vrot.lane.b32.xlu1 %v478_v24, %s800_s29 }
 0x154   : > { %v749_v25 = vpop.f32.mrf.mxu1 }
 0x1c5   : > { %v488_v28 = vpop.permute.xlu1 %487 }
 0x1c6   : > { %v493_v29 = vsel %vm492_vm5, %v491_v27, %v488_v28 }
 0x1c7   : > { %v494_v30 = vpack.c.bf16 %v493_v29, %v493_v29 }
 0x1c9   : > { %763 = vmatmul.mubr.msk.bf16.vlgmr.msra.gmra.mxu0 %vm550_vm6, %v494_v30 }
 0x289   : > { %v588_v32 = vpop.f32.mrf.mxu0 }
 0x28a   : > { %v589_v33 = vadd.f32 %v717_v31, %v588_v32 }
 0x28b   : > { %v764_v34 = vpop.f32.mrf.mxu0 }
 0x28c   : > { %v594_v35 = vmax.f32 %v589_v33, 0.0 }
 0x28d   : > { %v591_v36 = vpop.f32.mrf.mxu0 }
 0x28e   : > { %v595_v37 = vmul.f32 %v594_v35, %v867_v12 }
 0x28f   : > { %v765_v38 = vpop.f32.mrf.mxu0 }
 0x290   : > { %v598_v39 = vsel %vm490_vm4, %v595_v37, 0.0 }
 0x291   : > { %599 = vadd.xlane.f32.xlu1 %v598_v39 }
 0x31a   : > { %v600_v40 = vpop.xlane.xlu1 %599 }
 0x31b   : > { %v602_v41 = vmul.f32 0.03125, %v600_v40 }
 0x31d   : > { %v603_v42 = vsub.f32 %v595_v37, %v602_v41 }
 0x31f   : > { %v604_v43 = vmul.f32 %v603_v42, %v603_v42 }
 0x321   : > { %v605_v44 = vsel %vm490_vm4, %v604_v43, 0.0 }
 0x322   : > { %606 = vadd.xlane.f32.xlu0 %v605_v44 }
 0x3ab   : > { %v607_v45 = vpop.xlane.xlu0 %606 }
 0x3ac   : > { %v608_v46 = vmul.f32 0.03125, %v607_v45 }
 0x3ae   : > { %v609_v47 = vadd.f32 1e-05, %v608_v46 }
 0x3b0   : > { %786 = vrsqrt.f32 %v609_v47 }
 0x3bd   : > { %v787_v48 = vpop.eup %786 }
 0x3be   : > { %v611_v50 = vmul.f32 %v787_v48, %v603_v42 }
 0x3c0   : > { %v618_v52 = vmul.f32 %v725_v49, %v611_v50 }
 0x3c2   : > { %v625_v53 = vadd.f32 %v726_v51, %v618_v52 }
 0x3c4   : > { %v626_v54 = vmul.f32 %v625_v53, %v867_v12 }
 0x3c6   : > { %v627_v55 = vpack.c.bf16 %v626_v54, %v626_v54 }
 0x3c8   : > { %629 = vst.msk [vmem:[%s304_s16] sm:$0xf] %vm628_vm7, %v627_v55 }
 0x3c9 PF: > { %s17_s24 = sadd.s32 1, %s794_s24  }
 0x3ca   : > { %p14_p4 = scmp.ge.s32.totalorder %s17_s24, 4  }
 0x3cc   :  { %16 = sbr.rel (!%p14_p4) target bundleno = 1 (0x1), region = 84 }

// kernel: light_transformer_forward.10
= control target key start
LH: loop header
LB: loop body
LE: loop exit
PB: predicated region body
PF: predicated region fallthrough
CT: control target
= control target key end

     0   :  { %s1959_s21 = smov 0   ;;  %s2202_s0 = inlined_call_operand.vmem [shape: bf16[2,8,32], index: 0, kind: input, shape index: {}]   ;;  %s2203_s1 = inlined_call_operand.vmem [shape: f32[2,8,1], index: 1, kind: input, shape index: {}]   ;;  %s2204_s2 = inlined_call_operand.vmem [shape: f32[2,1,8], index: 2, kind: input, shape index: {}]   ;;  %s2205_s3 = inlined_call_operand.vmem [shape: f32[2,8,8], index: 3, kind: input, shape index: {}]   ;;  %s2206_s4 = inlined_call_operand.vmem [shape: bf16[32,96], index: 4, kind: input, shape index: {}]   ;;  %s2207_s5 = inlined_call_operand.vmem [shape: f32[1,96], index: 5, kind: input, shape index: {}]   ;;  %s2208_s6 = inlined_call_operand.vmem [shape: bf16[32,32], index: 6, kind: input, shape index: {}]   ;;  %s2209_s7 = inlined_call_operand.vmem [shape: f32[1,32], index: 7, kind: input, shape index: {}]   ;;  %s2210_s8 = inlined_call_operand.vmem [shape: f32[1,32], index: 8, kind: input, shape index: {}]   ;;  %s2211_s9 = inlined_call_operand.vmem [shape: f32[1,32], index: 9, kind: input, shape index: {}]   ;;  %s2212_s10 = inlined_call_operand.vmem [shape: bf16[96,64], index: 10, kind: input, shape index: {}]   ;;  %s2213_s11 = inlined_call_operand.vmem [shape: f32[1,64], index: 11, kind: input, shape index: {}]   ;;  %s2214_s12 = inlined_call_operand.vmem [shape: bf16[192,32], index: 12, kind: input, shape index: {}]   ;;  %s2215_s13 = inlined_call_operand.vmem [shape: f32[1,32], index: 13, kind: input, shape index: {}]   ;;  %s2216_s14 = inlined_call_operand.vmem [shape: f32[1,32], index: 14, kind: input, shape index: {}]   ;;  %s2217_s15 = inlined_call_operand.vmem [shape: f32[1,32], index: 15, kind: input, shape index: {}]   ;;  %s2218_s16 = inlined_call_operand.vmem [shape: bf16[2,8,32], index: 16, kind: output, shape index: {}]  }
   0x1   :  { %2219 = sst [smem:[#allocation2_spill]] %s2202_s0 }
   0x2 LB: > { %s1642_s22 = sadd.s32 4294967295, %s1862_s21   ;;  %p1646_p0 = scmp.ge.s32.totalorder %s1862_s21, 1  ;;  %s1862_s21 = sphi %s1959_s21, %s26_s21  }
   0x3   : > { %p478_p1 = scmp.lt.s32.totalorder %s1862_s21, 3 }
   0x5   : > { %p479_p2 = pnand %p1646_p0, %p478_p1 }
   0x6   : > { %p533_p3 = scmp.lt.s32.totalorder (!%p479_p2), %s1642_s22, 1  ;;  %s2220_s30 = sld [smem:[#allocation2_spill]] (!%p479_p2) }
   0x7   : > { %482 = sbr.rel (%p479_p2) target bundleno = 3416 (0xd58), region = 84  ;;  %s1866_s19 = smov (!%p479_p2), 64  }
   0x8   : > { %s1867_s20 = smov (!%p479_p2), 96   ;;  %s1868_s29 = smov (!%p479_p2), 80  }
   0x9   : > { %s1870_s18 = smov (!%p479_p2), 48  }
   0xc   : > { %v1822_v0 = vld [vmem:[%s2206_s4 + $0x8] sm:$0xff]   ;;  %v1864_v1 = vmov 0.0   ;;  %v1823_v2 = vld [vmem:[%s2206_s4] sm:$0xff]   ;;  %vm1865_vm0 = vmmov 0   ;;  %s2222_s22 = smov (!%p533_p3, %s1642_s22), 1  ;;  %vm576_vm1 = vcmask 261120   ;;  %v677_v17 = vlaneseq }
   0xd   : > { %1727 = vmatprep.subr.bf16.mxu0 %v1864_v1  ;;  %1759 = vmatprep.subr.bf16.mxu1 %v1864_v1  ;;  %s1647_s27 = sshll.u32 %s2222_s22, 2  ;;  %v1650_v4 = vld [vmem:[%s2207_s5] ss:$0 sm:$0xff]  ;;  %vm629_vm2 = vcmask 130048   ;;  %vm701_vm3 = vcmask 1043456   ;;  %s543_s25 = scalar_lea.vmem %s2204_s2, %s2222_s22  ;;  %vm683_vm4 = vcmask 64512  }
   0xe   : > { %1728 = vmatpush3.bf16.msra.mxu0 %v1822_v0  ;;  %1731 = vmatprep.mubr.msk.bf16.mxu0 %vm1865_vm0, %v1864_v1  ;;  %s536_s0 = scalar_lea.vmem %s2220_s30, %s1647_s27  ;;  %v552_v18 = vld [vmem:[%s543_s25] sm:$0x1]  ;;  %v2015_v20 = vshrl.u32 %v677_v17, 7  ;;  %s1869_s30 = smov 112   ;;  %v1657_v48 = vld [vmem:[%s2205_s3 + $0x8] sm:$0xff]  ;;  %vm1136_vm7 = vcmask 523264  }
   0xf   : > { %1729 = vmatprep.subr.bf16.mxu0 %v1864_v1  ;;  %1763 = vmatprep.mubr.msk.bf16.mxu1 %vm1865_vm0, %v1864_v1  ;;  %v1989_v3 = vld [vmem:[%s536_s0] sm:$0xf]  ;;  %v1654_v19 = vadd.f32 -1.0, %v552_v18  ;;  %s1648_s26 = sshll.u32 %s2222_s22, 3  ;;  %s1872_s0 = smov 16   ;;  %vm1194_vm8 = vcmask 785408  }
  0x10   : > { %v679_v22 = vsub.s32 0, %v2015_v20  ;;  %v625_v23 = vld [vmem:[%s2205_s3] sm:$0xff]  ;;  %vm1566_vm9 = vcmask 257024  }
  0x11   : > { %v621_v21 = vmul.f32 1e+09, %v1654_v19 }
  0x12   : > { %1730 = vmatpush3.bf16.msra.mxu0 %v1823_v2 }
  0x13   : > { %1735 = vmatprep.subr.bf16.mxu0 %v1864_v1  ;;  %v680_v24 = vrot.slane %v621_v21, %v679_v22  ;;  %v550_v22 = vunpack.c.l.bf16 %v1989_v3 }
  0x15   : > { %1732 = vmatmul.mubr.msk.bf16.vlgmr.msra.gmra.mxu0 %vm576_vm1, %v1989_v3 }
  0x16   : > { %1737 = vmatprep.mubr.msk.bf16.mxu0 %vm1865_vm0, %v1864_v1 }
  0xd5   : > { %v614_v5 = vpop.f32.mrf.mxu0 }
  0xd6   : > { %v615_v6 = vadd.f32 %v1650_v4, %v614_v5  ;;  %v1824_v5 = vld [vmem:[%s2208_s6 + $0x8] sm:$0xff]  }
  0xd7   : > { %v1733_v7 = vpop.f32.mrf.mxu0  ;;  %1760 = vmatpush3.bf16.msra.mxu1 %v1824_v5 }
  0xd8   : > { %v1998_v8 = vpack.c.bf16 %v615_v6, %v615_v6  ;;  %v622_v13 = vmul.f32 0.25, %v615_v6  ;;  %1761 = vmatprep.subr.bf16.mxu1 %v1864_v1  ;;  %v1825_v6 = vld [vmem:[%s2208_s6] sm:$0xff]   ;;  %v1871_v7 = vmov 0  }
  0xd9   : > { %v617_v9 = vpop.f32.mrf.mxu0  ;;  %1821 = vset.pattern.permute.xlu0 %v1871_v7 }
  0xda   : > { %696 = vrot.lane.b32.xlu1 %v1998_v8, %s1866_s19  ;;  %627 = vrot.lane.b32.xlu0 %v1998_v8, %s1867_s20  ;;  %v623_v15 = vpack.c.bf16 %v622_v13, %v622_v13 }
  0xdb   : > { %v1734_v10 = vpop.f32.mrf.mxu0  ;;  %1762 = vmatpush3.bf16.msra.mxu1 %v1825_v6 }
  0xdc   : > { %1772 = vmatprep.subr.mxu1 %v1864_v1 }
 0x14c   : > { %v628_v11 = vpop.permute.xlu0 %627  ;;  %v697_v14 = vpop.permute.xlu1 %696 }
 0x14d   : > { %v634_v12 = vsel %vm629_vm2, %v628_v11, 0  ;;  %v703_v16 = vsel %vm701_vm3, %v697_v14, 0 }
 0x14e   : > { %1736 = vmatpush3.bf16.xpose.msra.mxu0 %v634_v12 }
 0x14f   : > { %1741 = vmatprep.subr.bf16.mxu0 %v1864_v1 }
 0x155   : > { %1738 = vmatmul.mubr.msk.bf16.vlgmr.msra.gmra.mxu0 %vm629_vm2, %v623_v15 }
 0x156   : > { %1742 = vmatpush3.bf16.msra.mxu0 %v703_v16  ;;  %1743 = vmatprep.mubr.msk.bf16.mxu0 %vm1865_vm0, %v1864_v1  ;;  %v1660_v16 = vld [vmem:[%s2209_s7] ss:$0 sm:$0xff] }
 0x157   : > { %1747 = vmatprep.subr.bf16.mxu0 %v1864_v1 }
 0x215   : > { %v670_v25 = vpop.f32.mrf.mxu0 }
 0x216   : > { %v671_v26 = vadd.f32 %v670_v25, %v625_v23 }
 0x217   : > { %v1739_v27 = vpop.f32.mrf.mxu0 }
 0x218   : > { %v682_v28 = vadd.f32 %v680_v24, %v671_v26 }
 0x219   : > { %v673_v29 = vpop.f32.mrf.mxu0 }
 0x21a   : > { %v684_v30 = vsel %vm683_vm4, %v682_v28, -inf }
 0x21b   : > { %685 = vmax.xlane.f32.xlu0 %v684_v30  ;;  %v1740_v31 = vpop.f32.mrf.mxu0 }
 0x2a4   : > { %v686_v32 = vpop.xlane.xlu0 %685 }
 0x2a5   : > { %v687_v33 = vsub.f32 %v682_v28, %v686_v32 }
 0x2a7   : > { %v688_v34 = vmul.f32 1.442695, %v687_v33 }
 0x2a9   : > { %1844 = vpow2.f32 %v688_v34 }
 0x2b6   : > { %v1845_v35 = vpop.eup %1844 }
 0x2b7   : > { %v690_v36 = vsel %vm683_vm4, %v1845_v35, 0.0 }
 0x2b8   : > { %691 = vadd.xlane.f32.xlu1 %v690_v36 }
 0x2c9   : > { %750 = vrot.lane.b32.xlu1 %v1998_v8, %s1868_s29 }
 0x2cd   : > { %748 = vrot.lane.b32.xlu1 %v623_v15, %s1869_s30  ;;  %s540_s30 = scalar_lea.vmem %s2203_s1, %s1648_s26  ;;  %s1873_s26 = smov 32  }
 0x2ce   : > { %v551_v10 = vld [vmem:[%s540_s30] sm:$0xff] }
 0x341   : > { %v692_v37 = vpop.xlane.xlu1 %691 }
 0x342   : > { %1846 = vrcp.f32 %v692_v37  ;;  %v1664_v37 = vld [vmem:[%s2210_s8] ss:$0 sm:$0xff] }
 0x345   : > { %v751_v40 = vpop.permute.xlu1 %750 }
 0x346   : > { %v756_v42 = vsel %vm629_vm2, %v751_v40, 0 }
 0x349   : > { %v749_v43 = vpop.permute.xlu1 %748 }
 0x34f   : > { %v1847_v38 = vpop.eup %1846 }
 0x350   : > { %v694_v39 = vmul.f32 %v1847_v38, %v1845_v35  ;;  %v972_v38 = vand.u32 127, %v677_v17 }
 0x352   : > { %v695_v41 = vpack.c.bf16 %v694_v39, %v694_v39  ;;  %v973_v39 = vadd.s32 4294967295, %v2015_v20 }
 0x354   : > { %1744 = vmatmul.mubr.msk.bf16.vlgmr.msra.gmra.mxu0 %vm683_vm4, %v695_v41  ;;  %v1050_v41 = vadd.s32 1, %v2015_v20  ;;  %vm974_vm5 = vcmp.eq.s32.totalorder %v972_v38, %v973_v39  ;;  %v1826_v20 = vld [vmem:[%s2212_s10 + $0x28] sm:$0xff]  }
 0x355   : > { %1748 = vmatpush3.bf16.xpose.msra.mxu0 %v756_v42  ;;  %1749 = vmatprep.mubr.msk.bf16.mxu0 %vm1865_vm0, %v1864_v1  ;;  %v1665_v42 = vld [vmem:[%s2211_s9] ss:$0 sm:$0xff] }
 0x356   : > { %1753 = vmatprep.subr.bf16.mxu0 %v1864_v1  ;;  %vm1051_vm6 = vcmp.eq.s32.totalorder %v972_v38, %v1050_v41 }
 0x357   : > { %v1668_v17 = vsel %vm1051_vm6, 1.0, %v1864_v1 }
 0x35c   : > { %1750 = vmatmul.mubr.msk.bf16.vlgmr.msra.gmra.mxu0 %vm629_vm2, %v749_v43 }
 0x35d   : > { %1755 = vmatprep.mubr.msk.bf16.mxu0 %vm1865_vm0, %v1864_v1 }
 0x414   : > { %v739_v44 = vpop.f32.mrf.mxu0 }
 0x416   : > { %v1745_v45 = vpop.f32.mrf.mxu0 }
 0x418   : > { %v742_v46 = vpop.f32.mrf.mxu0 }
 0x419   : > { %v1666_v46 = vsel %vm974_vm5, 1.0, %v1864_v1 }
 0x41a   : > { %v1746_v47 = vpop.f32.mrf.mxu0 }
 0x41b   : > { %v1827_v47 = vld [vmem:[%s2212_s10 + $0x20] sm:$0xff]  }
 0x41c   : > { %v792_v49 = vpop.f32.mrf.mxu0 }
 0x41d   : > { %v793_v50 = vadd.f32 %v1657_v48, %v792_v49  ;;  %v1828_v48 = vld [vmem:[%s2212_s10 + $0x18] sm:$0xff]   ;;  %v1829_v49 = vld [vmem:[%s2212_s10 + $0x10] sm:$0xff]  }
 0x41e   : > { %v1751_v51 = vpop.f32.mrf.mxu0 }
 0x41f   : > { %v798_v52 = vadd.f32 %v793_v50, %v680_v24  ;;  %v1830_v50 = vld [vmem:[%s2212_s10 + $0x8] sm:$0xff]   ;;  %v1831_v51 = vld [vmem:[%s2212_s10] sm:$0xff]  }
 0x420   : > { %v795_v53 = vpop.f32.mrf.mxu0 }
 0x421   : > { %v799_v54 = vsel %vm683_vm4, %v798_v52, -inf }
 0x422   : > { %800 = vmax.xlane.f32.xlu1 %v799_v54  ;;  %v1752_v55 = vpop.f32.mrf.mxu0 }
 0x4ab   : > { %v801_v56 = vpop.xlane.xlu1 %800 }
 0x4ac   : > { %v802_v57 = vsub.f32 %v798_v52, %v801_v56 }
 0x4ae   : > { %v803_v58 = vmul.f32 1.442695, %v802_v57 }
 0x4b0   : > { %1848 = vpow2.f32 %v803_v58 }
 0x4bd   : > { %v1849_v59 = vpop.eup %1848 }
 0x4be   : > { %v805_v60 = vsel %vm683_vm4, %v1849_v59, 0.0 }
 0x4bf   : > { %806 = vadd.xlane.f32.xlu0 %v805_v60 }
 0x4d5   : > { %811 = vrot.lane.b32.xlu0 %v1998_v8, %s1870_s18 }
 0x548   : > { %v807_v61 = vpop.xlane.xlu0 %806 }
 0x549   : > { %1850 = vrcp.f32 %v807_v61  ;;  %v1670_v61 = vld [vmem:[%s2213_s11] ss:$0 sm:$0xff] }
 0x54c   : > { %v812_v62 = vpop.permute.xlu0 %811 }
 0x54d   : > { %v817_v63 = vsel %vm701_vm3, %v812_v62, 0 }
 0x54e   : > { %1754 = vmatpush3.bf16.msra.mxu0 %v817_v63 }
 0x54f   : > { %1767 = vmatprep.subr.mxu0 %v1864_v1 }
 0x556   : > { %v1851_v0 = vpop.eup %1850 }
 0x557   : > { %v809_v2 = vmul.f32 %v1851_v0, %v1849_v59 }
 0x559   : > { %v810_v4 = vpack.c.bf16 %v809_v2, %v809_v2 }
 0x55b   : > { %1756 = vmatmul.mubr.msk.bf16.vlgmr.msra.gmra.mxu0 %vm683_vm4, %v810_v4 }
 0x55c   : > { %1769 = vmatprep.mubr.msk.f32.mxu0 %vm1865_vm0, %v1864_v1 }
 0x61b   : > { %v853_v8 = vpop.f32.mrf.mxu0 }
 0x61c   : > { %860 = vrot.lane.b32.xlu0 %v853_v8, %s1872_s0  ;;  %v1832_v8 = vld [vmem:[%s2214_s12 + $0x38] sm:$0xff]  }
 0x61d   : > { %v1757_v9 = vpop.f32.mrf.mxu0 }
 0x61e   : > { %v1833_v9 = vld [vmem:[%s2214_s12 + $0x30] sm:$0xff]  }
 0x61f   : > { %v856_v11 = vpop.f32.mrf.mxu0 }
 0x620   : > { %933 = vperm.xlu0 %1821, %v551_v10   ;;  %v1835_v10 = vld [vmem:[%s2214_s12 + $0x20] sm:$0xff]   ;;  %v1836_v11 = vld [vmem:[%s2214_s12 + $0x18] sm:$0xff]  }
 0x621   : > { %v1758_v12 = vpop.f32.mrf.mxu0 }
 0x622   : > { %v1837_v12 = vld [vmem:[%s2214_s12 + $0x10] sm:$0xff]  }
 0x68e   : > { %v861_v13 = vpop.permute.xlu0 %860 }
 0x68f   : > { %v863_v14 = vsel %vm629_vm2, %v739_v44, %v861_v13  ;;  %v1838_v13 = vld [vmem:[%s2214_s12 + $0x8] sm:$0xff]  }
 0x690   : > { %v864_v15 = vpack.c.bf16 %v863_v14, %v863_v14  ;;  %v1839_v14 = vld [vmem:[%s2214_s12] sm:$0xff]  }
 0x692   : > { %1764 = vmatmul.mubr.msk.bf16.vlgmr.msra.gmra.mxu1 %vm576_vm1, %v864_v15  ;;  %v1840_v15 = vld [vmem:[%s2214_s12 + $0x58] sm:$0xff]  }
 0x693   : > { %1774 = vmatprep.mubr.msk.f32.mxu1 %vm1865_vm0, %v1864_v1 }
 0x69b   : > { %v2063_v19 = vpop.permute.xlu0 %933 }
 0x752   : > { %v925_v18 = vpop.f32.mrf.mxu1 }
 0x753   : > { %v926_v21 = vadd.f32 %v1660_v16, %v925_v18  ;;  %v1841_v16 = vld [vmem:[%s2214_s12 + $0x50] sm:$0xff]   ;;  %v1842_v18 = vld [vmem:[%s2214_s12 + $0x48] sm:$0xff]  }
 0x754   : > { %v1765_v23 = vpop.f32.mrf.mxu1 }
 0x755   : > { %v936_v24 = vmul.f32 %v2063_v19, %v926_v21  ;;  %v1843_v21 = vld [vmem:[%s2214_s12 + $0x40] sm:$0xff]  }
 0x756   : > { %v928_v25 = vpop.f32.mrf.mxu1 }
 0x757   : > { %v937_v26 = vadd.f32 %v936_v24, %v550_v22 }
 0x758   : > { %v1766_v27 = vpop.f32.mrf.mxu1 }
 0x759   : > { %v940_v28 = vsel %vm576_vm1, %v937_v26, 0.0 }
 0x75a   : > { %941 = vadd.xlane.f32.xlu1 %v940_v28 }
 0x7e3   : > { %v942_v29 = vpop.xlane.xlu1 %941 }
 0x7e4   : > { %v944_v30 = vmul.f32 0.03125, %v942_v29 }
 0x7e6   : > { %v945_v31 = vsub.f32 %v937_v26, %v944_v30 }
 0x7e8   : > { %v946_v32 = vmul.f32 %v945_v31, %v945_v31 }
 0x7ea   : > { %v947_v33 = vsel %vm576_vm1, %v946_v32, 0.0 }
 0x7eb   : > { %948 = vadd.xlane.f32.xlu1 %v947_v33 }
 0x874   : > { %v949_v34 = vpop.xlane.xlu1 %948 }
 0x875   : > { %v950_v35 = vmul.f32 0.03125, %v949_v34 }
 0x877   : > { %v951_v36 = vadd.f32 1e-05, %v950_v35 }
 0x879   : > { %1852 = vrsqrt.f32 %v951_v36 }
 0x886   : > { %v1853_v3 = vpop.eup %1852 }
 0x887   : > { %v953_v40 = vmul.f32 %v1853_v3, %v945_v31 }
 0x889   : > { %v960_v43 = vmul.f32 %v1664_v37, %v953_v40 }
 0x88b   : > { %v967_v44 = vadd.f32 %v1665_v42, %v960_v43 }
 0x88d   : > { %v2079_v45 = vmul.f32 %v967_v44, %v2063_v19 }
 0x88f   : > { %1128 = vrot.lane.b32.xlu0 %v2079_v45, %s1873_s26  ;;  %1768 = vmatpush3.msra.mxu0 %v2079_v45  ;;  %s547_s26 = scalar_lea.vmem %s2218_s16, %s1647_s27 }
 0x890   : > { %1773 = vmatpush3.msra.mxu1 %v2079_v45  ;;  %1770 = vmatmul.mubr.msk.f32.vlgmr.msra.gmra.mxu0 %vm683_vm4, %v1666_v46 }
 0x891   : > { %1775 = vmatmul.mubr.msk.f32.vlgmr.msra.gmra.mxu1 %vm683_vm4, %v1668_v17  ;;  %1777 = vmatprep.subr.bf16.mxu0 %v1864_v1 }
 0x892   : > { %1789 = vmatprep.mubr.msk.bf16.mxu0 %vm1865_vm0, %v1864_v1  ;;  %1793 = vmatprep.subr.mxu1 %v1864_v1 }
 0x893   : > { %1795 = vmatprep.mubr.msk.f32.mxu1 %vm1865_vm0, %v1864_v1  ;;  %1778 = vmatpush3.bf16.msra.mxu0 %v1826_v20  ;;  %v1695_v20 = vld [vmem:[%s2217_s15] ss:$0 sm:$0xff] }
 0x894   : > { %1779 = vmatprep.subr.bf16.mxu0 %v1864_v1 }
 0x897   : > { %1780 = vmatpush3.bf16.msra.mxu0 %v1827_v47 }
 0x898   : > { %1781 = vmatprep.subr.bf16.mxu0 %v1864_v1 }
 0x89b   : > { %1782 = vmatpush3.bf16.msra.mxu0 %v1828_v48 }
 0x89c   : > { %1783 = vmatprep.subr.bf16.mxu0 %v1864_v1 }
 0x89f   : > { %1784 = vmatpush3.bf16.msra.mxu0 %v1829_v49 }
 0x8a0   : > { %1785 = vmatprep.subr.bf16.mxu0 %v1864_v1 }
 0x8a3   : > { %1786 = vmatpush3.bf16.msra.mxu0 %v1830_v50 }
 0x8a4   : > { %1787 = vmatprep.subr.bf16.mxu0 %v1864_v1 }
 0x8a7   : > { %1788 = vmatpush3.bf16.msra.mxu0 %v1831_v51 }
 0x901   : > { %v1129_v56 = vpop.permute.xlu0 %1128 }
 0x950   : > { %v1046_v52 = vpop.f32.mrf.mxu0 }
 0x951   : > { %v1123_v53 = vpop.f32.mrf.mxu1  ;;  %v1135_v57 = vsel %vm576_vm1, %v1046_v52, %v1129_v56 }
 0x952   : > { %1132 = vrot.lane.b32.xlu1 %v1123_v53, %s1866_s19  ;;  %v1771_v54 = vpop.f32.mrf.mxu0 }
 0x953   : > { %v1776_v55 = vpop.f32.mrf.mxu1 }
 0x9c4   : > { %v1133_v58 = vpop.permute.xlu1 %1132 }
 0x9c5   : > { %v1137_v59 = vsel %vm1136_vm7, %v1135_v57, %v1133_v58 }
 0x9c6   : > { %v1138_v60 = vpack.c.bf16 %v1137_v59, %v1137_v59 }
 0x9c8   : > { %1790 = vmatmul.mubr.msk.bf16.vlgmr.msra.gmra.mxu0 %vm1194_vm8, %v1138_v60 }
 0xa88   : > { %v1232_v62 = vpop.f32.mrf.mxu0 }
 0xa89   : > { %v1233_v63 = vadd.f32 %v1670_v61, %v1232_v62 }
 0xa8a   : > { %v1791_v0 = vpop.f32.mrf.mxu0 }
 0xa8b   : > { %v1238_v2 = vmax.f32 %v1233_v63, 0.0 }
 0xa8c   : > { %v1235_v4 = vpop.f32.mrf.mxu0 }
 0xa8d   : > { %v1239_v5 = vmul.f32 %v1238_v2, %v2063_v19 }
 0xa8e   : > { %v1792_v6 = vpop.f32.mrf.mxu0 }
 0xa8f   : > { %1381 = vrot.lane.b32.xlu0 %v1239_v5, %s1866_s19  ;;  %1794 = vmatpush3.msra.mxu1 %v1239_v5 }
 0xa90   : > { %1796 = vmatmul.mubr.msk.f32.vlgmr.msra.gmra.mxu1 %vm683_vm4, %v1666_v46  ;;  %1798 = vmatprep.subr.mxu1 %v1864_v1 }
 0xa91   : > { %1799 = vmatpush3.msra.mxu1 %v1239_v5  ;;  %1800 = vmatprep.mubr.msk.f32.mxu1 %vm1865_vm0, %v1864_v1  ;;  %v1834_v1 = vld [vmem:[%s2214_s12 + $0x28] sm:$0xff]  }
 0xa92   : > { %1493 = vmatprep.subr.bf16.mxu1 %v1871_v7 }
 0xa94   : > { %1801 = vmatmul.mubr.msk.f32.vlgmr.msra.gmra.mxu1 %vm683_vm4, %v1668_v17 }
 0xa95   : > { %1494 = vmatpush1.bf16.msra.mxu1 %v1832_v8 }
 0xa96   : > { %1495 = vmatprep.subr.bf16.mxu1 %v1871_v7 }
 0xa99   : > { %1496 = vmatpush1.bf16.msra.mxu1 %v1833_v9 }
 0xa9a   : > { %1497 = vmatprep.subr.bf16.mxu1 %v1871_v7 }
 0xa9d   : > { %1498 = vmatpush1.bf16.msra.mxu1 %v1834_v1 }
 0xa9e   : > { %1499 = vmatprep.subr.bf16.mxu1 %v1871_v7 }
 0xaa1   : > { %1500 = vmatpush1.bf16.msra.mxu1 %v1835_v10 }
 0xaa2   : > { %1501 = vmatprep.subr.bf16.mxu1 %v1871_v7 }
 0xaa5   : > { %1502 = vmatpush1.bf16.msra.mxu1 %v1836_v11 }
 0xaa6   : > { %1503 = vmatprep.subr.bf16.mxu1 %v1871_v7 }
 0xaa9   : > { %1504 = vmatpush1.bf16.msra.mxu1 %v1837_v12 }
 0xaaa   : > { %1505 = vmatprep.subr.bf16.mxu1 %v1871_v7 }
 0xaad   : > { %1506 = vmatpush1.bf16.msra.mxu1 %v1838_v13 }
 0xaae   : > { %1507 = vmatprep.subr.bf16.mxu1 %v1871_v7 }
 0xab1   : > { %1508 = vmatpush1.bf16.msra.mxu1 %v1839_v14 }
 0xab2   : > { %1517 = vmatprep.subr.bf16.mxu1 %v1871_v7 }
 0xab5   : > { %1518 = vmatpush2.bf16.msra.mxu1 %v1840_v15 }
 0xab6   : > { %1519 = vmatprep.subr.bf16.mxu1 %v1871_v7 }
 0xab9   : > { %1520 = vmatpush2.bf16.msra.mxu1 %v1841_v16 }
 0xaba   : > { %1521 = vmatprep.subr.bf16.mxu1 %v1871_v7 }
 0xabd   : > { %1522 = vmatpush2.bf16.msra.mxu1 %v1842_v18 }
 0xabe   : > { %1523 = vmatprep.subr.bf16.mxu1 %v1871_v7  ;;  %v1680_v7 = vld [vmem:[%s2215_s13] ss:$0 sm:$0xff] }
 0xac1   : > { %1524 = vmatpush2.bf16.msra.mxu1 %v1843_v21 }
 0xb01   : > { %v1382_v23 = vpop.permute.xlu0 %1381 }
 0xb50   : > { %v1306_v22 = vpop.f32.mrf.mxu1 }
 0xb51   : > { %v1384_v25 = vsel %vm1136_vm7, %v1306_v22, %v1382_v23 }
 0xb52   : > { %v1797_v24 = vpop.f32.mrf.mxu1  ;;  %v1385_v28 = vpack.c.bf16 %v1384_v25, %v1384_v25 }
 0xb54   : > { %v1376_v26 = vpop.f32.mrf.mxu1 }
 0xb55   : > { %v1386_v27 = vpack.c.bf16 %v1376_v26, %v1376_v26 }
 0xb56   : > { %v1802_v29 = vpop.f32.mrf.mxu1 }
 0xb57   : > { %1693 = vmatprep.mubr.msk.bf16.mxu1 %vm1136_vm7, %v1386_v27 }
 0xb58   : > { %1526 = vmatmul.mubr.bf16.vlgmr.msra.gmra.mxu1 %v1385_v28 }
 0xc18   : > { %v1527_v30 = vpop.f32.mrf.mxu1 }
 0xc19   : > { %v1528_v31 = vadd.f32 %v1680_v7, %v1527_v30 }
 0xc1a   : > { %v1529_v32 = vpop.f32.mrf.mxu1 }
 0xc1b   : > { %v1533_v33 = vmul.f32 %v1528_v31, %v2063_v19 }
 0xc1c   : > { %v1530_v34 = vpop.f32.mrf.mxu1 }
 0xc1d   : > { %v1534_v35 = vadd.f32 %v1533_v33, %v2079_v45  ;;  %v1694_v45 = vld [vmem:[%s2216_s14] ss:$0 sm:$0xff] }
 0xc1e   : > { %v1531_v36 = vpop.f32.mrf.mxu1 }
 0xc1f   : > { %v1537_v3 = vsel %vm576_vm1, %v1534_v35, 0.0 }
 0xc20   : > { %1538 = vadd.xlane.f32.xlu0 %v1537_v3 }
 0xca9   : > { %v1539_v37 = vpop.xlane.xlu0 %1538 }
 0xcaa   : > { %v1540_v38 = vmul.f32 0.03125, %v1539_v37 }
 0xcac   : > { %v1541_v39 = vsub.f32 %v1534_v35, %v1540_v38 }
 0xcae   : > { %v1542_v40 = vmul.f32 %v1541_v39, %v1541_v39 }
 0xcb0   : > { %v1543_v41 = vsel %vm576_vm1, %v1542_v40, 0.0 }
 0xcb1   : > { %1544 = vadd.xlane.f32.xlu1 %v1543_v41 }
 0xd3a   : > { %v1545_v42 = vpop.xlane.xlu1 %1544 }
 0xd3b   : > { %v1546_v43 = vmul.f32 0.03125, %v1545_v42 }
 0xd3d   : > { %v1547_v44 = vadd.f32 1e-05, %v1546_v43 }
 0xd3f   : > { %1854 = vrsqrt.f32 %v1547_v44 }
 0xd4c   : > { %v1855_v46 = vpop.eup %1854 }
 0xd4d   : > { %v1549_v17 = vmul.f32 %v1855_v46, %v1541_v39 }
 0xd4f   : > { %v1556_v47 = vmul.f32 %v1694_v45, %v1549_v17 }
 0xd51   : > { %v1563_v48 = vadd.f32 %v1695_v20, %v1556_v47 }
 0xd53   : > { %v1564_v49 = vmul.f32 %v1563_v48, %v2063_v19 }
 0xd55   : > { %v1565_v50 = vpack.c.bf16 %v1564_v49, %v1564_v49 }
 0xd57   : > { %1567 = vst.msk [vmem:[%s547_s26] sm:$0xf] %vm1566_vm9, %v1565_v50 }
 0xd58 PF: > { %s26_s21 = sadd.s32 1, %s1862_s21  }
 0xd59   : > { %p23_p4 = scmp.ge.s32.totalorder %s26_s21, 4  }
 0xd5b   :  { %25 = sbr.rel (!%p23_p4) target bundleno = 2 (0x2), region = 121 }

// kernel: light_transformer_forward.14
= control target key start
LH: loop header
LB: loop body
LE: loop exit
PB: predicated region body
PF: predicated region fallthrough
CT: control target
= control target key end

     0   :  { %s587_s18 = smov 0   ;;  %s632_s0 = inlined_call_operand.vmem [shape: bf16[2,32,32], index: 0, kind: input, shape index: {}]   ;;  %s633_s1 = inlined_call_operand.vmem [shape: bf16[32,32], index: 1, kind: input, shape index: {}]   ;;  %s634_s2 = inlined_call_operand.vmem [shape: f32[1,32], index: 2, kind: input, shape index: {}]   ;;  %s635_s3 = inlined_call_operand.vmem [shape: f32[2,1,32], index: 3, kind: input, shape index: {}]   ;;  %s636_s4 = inlined_call_operand.vmem [shape: f32[2,32,1], index: 4, kind: input, shape index: {}]   ;;  %s637_s5 = inlined_call_operand.vmem [shape: bf16[2,32,32], index: 5, kind: output, shape index: {}]  }
   0x1 LB: > { %s489_s19 = sadd.s32 4294967295, %s554_s18   ;;  %p493_p0 = scmp.ge.s32.totalorder %s554_s18, 1  ;;  %s554_s18 = sphi %s587_s18, %s15_s18  }
   0x2   : > { %p205_p1 = scmp.lt.s32.totalorder %s554_s18, 3 }
   0x4   : > { %p206_p2 = pnand %p493_p0, %p205_p1 }
   0x5   : > { %p241_p3 = scmp.lt.s32.totalorder (!%p206_p2), %s489_s19, 1 }
   0x6   : > { %209 = sbr.rel (%p206_p2) target bundleno = 228 (0xe4), region = 40 }
   0xb   : > { %v544_v0 = vld [vmem:[%s633_s1 + $0x8] sm:$0xff]   ;;  %v545_v1 = vld [vmem:[%s633_s1] sm:$0xff]   ;;  %s639_s19 = smov (!%p241_p3, %s489_s19), 1  ;;  %v556_v2 = vmov 0   ;;  %vm297_vm0 = vcmask 261120   ;;  %vm408_vm1 = vcmask 257024  }
   0xc   : > { %525 = vmatprep.subr.bf16.mxu0 %v544_v0  ;;  %543 = vset.pattern.permute.xlu1 %v556_v2  ;;  %s514_s24 = sshll.u32 %s639_s19, 4  ;;  %s515_s25 = sshll.u32 %s639_s19, 5  ;;  %v500_v9 = vld [vmem:[%s634_s2] ss:$0 sm:$0xff] }
   0xd   : > { %526 = vmatpush3.bf16.msra.mxu0 %v544_v0  ;;  %542 = vset.pattern.permute.xlu0 %v556_v2  ;;  %s245_s28 = scalar_lea.vmem %s632_s0, %s514_s24  ;;  %s253_s6 = scalar_lea.vmem %s636_s4, %s515_s25 }
   0xe   : > { %527 = vmatprep.subr.bf16.mxu0 %v545_v1  ;;  %v546_v3 = vld [vmem:[%s245_s28] sm:$0xff]   ;;  %v547_v4 = vld [vmem:[%s245_s28 + $0x8] sm:$0xff]   ;;  %v366_v5 = vld [vmem:[%s253_s6 + $0x10] sm:$0xff]  ;;  %s248_s9 = scalar_lea.vmem %s635_s3, %s639_s19  ;;  %s258_s14 = scalar_lea.vmem %s637_s5, %s514_s24 }
   0xf   : > { %529 = vmatprep.mubr.msk.bf16.mxu0 %vm297_vm0, %v546_v3  ;;  %v364_v6 = vld [vmem:[%s253_s6] sm:$0xff]  ;;  %380 = vperm.xlu1 %543, %v366_v5   ;;  %v367_v7 = vld [vmem:[%s253_s6 + $0x18] sm:$0xff]  ;;  %v365_v8 = vld [vmem:[%s253_s6 + $0x8] sm:$0xff] }
  0x10   : > { %370 = vperm.xlu0 %542, %v364_v6   ;;  %v507_v11 = vld [vmem:[%s248_s9] ss:$0 sm:$0xff] }
  0x11   : > { %528 = vmatpush3.bf16.msra.mxu0 %v545_v1 }
  0x13   : > { %385 = vperm.xlu1 %543, %v367_v7  }
  0x14   : > { %530 = vmatmul.mubr.msk.bf16.vlgmr.msra.gmra.mxu0 %vm297_vm0, %v547_v4  ;;  %375 = vperm.xlu0 %542, %v365_v8  }
  0x8a   : > { %v381_v13 = vpop.permute.xlu1 %380 }
  0x8b   : > { %v371_v17 = vpop.permute.xlu0 %370 }
  0x8e   : > { %v386_v27 = vpop.permute.xlu1 %385 }
  0x8f   : > { %v376_v31 = vpop.permute.xlu0 %375 }
  0xd4   : > { %v531_v10 = vpop.f32.mrf.mxu0 }
  0xd5   : > { %v347_v12 = vadd.f32 %v531_v10, %v500_v9 }
  0xd6   : > { %v338_v14 = vpop.f32.mrf.mxu0 }
  0xd7   : > { %v362_v15 = vadd.f32 %v507_v11, %v347_v12  ;;  %v339_v16 = vadd.f32 %v500_v9, %v338_v14 }
  0xd8   : > { %v532_v18 = vpop.f32.mrf.mxu0 }
  0xd9   : > { %v390_v19 = vmul.f32 %v381_v13, %v362_v15  ;;  %v360_v20 = vadd.f32 %v507_v11, %v339_v16  ;;  %v350_v21 = vadd.f32 %v532_v18, %v500_v9 }
  0xda   : > { %v341_v22 = vpop.f32.mrf.mxu0 }
  0xdb   : > { %v519_v23 = vpack.c.bf16 %v390_v19, %v390_v19  ;;  %v388_v24 = vmul.f32 %v371_v17, %v360_v20  ;;  %v363_v25 = vadd.f32 %v507_v11, %v350_v21  ;;  %v342_v26 = vadd.f32 %v500_v9, %v341_v22 }
  0xdd   : > { %411 = vst.msk [vmem:[%s258_s14 + $0x8] sm:$0xf] %vm408_vm1, %v519_v23  ;;  %v517_v28 = vpack.c.bf16 %v388_v24, %v388_v24  ;;  %v391_v29 = vmul.f32 %v386_v27, %v363_v25  ;;  %v361_v30 = vadd.f32 %v507_v11, %v342_v26 }
  0xdf   : > { %409 = vst.msk [vmem:[%s258_s14] sm:$0xf] %vm408_vm1, %v517_v28  ;;  %v520_v32 = vpack.c.bf16 %v391_v29, %v391_v29  ;;  %v389_v33 = vmul.f32 %v376_v31, %v361_v30 }
  0xe1   : > { %412 = vst.msk [vmem:[%s258_s14 + $0xc] sm:$0xf] %vm408_vm1, %v520_v32  ;;  %v518_v34 = vpack.c.bf16 %v389_v33, %v389_v33 }
  0xe3   : > { %410 = vst.msk [vmem:[%s258_s14 + $0x4] sm:$0xf] %vm408_vm1, %v518_v34 }
  0xe4 PF: > { %s15_s18 = sadd.s32 1, %s554_s18  }
  0xe5   : > { %p12_p4 = scmp.ge.s32.totalorder %s15_s18, 4  }
  0xe7   :  { %14 = sbr.rel (!%p12_p4) target bundleno = 1 (0x1), region = 76 }

// kernel: light_transformer_forward.17
= control target key start
LH: loop header
LB: loop body
LE: loop exit
PB: predicated region body
PF: predicated region fallthrough
CT: control target
= control target key end

     0   :  { %10 = vsyncpa [#allocation3], 0  ;;  %s798_s0 = inlined_call_operand.vmem [shape: bf16[2,32,32], index: 0, kind: input, shape index: {}]   ;;  %s799_s1 = inlined_call_operand.vmem [shape: bf16[32,80], index: 1, kind: input, shape index: {}]   ;;  %s800_s2 = inlined_call_operand.vmem [shape: f32[1,80], index: 2, kind: input, shape index: {}]   ;;  %s801_s3 = inlined_call_operand.vmem [shape: f32[2,1,80], index: 3, kind: input, shape index: {}]   ;;  %s802_s4 = inlined_call_operand.vmem [shape: f32[2,32,1], index: 4, kind: input, shape index: {}]   ;;  %s803_s5 = inlined_call_operand.hbm [shape: f32[2,32,80], index: 5, kind: output, shape index: {}]  }
   0x1   :  { %12 = vsyncpa [#allocation3 + $0x1], 0  ;;  %s673_s18 = smov 0   ;;  %s675_s19 = smov 0  }
   0x2   :  { %s677_s20 = smov 0   ;;  %s679_s21 = smov 0  }
   0x3 LB: > { %s694_s22 = sadd.s32 4294967295, %s637_s21   ;;  %s492_s23 = sadd.s32 4294967294, %s637_s21   ;;  %s637_s21 = sphi %s679_s21, %s809_s21   ;;  %s633_s20 = sphi %s677_s20, %s808_s20   ;;  %s629_s19 = sphi %s675_s19, %s807_s19   ;;  %s625_s18 = sphi %s673_s18, %s806_s18  }
   0x4   : > { %s698_s24 = sadd.s32 1, %s637_s21   ;;  %s145_s25 = sadd.s32 1, %s633_s20 }
   0x5   : > { %s142_s26 = ssub.s32 %s637_s21, %s698_s24  ;;  %p155_p0 = scmp.ne.s32.totalorder %s633_s20, %s629_s19 }
   0x6   : > { %p143_p1 = scmp.eq.s32.totalorder %s142_s26, 0  ;;  %p156_p2 = scmp.eq.s32.totalorder %s694_s22, 1 }
   0x7   : > { %p161_p3 = scmp.ne.s32.totalorder %s629_s19, %s625_s18  ;;  %p162_p4 = scmp.eq.s32.totalorder %s492_s23, 1 }
   0x8   : > { %s709_s27 = scalar_select %p143_p1, %s633_s20, %s145_s25  }
   0x9   : > { %p711_p5 = por %p156_p2, %p155_p0  ;;  %p715_p6 = por %p162_p4, %p161_p3 }
   0xa   : > { %p495_p7 = scmp.ge.s32.totalorder %s637_s21, 1  ;;  %p208_p8 = scmp.lt.s32.totalorder %s637_s21, 3 }
   0xc   : > { %p209_p9 = pnand %p495_p7, %p208_p8 }
   0xd   : > { %p244_p10 = scmp.lt.s32.totalorder (!%p209_p9), %s694_s22, 1  ;;  %s241_s7 = sand.u32 (!%p209_p9), 1, %s629_s19  }
   0xe   : > { %212 = sbr.rel (%p209_p9) target bundleno = 247 (0xf7), region = 40  ;;  %s496_s8 = sshll.u32 (!%p209_p9), %s241_s7, 5 }
   0xf   : > { %s640_s16 = smov (!%p209_p9), [#allocation2]  }
  0x13   : > { %v573_v0 = vld [vmem:[%s799_s1 + $0x8] sm:$0xff]   ;;  %v574_v1 = vld [vmem:[%s799_s1] sm:$0xff]   ;;  %s245_s9 = scalar_select %p244_p10, %s694_s22, 1  ;;  %v639_v2 = vmov 0   ;;  %vm295_vm0 = vcmask 261120   ;;  %vm390_vm1 = vcmask 654336  }
  0x14   : > { %521 = vmatprep.subr.bf16.mxu0 %v573_v0  ;;  %572 = vset.pattern.permute.xlu1 %v639_v2  ;;  %v501_v9 = vld [vmem:[%s800_s2] ss:$0 sm:$0xff] }
  0x15   : > { %522 = vmatpush3.bf16.msra.mxu0 %v573_v0  ;;  %s514_s10 = sshll.u32 %s245_s9, 4  ;;  %571 = vset.pattern.permute.xlu0 %v639_v2  ;;  %s515_s11 = sshll.u32 %s245_s9, 5 }
  0x16   : > { %523 = vmatprep.subr.bf16.mxu0 %v574_v1  ;;  %s248_s14 = scalar_lea.vmem %s798_s0, %s514_s10  ;;  %s256_s17 = scalar_lea.vmem %s802_s4, %s515_s11 }
  0x17   : > { %v575_v3 = vld [vmem:[%s248_s14] sm:$0xff]   ;;  %v576_v4 = vld [vmem:[%s248_s14 + $0x8] sm:$0xff]   ;;  %v364_v5 = vld [vmem:[%s256_s17 + $0x10] sm:$0xff]  ;;  %s251_s26 = scalar_lea.vmem %s801_s3, %s245_s9  ;;  %s243_s9 = scalar_lea.vmem [#allocation2], %s496_s8 }
  0x18   : > { %525 = vmatprep.mubr.msk.bf16.mxu0 %vm295_vm0, %v575_v3  ;;  %v362_v6 = vld [vmem:[%s256_s17] sm:$0xff]  ;;  %378 = vperm.xlu1 %572, %v364_v5   ;;  %v365_v7 = vld [vmem:[%s256_s17 + $0x18] sm:$0xff]  ;;  %v363_v8 = vld [vmem:[%s256_s17 + $0x8] sm:$0xff]  ;;  %s409_s10 = sshll.u32 %s243_s9, 4  ;;  %s516_s11 = sshll.u32 %s694_s22, 9  ;;  %s747_s10 = int_to_ptr.vmem [resolvable:$true] %s409_s10 }
  0x19   : > { %524 = vmatpush3.bf16.msra.mxu0 %v574_v1  ;;  %368 = vperm.xlu0 %571, %v362_v6   ;;  %v508_v11 = vld [vmem:[%s251_s26] ss:$0 sm:$0xff]  ;;  %s752_s14 = scalar_lea.hbm %s803_s5, %s516_s11  ;;  %s758_s22 = scalar_lea.sflag [#allocation3], %s241_s7 }
  0x1a   : > { %s577_s15 = scalar_lea.vmem %s747_s10, 512  ;;  %s581_s17 = sshll.u32 %s640_s16, 4  ;;  %s582_s17 = int_to_ptr.vmem [resolvable:$false] %s581_s17 }
  0x1b   : > { %p578_p11 = scmp.ne.s32.totalorder %s747_s10, %s577_s15  ;;  %s583_s23 = scalar_lea.vmem %s582_s17, 1024 }
  0x1c   : > { %526 = vmatmul.mubr.msk.bf16.vlgmr.msra.gmra.mxu0 %vm295_vm0, %v576_v4  ;;  %383 = vperm.xlu1 %572, %v365_v7   ;;  %p584_p0 = scmp.lt.s32.totalorder %s747_s10, %s582_s17  ;;  %p585_p1 = scmp.lt.s32.totalorder %s583_s23, %s577_s15 }
  0x1d   : > { %373 = vperm.xlu0 %571, %v363_v8   ;;  %p579_p12 = pnand %p578_p11, %p711_p5 }
  0x1e   : > { %p586_p2 = por %p585_p1, %p584_p0 }
  0x1f   : > { %p580_p13 = pneg %p579_p12 }
  0x21   : > { %p587_p3 = pnand %p586_p2, %p580_p13 }
  0x93   : > { %v379_v13 = vpop.permute.xlu1 %378 }
  0x94   : > { %v369_v17 = vpop.permute.xlu0 %368 }
  0x97   : > { %v384_v26 = vpop.permute.xlu1 %383 }
  0x98   : > { %v374_v29 = vpop.permute.xlu0 %373 }
  0xdc   : > { %v527_v10 = vpop.f32.mrf.mxu0 }
  0xdd   : > { %v345_v12 = vadd.f32 %v527_v10, %v501_v9 }
  0xde   : > { %v336_v14 = vpop.f32.mrf.mxu0 }
  0xdf   : > { %v360_v15 = vadd.f32 %v508_v11, %v345_v12  ;;  %v337_v16 = vadd.f32 %v501_v9, %v336_v14 }
  0xe0   : > { %v528_v18 = vpop.f32.mrf.mxu0 }
  0xe1   : > { %v388_v19 = vmul.f32 %v379_v13, %v360_v15  ;;  %v358_v20 = vadd.f32 %v508_v11, %v337_v16  ;;  %v348_v21 = vadd.f32 %v528_v18, %v501_v9 }
  0xe2   : > { %v339_v22 = vpop.f32.mrf.mxu0 }
  0xe3   : > { %393 = vst.msk [vmem:[%s243_s9 + $0x10] sm:$0xff] %vm390_vm1, %v388_v19  ;;  %v386_v23 = vmul.f32 %v369_v17, %v358_v20  ;;  %v361_v24 = vadd.f32 %v508_v11, %v348_v21  ;;  %v340_v25 = vadd.f32 %v501_v9, %v339_v22 }
  0xe5   : > { %391 = vst.msk [vmem:[%s243_s9] sm:$0xff] %vm390_vm1, %v386_v23  ;;  %v389_v27 = vmul.f32 %v384_v26, %v361_v24  ;;  %v359_v28 = vadd.f32 %v508_v11, %v340_v25 }
  0xe7   : > { %394 = vst.msk [vmem:[%s243_s9 + $0x18] sm:$0xff] %vm390_vm1, %v389_v27  ;;  %v387_v30 = vmul.f32 %v374_v29, %v359_v28 }
  0xe9   : > { %392 = vst.msk [vmem:[%s243_s9 + $0x8] sm:$0xff] %vm390_vm1, %v387_v30 }
  0xea   : > { %590 = shalt.err (!%p587_p3)
}
  0xeb   : > { %s591_s25 = scalar_lea.hbm %s752_s14, 512  ;;  %s595_s6 = scalar_lea.hbm %s803_s5, 1024 }
  0xec   : > { %p592_p4 = scmp.ne.s32.totalorder %s752_s14, %s591_s25  ;;  %p596_p9 = scmp.lt.s32.totalorder %s752_s14, %s803_s5 }
  0xed   : > { %p597_p10 = scmp.lt.s32.totalorder %s595_s6, %s591_s25 }
  0xee   : > { %p593_p7 = pnand %p592_p4, %p711_p5 }
  0xef   : > { %p598_p11 = por %p597_p10, %p596_p9 }
  0xf0   : > { %p594_p8 = pneg %p593_p7 }
  0xf2   : > { %p599_p12 = pnand %p598_p11, %p594_p8 }
  0xf4   : > { %602 = shalt.err (!%p599_p12)
}
  0xf5   : > { %s641_s9 = smov 128   ;;  %s642_s11 = smov 8  }
  0xf6   : > { %529 = dma.vmem_to_hbm [thread:$0]  (%p711_p5), %s747_s10, 512, %s752_s14, %s758_s22, %s641_s9, %s641_s9, %s642_s11  }
  0xf7 PF: > { %p535_p13 = scmp.ge.s32.totalorder %s637_s21, 2  ;;  %s424_s12 = sand.u32 1, %s625_s18  }
  0xf8   : > { %s425_s13 = scalar_lea.sflag [#allocation3], %s424_s12 }
  0xf9   : > { %p532_p0 = pnand %p535_p13, %p715_p6 }
  0xfb   : > { %p533_p1 = pneg %p532_p0 }
  0xfd   : > { %620 = dma.done.wait (%p533_p1), %s425_s13, 512  }
  0xfe   : > { %622 = vsyncadd (%p533_p1), %s425_s13, 4294966784  ;;  %p15_p2 = scmp.ge.s32.totalorder %s698_s24, 4   ;;  %s806_s18 = smov %s629_s19 }
  0xff   : > { %s807_s19 = smov %s633_s20  ;;  %s808_s20 = smov %s709_s27 }
 0x100   : > { %s809_s21 = smov %s698_s24  ;;  %17 = sbr.rel (!%p15_p2) target bundleno = 3 (0x3), region = 81 }
 0x105   :  { %430 = vsyncpa [#allocation3], 1 }
 0x106   :  { %432 = vsyncpa [#allocation3 + $0x1], 1 }

// kernel: light_transformer_forward.13
= control target key start
LH: loop header
LB: loop body
LE: loop exit
PB: predicated region body
PF: predicated region fallthrough
CT: control target
= control target key end

     0   :  { %s1394_s23 = smov 0   ;;  %s1552_s0 = inlined_call_operand.vmem [shape: bf16[2,8,32], index: 0, kind: input, shape index: {}]   ;;  %s1553_s1 = inlined_call_operand.vmem [shape: f32[2,8,1], index: 1, kind: input, shape index: {}]   ;;  %s1554_s2 = inlined_call_operand.vmem [shape: bf16[96,32], index: 2, kind: input, shape index: {}]   ;;  %s1555_s3 = inlined_call_operand.vmem [shape: f32[1,32], index: 3, kind: input, shape index: {}]   ;;  %s1556_s4 = inlined_call_operand.vmem [shape: f32[1,32], index: 4, kind: input, shape index: {}]   ;;  %s1557_s5 = inlined_call_operand.vmem [shape: f32[1,32], index: 5, kind: input, shape index: {}]   ;;  %s1558_s6 = inlined_call_operand.vmem [shape: bf16[96,32], index: 6, kind: input, shape index: {}]   ;;  %s1559_s7 = inlined_call_operand.vmem [shape: f32[1,32], index: 7, kind: input, shape index: {}]   ;;  %s1560_s8 = inlined_call_operand.vmem [shape: f32[1,32], index: 8, kind: input, shape index: {}]   ;;  %s1561_s9 = inlined_call_operand.vmem [shape: f32[1,32], index: 9, kind: input, shape index: {}]   ;;  %s1562_s10 = inlined_call_operand.vmem [shape: bf16[32,1], index: 10, kind: input, shape index: {}]   ;;  %s1563_s11 = inlined_call_operand.<no memory space> [shape: f32[1,1], index: 11, kind: input, shape index: {}]   ;;  %s1564_s12 = inlined_call_operand.vmem [shape: f32[2,8,1], index: 12, kind: output, shape index: {}]  }
   0x1   :  { %v17_v0 = vstv %s1563_s11 }
   0x2   :  { %18 = vst [vmem:[#allocation2] sm:$0x1] %v17_v0 }
   0x3 LB: > { %s1156_s24 = sadd.s32 4294967295, %s1319_s23   ;;  %p1160_p0 = scmp.ge.s32.totalorder %s1319_s23, 1  ;;  %s1319_s23 = sphi %s1394_s23, %s24_s23  }
   0x4   : > { %p372_p1 = scmp.lt.s32.totalorder %s1319_s23, 3 }
   0x6   : > { %p373_p2 = pnand %p1160_p0, %p372_p1 }
   0x7   : > { %p416_p3 = scmp.lt.s32.totalorder (!%p373_p2), %s1156_s24, 1  ;;  %s1324_s14 = smov (!%p373_p2), 32  }
   0x8   : > { %376 = sbr.rel (%p373_p2) target bundleno = 1987 (0x7c3), region = 68  ;;  %s1325_s29 = smov (!%p373_p2), 64  }
   0xd   : > { %v1321_v1 = vmov 0   ;;  %s1566_s24 = smov (!%p416_p3, %s1156_s24), 1  ;;  %v1322_v2 = vmov 0.0   ;;  %vm1323_vm0 = vmmov 0   ;;  %v438_v4 = vlaneseq  ;;  %v1295_v15 = vld [vmem:[%s1554_s2 + $0x28] sm:$0xff]   ;;  %v1296_v16 = vld [vmem:[%s1554_s2 + $0x20] sm:$0xff]  }
   0xe   : > { %1294 = vset.pattern.permute.xlu0 %v1321_v1  ;;  %s1162_s11 = sshll.u32 %s1566_s24, 3  ;;  %1221 = vmatprep.subr.mxu0 %v1322_v2  ;;  %s1161_s28 = sshll.u32 %s1566_s24, 2  ;;  %vm446_vm3 = vcmask 64512   ;;  %v1297_v17 = vld [vmem:[%s1554_s2 + $0x18] sm:$0xff]   ;;  %v1298_v18 = vld [vmem:[%s1554_s2 + $0x10] sm:$0xff]   ;;  %v1299_v19 = vld [vmem:[%s1554_s2 + $0x8] sm:$0xff]  }
   0xf   : > { %1226 = vmatprep.subr.mxu1 %v1322_v2  ;;  %s423_s27 = scalar_lea.vmem %s1553_s1, %s1162_s11  ;;  %1223 = vmatprep.mubr.msk.f32.mxu0 %vm1323_vm0, %v1322_v2  ;;  %v439_v5 = vshrl.u32 %v438_v4, 7  ;;  %s419_s13 = scalar_lea.vmem %s1552_s0, %s1161_s28  ;;  %v441_v7 = vand.u32 127, %v438_v4  ;;  %v1300_v20 = vld [vmem:[%s1554_s2] sm:$0xff]   ;;  %vm605_vm4 = vcmask 261120   ;;  %vm607_vm5 = vcmask 523264   ;;  %v1301_v53 = vld [vmem:[%s1558_s6 + $0x28] sm:$0xff]  }
  0x10   : > { %1228 = vmatprep.mubr.msk.f32.mxu1 %vm1323_vm0, %v1322_v2  ;;  %v1416_v3 = vld [vmem:[%s423_s27] sm:$0xff]  ;;  %vm665_vm6 = vcmask 785408   ;;  %v1303_v55 = vld [vmem:[%s1558_s6 + $0x18] sm:$0xff]   ;;  %v1304_v56 = vld [vmem:[%s1558_s6 + $0x10] sm:$0xff]   ;;  %s427_s28 = scalar_lea.vmem %s1564_s12, %s1162_s11  ;;  %vm1089_vm7 = vcmask 7168  }
  0x11   : > { %434 = vperm.xlu0 %1294, %v1416_v3   ;;  %v430_v6 = vld [vmem:[%s419_s13] sm:$0xf]  ;;  %v442_v8 = vadd.s32 4294967295, %v439_v5  ;;  %v520_v9 = vadd.s32 1, %v439_v5  ;;  %v1305_v57 = vld [vmem:[%s1558_s6 + $0x8] sm:$0xff]  }
  0x12   : > { %v431_v10 = vunpack.c.l.bf16 %v430_v6  ;;  %v1168_v30 = vld [vmem:[%s1555_s3] ss:$0 sm:$0xff] }
  0x13   : > { %vm443_vm1 = vcmp.eq.s32.totalorder %v441_v7, %v442_v8  ;;  %vm521_vm2 = vcmp.eq.s32.totalorder %v441_v7, %v520_v9  ;;  %v1176_v47 = vld [vmem:[%s1556_s4] ss:$0 sm:$0xff] }
  0x14   : > { %v1427_v13 = vsel %vm443_vm1, 1.0, %v1322_v2  ;;  %v1430_v14 = vsel %vm521_vm2, 1.0, %v1322_v2  ;;  %v1177_v49 = vld [vmem:[%s1557_s5] ss:$0 sm:$0xff] }
  0x15   : > { %v1302_v54 = vld [vmem:[%s1558_s6 + $0x20] sm:$0xff]  }
  0x16   : > { %v1306_v58 = vld [vmem:[%s1558_s6] sm:$0xff]  }
  0x17   : > { %v1180_v6 = vld [vmem:[%s1559_s7] ss:$0 sm:$0xff] }
  0x8c   : > { %v1423_v11 = vpop.permute.xlu0 %434 }
  0x8d   : > { %v437_v12 = vmul.f32 %v1423_v11, %v431_v10 }
  0x8f   : > { %598 = vrot.lane.b32.xlu0 %v437_v12, %s1324_s14  ;;  %1222 = vmatpush3.msra.mxu0 %v437_v12 }
  0x90   : > { %1227 = vmatpush3.msra.mxu1 %v437_v12  ;;  %1224 = vmatmul.mubr.msk.f32.vlgmr.msra.gmra.mxu0 %vm446_vm3, %v1427_v13 }
  0x91   : > { %1229 = vmatmul.mubr.msk.f32.vlgmr.msra.gmra.mxu1 %vm446_vm3, %v1430_v14  ;;  %1231 = vmatprep.subr.bf16.mxu0 %v1322_v2 }
  0x92   : > { %1243 = vmatprep.mubr.msk.bf16.mxu0 %vm1323_vm0, %v1322_v2  ;;  %1247 = vmatprep.subr.mxu1 %v1322_v2 }
  0x93   : > { %1249 = vmatprep.mubr.msk.f32.mxu1 %vm1323_vm0, %v1322_v2  ;;  %1232 = vmatpush3.bf16.msra.mxu0 %v1295_v15 }
  0x94   : > { %1233 = vmatprep.subr.bf16.mxu0 %v1322_v2 }
  0x97   : > { %1234 = vmatpush3.bf16.msra.mxu0 %v1296_v16 }
  0x98   : > { %1235 = vmatprep.subr.bf16.mxu0 %v1322_v2 }
  0x9b   : > { %1236 = vmatpush3.bf16.msra.mxu0 %v1297_v17 }
  0x9c   : > { %1237 = vmatprep.subr.bf16.mxu0 %v1322_v2 }
  0x9f   : > { %1238 = vmatpush3.bf16.msra.mxu0 %v1298_v18 }
  0xa0   : > { %1239 = vmatprep.subr.bf16.mxu0 %v1322_v2 }
  0xa3   : > { %1240 = vmatpush3.bf16.msra.mxu0 %v1299_v19 }
  0xa4   : > { %1241 = vmatprep.subr.bf16.mxu0 %v1322_v2 }
  0xa7   : > { %1242 = vmatpush3.bf16.msra.mxu0 %v1300_v20  ;;  %v1307_v20 = vld [vmem:[%s1562_s10 + $0x8] sm:$0xff]  }
  0xa8   : > { %1273 = vmatprep.subr.bf16.mxu0 %v1322_v2 }
 0x101   : > { %v599_v25 = vpop.permute.xlu0 %598 }
 0x150   : > { %v516_v21 = vpop.f32.mrf.mxu0 }
 0x151   : > { %v593_v22 = vpop.f32.mrf.mxu1  ;;  %v606_v26 = vsel %vm605_vm4, %v516_v21, %v599_v25  ;;  %v1308_v21 = vld [vmem:[%s1562_s10] sm:$0xff]  }
 0x152   : > { %602 = vrot.lane.b32.xlu1 %v593_v22, %s1325_s29  ;;  %v1225_v23 = vpop.f32.mrf.mxu0 }
 0x153   : > { %v1230_v24 = vpop.f32.mrf.mxu1 }
 0x1c4   : > { %v603_v27 = vpop.permute.xlu1 %602 }
 0x1c5   : > { %v608_v28 = vsel %vm607_vm5, %v606_v26, %v603_v27  ;;  %v1188_v26 = vld [vmem:[%s1560_s8] ss:$0 sm:$0xff] }
 0x1c6   : > { %v609_v29 = vpack.c.bf16 %v608_v28, %v608_v28  ;;  %v1189_v28 = vld [vmem:[%s1561_s9] ss:$0 sm:$0xff] }
 0x1c8   : > { %1244 = vmatmul.mubr.msk.bf16.vlgmr.msra.gmra.mxu0 %vm665_vm6, %v609_v29 }
 0x1c9   : > { %1277 = vmatprep.mubr.msk.bf16.mxu0 %vm1323_vm0, %v1322_v2  ;;  %1274 = vmatpush3.bf16.msra.mxu0 %v1307_v20 }
 0x1ca   : > { %1275 = vmatprep.subr.bf16.mxu0 %v1322_v2 }
 0x1cd   : > { %1276 = vmatpush3.bf16.msra.mxu0 %v1308_v21 }
 0x288   : > { %v703_v31 = vpop.f32.mrf.mxu0 }
 0x289   : > { %v704_v32 = vadd.f32 %v1168_v30, %v703_v31 }
 0x28a   : > { %v1245_v33 = vpop.f32.mrf.mxu0 }
 0x28b   : > { %v709_v34 = vmax.f32 %v704_v32, 0.0  ;;  %v1190_v32 = vld [vmem:[#allocation2] ss:$0 sm:$0xff] }
 0x28c   : > { %v706_v35 = vpop.f32.mrf.mxu0 }
 0x28d   : > { %v712_v36 = vsel %vm605_vm4, %v709_v34, 0.0 }
 0x28e   : > { %713 = vadd.xlane.f32.xlu1 %v712_v36  ;;  %v1246_v37 = vpop.f32.mrf.mxu0 }
 0x317   : > { %v714_v38 = vpop.xlane.xlu1 %713 }
 0x318   : > { %v716_v39 = vmul.f32 0.03125, %v714_v38 }
 0x31a   : > { %v717_v40 = vsub.f32 %v709_v34, %v716_v39 }
 0x31c   : > { %v718_v41 = vmul.f32 %v717_v40, %v717_v40 }
 0x31e   : > { %v719_v42 = vsel %vm605_vm4, %v718_v41, 0.0 }
 0x31f   : > { %720 = vadd.xlane.f32.xlu0 %v719_v42 }
 0x3a8   : > { %v721_v43 = vpop.xlane.xlu0 %720 }
 0x3a9   : > { %v722_v44 = vmul.f32 0.03125, %v721_v43 }
 0x3ab   : > { %v723_v45 = vadd.f32 1e-05, %v722_v44 }
 0x3ad   : > { %1309 = vrsqrt.f32 %v723_v45 }
 0x3ba   : > { %v1310_v46 = vpop.eup %1309 }
 0x3bb   : > { %v725_v48 = vmul.f32 %v1310_v46, %v717_v40 }
 0x3bd   : > { %v732_v50 = vmul.f32 %v1176_v47, %v725_v48 }
 0x3bf   : > { %v739_v51 = vadd.f32 %v1177_v49, %v732_v50 }
 0x3c1   : > { %v740_v52 = vmul.f32 %v739_v51, %v1423_v11 }
 0x3c3   : > { %882 = vrot.lane.b32.xlu0 %v740_v52, %s1324_s14  ;;  %1248 = vmatpush3.msra.mxu1 %v740_v52 }
 0x3c4   : > { %1250 = vmatmul.mubr.msk.f32.vlgmr.msra.gmra.mxu1 %vm446_vm3, %v1427_v13  ;;  %1252 = vmatprep.subr.mxu1 %v1322_v2 }
 0x3c5   : > { %1253 = vmatpush3.msra.mxu1 %v740_v52  ;;  %1254 = vmatprep.mubr.msk.f32.mxu1 %vm1323_vm0, %v1322_v2 }
 0x3c6   : > { %1257 = vmatprep.subr.bf16.mxu1 %v1322_v2 }
 0x3c8   : > { %1255 = vmatmul.mubr.msk.f32.vlgmr.msra.gmra.mxu1 %vm446_vm3, %v1430_v14 }
 0x3c9   : > { %1269 = vmatprep.mubr.msk.bf16.mxu1 %vm1323_vm0, %v1322_v2  ;;  %1258 = vmatpush3.bf16.msra.mxu1 %v1301_v53 }
 0x3ca   : > { %1259 = vmatprep.subr.bf16.mxu1 %v1322_v2 }
 0x3cd   : > { %1260 = vmatpush3.bf16.msra.mxu1 %v1302_v54 }
 0x3ce   : > { %1261 = vmatprep.subr.bf16.mxu1 %v1322_v2 }
 0x3d1   : > { %1262 = vmatpush3.bf16.msra.mxu1 %v1303_v55 }
 0x3d2   : > { %1263 = vmatprep.subr.bf16.mxu1 %v1322_v2 }
 0x3d5   : > { %1264 = vmatpush3.bf16.msra.mxu1 %v1304_v56 }
 0x3d6   : > { %1265 = vmatprep.subr.bf16.mxu1 %v1322_v2 }
 0x3d9   : > { %1266 = vmatpush3.bf16.msra.mxu1 %v1305_v57 }
 0x3da   : > { %1267 = vmatprep.subr.bf16.mxu1 %v1322_v2 }
 0x3dd   : > { %1268 = vmatpush3.bf16.msra.mxu1 %v1306_v58 }
 0x435   : > { %v883_v63 = vpop.permute.xlu0 %882 }
 0x484   : > { %v807_v59 = vpop.f32.mrf.mxu1 }
 0x485   : > { %v889_v0 = vsel %vm605_vm4, %v807_v59, %v883_v63 }
 0x486   : > { %v1251_v60 = vpop.f32.mrf.mxu1 }
 0x488   : > { %v877_v61 = vpop.f32.mrf.mxu1 }
 0x489   : > { %886 = vrot.lane.b32.xlu1 %v877_v61, %s1325_s29 }
 0x48a   : > { %v1256_v62 = vpop.f32.mrf.mxu1 }
 0x4fb   : > { %v887_v1 = vpop.permute.xlu1 %886 }
 0x4fc   : > { %v890_v4 = vsel %vm607_vm5, %v889_v0, %v887_v1 }
 0x4fd   : > { %v891_v5 = vpack.c.bf16 %v890_v4, %v890_v4 }
 0x4ff   : > { %1270 = vmatmul.mubr.msk.bf16.vlgmr.msra.gmra.mxu1 %vm665_vm6, %v891_v5 }
 0x5bf   : > { %v984_v7 = vpop.f32.mrf.mxu1 }
 0x5c0   : > { %v985_v8 = vadd.f32 %v1180_v6, %v984_v7 }
 0x5c1   : > { %v1271_v9 = vpop.f32.mrf.mxu1 }
 0x5c2   : > { %v990_v10 = vmax.f32 %v985_v8, 0.0 }
 0x5c3   : > { %v987_v12 = vpop.f32.mrf.mxu1 }
 0x5c4   : > { %v993_v13 = vsel %vm605_vm4, %v990_v10, 0.0 }
 0x5c5   : > { %994 = vadd.xlane.f32.xlu1 %v993_v13  ;;  %v1272_v14 = vpop.f32.mrf.mxu1 }
 0x64e   : > { %v995_v15 = vpop.xlane.xlu1 %994 }
 0x64f   : > { %v996_v16 = vmul.f32 0.03125, %v995_v15 }
 0x651   : > { %v997_v17 = vsub.f32 %v990_v10, %v996_v16 }
 0x653   : > { %v998_v18 = vmul.f32 %v997_v17, %v997_v17 }
 0x655   : > { %v999_v19 = vsel %vm605_vm4, %v998_v18, 0.0 }
 0x656   : > { %1000 = vadd.xlane.f32.xlu0 %v999_v19 }
 0x6df   : > { %v1001_v22 = vpop.xlane.xlu0 %1000 }
 0x6e0   : > { %v1002_v23 = vmul.f32 0.03125, %v1001_v22 }
 0x6e2   : > { %v1003_v24 = vadd.f32 1e-05, %v1002_v23 }
 0x6e4   : > { %1311 = vrsqrt.f32 %v1003_v24 }
 0x6f1   : > { %v1312_v25 = vpop.eup %1311 }
 0x6f2   : > { %v1005_v27 = vmul.f32 %v1312_v25, %v997_v17 }
 0x6f4   : > { %v1012_v29 = vmul.f32 %v1188_v26, %v1005_v27 }
 0x6f6   : > { %v1019_v30 = vadd.f32 %v1189_v28, %v1012_v29 }
 0x6f8   : > { %v1020_v2 = vmul.f32 %v1019_v30, %v1423_v11 }
 0x6fa   : > { %v1021_v31 = vpack.c.bf16 %v1020_v2, %v1020_v2 }
 0x6fc   : > { %1278 = vmatmul.mubr.msk.bf16.vlgmr.msra.gmra.mxu0 %vm605_vm4, %v1021_v31 }
 0x7bc   : > { %v1082_v33 = vpop.f32.mrf.mxu0 }
 0x7bd   : > { %v1083_v34 = vadd.f32 %v1190_v32, %v1082_v33 }
 0x7be   : > { %v1279_v35 = vpop.f32.mrf.mxu0 }
 0x7bf   : > { %v1088_v36 = vmul.f32 %v1083_v34, %v1416_v3 }
 0x7c0   : > { %v1085_v37 = vpop.f32.mrf.mxu0 }
 0x7c1   : > { %1090 = vst.msk [vmem:[%s427_s28] sm:$0xff] %vm1089_vm7, %v1088_v36 }
 0x7c2   : > { %v1280_v38 = vpop.f32.mrf.mxu0 }
 0x7c3 PF: > { %s24_s23 = sadd.s32 1, %s1319_s23  }
 0x7c4   : > { %p21_p4 = scmp.ge.s32.totalorder %s24_s23, 4  }
 0x7c6   :  { %23 = sbr.rel (!%p21_p4) target bundleno = 3 (0x3), region = 101 }

// kernel: light_transformer_forward.15
= control target key start
LH: loop header
LB: loop body
LE: loop exit
PB: predicated region body
PF: predicated region fallthrough
CT: control target
= control target key end

     0   :  { %s2706_s21 = smov 0   ;;  %s3136_s0 = inlined_call_operand.vmem [shape: bf16[2,32,32], index: 0, kind: input, shape index: {}]   ;;  %s3137_s1 = inlined_call_operand.vmem [shape: f32[2,32,1], index: 1, kind: input, shape index: {}]   ;;  %s3138_s2 = inlined_call_operand.vmem [shape: f32[2,1,32], index: 2, kind: input, shape index: {}]   ;;  %s3139_s3 = inlined_call_operand.vmem [shape: f32[2,32,32], index: 3, kind: input, shape index: {}]   ;;  %s3140_s4 = inlined_call_operand.vmem [shape: bf16[32,96], index: 4, kind: input, shape index: {}]   ;;  %s3141_s5 = inlined_call_operand.vmem [shape: f32[1,96], index: 5, kind: input, shape index: {}]   ;;  %s3142_s6 = inlined_call_operand.vmem [shape: bf16[32,32], index: 6, kind: input, shape index: {}]   ;;  %s3143_s7 = inlined_call_operand.vmem [shape: f32[1,32], index: 7, kind: input, shape index: {}]   ;;  %s3144_s8 = inlined_call_operand.vmem [shape: f32[1,32], index: 8, kind: input, shape index: {}]   ;;  %s3145_s9 = inlined_call_operand.vmem [shape: f32[1,32], index: 9, kind: input, shape index: {}]   ;;  %s3146_s10 = inlined_call_operand.vmem [shape: bf16[96,64], index: 10, kind: input, shape index: {}]   ;;  %s3147_s11 = inlined_call_operand.vmem [shape: f32[1,64], index: 11, kind: input, shape index: {}]   ;;  %s3148_s12 = inlined_call_operand.vmem [shape: bf16[192,32], index: 12, kind: input, shape index: {}]   ;;  %s3149_s13 = inlined_call_operand.vmem [shape: f32[1,32], index: 13, kind: input, shape index: {}]   ;;  %s3150_s14 = inlined_call_operand.vmem [shape: f32[1,32], index: 14, kind: input, shape index: {}]   ;;  %s3151_s15 = inlined_call_operand.vmem [shape: f32[1,32], index: 15, kind: input, shape index: {}]   ;;  %s3152_s16 = inlined_call_operand.vmem [shape: bf16[2,32,32], index: 16, kind: output, shape index: {}]  }
   0x1   :  { %3153 = sst [smem:[#allocation2_spill]] %s3136_s0 }
   0x2 LB: > { %s2182_s22 = sadd.s32 4294967295, %s2610_s21   ;;  %p2186_p0 = scmp.ge.s32.totalorder %s2610_s21, 1  ;;  %s2610_s21 = sphi %s2706_s21, %s26_s21  }
   0x3   : > { %p480_p1 = scmp.lt.s32.totalorder %s2610_s21, 3 }
   0x5   : > { %p481_p2 = pnand %p2186_p0, %p480_p1 }
   0x6   : > { %p538_p3 = scmp.lt.s32.totalorder (!%p481_p2), %s2182_s22, 1  ;;  %s3154_s30 = sld [smem:[#allocation2_spill]] (!%p481_p2) }
   0x7   : > { %484 = sbr.rel (%p481_p2) target bundleno = 3530 (0xdca), region = 84  ;;  %s2612_s19 = smov (!%p481_p2), 96  }
   0x8   : > { %s2614_s20 = smov (!%p481_p2), 80   ;;  %s2615_s23 = smov (!%p481_p2), 112  }
   0x9   : > { %s2616_s18 = smov (!%p481_p2), 48  }
   0xc   : > { %v2530_v0 = vld [vmem:[%s3140_s4 + $0x8] sm:$0xff]   ;;  %v2531_v1 = vld [vmem:[%s3140_s4] sm:$0xff]   ;;  %s3156_s22 = smov (!%p538_p3, %s2182_s22), 1  ;;  %vm603_vm0 = vcmask 261120   ;;  %vm679_vm1 = vcmask 130048   ;;  %v742_v25 = vlaneseq  ;;  %v671_v31 = vld [vmem:[%s3139_s3 + $0x10] sm:$0xff] }
   0xd   : > { %2347 = vmatprep.subr.bf16.mxu0 %v2530_v0  ;;  %s2276_s27 = sshll.u32 %s3156_s22, 4  ;;  %v2193_v5 = vld [vmem:[%s3141_s5] ss:$0 sm:$0xff]  ;;  %s550_s24 = scalar_lea.vmem %s3138_s2, %s3156_s22  ;;  %v672_v39 = vld [vmem:[%s3139_s3 + $0x18] sm:$0xff]  ;;  %v670_v41 = vld [vmem:[%s3139_s3 + $0x8] sm:$0xff]  ;;  %vm1521_vm10 = vcmask 523264  }
   0xe   : > { %2348 = vmatpush3.bf16.msra.mxu0 %v2530_v0  ;;  %s542_s0 = scalar_lea.vmem %s3154_s30, %s2276_s27  ;;  %v569_v26 = vld [vmem:[%s550_s24] sm:$0x1]  ;;  %v2762_v28 = vshrl.u32 %v742_v25, 7  ;;  %s2277_s26 = sshll.u32 %s3156_s22, 5  ;;  %vm1583_vm11 = vcmask 785408   ;;  %vm2101_vm12 = vcmask 257024  }
   0xf   : > { %2349 = vmatprep.subr.bf16.mxu0 %v2531_v1  ;;  %v2728_v2 = vld [vmem:[%s542_s0] sm:$0xff]   ;;  %v2730_v3 = vld [vmem:[%s542_s0 + $0x8] sm:$0xff]   ;;  %v2200_v27 = vadd.f32 -1.0, %v569_v26  ;;  %s547_s30 = scalar_lea.vmem %s3137_s1, %s2277_s26  ;;  %s2618_s0 = smov 16  }
  0x10   : > { %2351 = vmatprep.mubr.msk.bf16.mxu0 %vm603_vm0, %v2728_v2  ;;  %v744_v30 = vsub.s32 0, %v2762_v28  ;;  %v669_v34 = vld [vmem:[%s3139_s3] sm:$0xff]  ;;  %s2620_s26 = smov 32  }
  0x11   : > { %v660_v29 = vmul.f32 1e+09, %v2200_v27 }
  0x12   : > { %2350 = vmatpush3.bf16.msra.mxu0 %v2531_v1 }
  0x13   : > { %v2768_v32 = vrot.slane %v660_v29, %v744_v30 }
  0x15   : > { %2352 = vmatmul.mubr.msk.bf16.vlgmr.msra.gmra.mxu0 %vm603_vm0, %v2730_v3 }
  0xd5   : > { %v2353_v4 = vpop.f32.mrf.mxu0 }
  0xd6   : > { %v653_v7 = vadd.f32 %v2353_v4, %v2193_v5 }
  0xd7   : > { %v644_v6 = vpop.f32.mrf.mxu0 }
  0xd8   : > { %v645_v9 = vadd.f32 %v2193_v5, %v644_v6  ;;  %v663_v12 = vmul.f32 0.25, %v653_v7 }
  0xd9   : > { %v2354_v8 = vpop.f32.mrf.mxu0 }
  0xda   : > { %v656_v10 = vadd.f32 %v2354_v8, %v2193_v5  ;;  %v661_v16 = vmul.f32 0.25, %v645_v9 }
  0xdb   : > { %v647_v11 = vpop.f32.mrf.mxu0 }
  0xdc   : > { %v664_v13 = vmul.f32 0.25, %v656_v10  ;;  %v2739_v14 = vpack.c.bf16 %v656_v10, %v653_v7  ;;  %v648_v15 = vadd.f32 %v2193_v5, %v647_v11 }
  0xde   : > { %v2741_v17 = vpack.c.bf16 %v664_v13, %v663_v12  ;;  %v662_v18 = vmul.f32 0.25, %v648_v15  ;;  %677 = vrot.lane.b32.xlu0 %v2739_v14, %s2612_s19  ;;  %v2746_v20 = vpack.c.bf16 %v648_v15, %v645_v9 }
  0xe0   : > { %v2744_v19 = vpack.c.bf16 %v662_v18, %v661_v16 }
  0xe2   : > { %675 = vrot.lane.b32.xlu0 %v2746_v20, %s2612_s19  ;;  %2359 = vmatprep.mubr.msk.bf16.mxu0 %vm679_vm1, %v2744_v19  ;;  %s2613_s19 = smov 64  }
 0x150   : > { %v678_v21 = vpop.permute.xlu0 %677 }
 0x151   : > { %v690_v22 = vsel %vm679_vm1, %v678_v21, 0  ;;  %2467 = vmatprep.subr.msk.bf16.mxu0 %vm679_vm1, %v678_v21 }
 0x152   : > { %2356 = vmatpush3.bf16.xpose.msra.mxu0 %v690_v22 }
 0x154   : > { %v676_v23 = vpop.permute.xlu0 %675 }
 0x155   : > { %2468 = vmatprep.subr.msk.bf16.mxu0 %vm679_vm1, %v676_v23  ;;  %v687_v24 = vsel %vm679_vm1, %v676_v23, 0 }
 0x15a   : > { %2358 = vmatpush3.bf16.xpose.msra.mxu0 %v687_v24 }
 0x161   : > { %2360 = vmatmul.mubr.msk.bf16.vlgmr.msra.gmra.mxu0 %vm679_vm1, %v2741_v17 }
 0x221   : > { %v2361_v33 = vpop.f32.mrf.mxu0 }
 0x222   : > { %v735_v35 = vadd.f32 %v2361_v33, %v671_v31 }
 0x223   : > { %v726_v36 = vpop.f32.mrf.mxu0 }
 0x224   : > { %v727_v37 = vadd.f32 %v726_v36, %v669_v34  ;;  %v749_v38 = vadd.f32 %v2768_v32, %v735_v35 }
 0x225   : > { %v2362_v40 = vpop.f32.mrf.mxu0 }
 0x226   : > { %v757_v42 = vsel %vm603_vm0, %v749_v38, -inf  ;;  %v747_v43 = vadd.f32 %v2768_v32, %v727_v37  ;;  %v738_v45 = vadd.f32 %v2362_v40, %v672_v39 }
 0x227   : > { %758 = vmax.xlane.f32.xlu0 %v757_v42  ;;  %v729_v44 = vpop.f32.mrf.mxu0 }
 0x228   : > { %v730_v46 = vadd.f32 %v729_v44, %v670_v41  ;;  %v751_v47 = vsel %vm603_vm0, %v747_v43, -inf  ;;  %v750_v50 = vadd.f32 %v2768_v32, %v738_v45  ;;  %v2207_v41 = vld [vmem:[%s3139_s3 + $0x30] sm:$0xff] }
 0x229   : > { %752 = vmax.xlane.f32.xlu1 %v751_v47  ;;  %v2208_v47 = vld [vmem:[%s3139_s3 + $0x38] sm:$0xff] }
 0x22a   : > { %v748_v48 = vadd.f32 %v2768_v32, %v730_v46  ;;  %v760_v51 = vsel %vm603_vm0, %v750_v50, -inf }
 0x22c   : > { %v754_v49 = vsel %vm603_vm0, %v748_v48, -inf }
 0x22d   : > { %755 = vmax.xlane.f32.xlu1 %v754_v49  ;;  %v2206_v49 = vld [vmem:[%s3139_s3 + $0x28] sm:$0xff] }
 0x231   : > { %761 = vmax.xlane.f32.xlu1 %v760_v51 }
 0x23d   : > { %797 = vrot.lane.b32.xlu0 %v2746_v20, %s2613_s19 }
 0x242   : > { %799 = vrot.lane.b32.xlu1 %v2739_v14, %s2613_s19 }
 0x2b0   : > { %v759_v52 = vpop.xlane.xlu0 %758 }
 0x2b1   : > { %v765_v53 = vsub.f32 %v749_v38, %v759_v52 }
 0x2b2   : > { %v753_v54 = vpop.xlane.xlu1 %752 }
 0x2b3   : > { %v771_v55 = vmul.f32 1.442695, %v765_v53  ;;  %v763_v56 = vsub.f32 %v747_v43, %v753_v54  ;;  %v2205_v43 = vld [vmem:[%s3139_s3 + $0x20] sm:$0xff] }
 0x2b4   : > { %v798_v1 = vpop.permute.xlu0 %797 }
 0x2b5   : > { %2556 = vpow2.f32 %v771_v55  ;;  %v767_v57 = vmul.f32 1.442695, %v763_v56 }
 0x2b6   : > { %v756_v58 = vpop.xlane.xlu1 %755 }
 0x2b7   : > { %2558 = vpow2.f32 %v767_v57  ;;  %v764_v59 = vsub.f32 %v748_v48, %v756_v58 }
 0x2b9   : > { %v769_v62 = vmul.f32 1.442695, %v764_v59 }
 0x2ba   : > { %v762_v60 = vpop.xlane.xlu1 %761 }
 0x2bb   : > { %v766_v61 = vsub.f32 %v750_v50, %v762_v60 }
 0x2bd   : > { %v773_v63 = vmul.f32 1.442695, %v766_v61 }
 0x2be   : > { %v800_v0 = vpop.permute.xlu1 %799 }
 0x2bf   : > { %2560 = vpow2.f32 %v773_v63  ;;  %2363 = vmatprep.subr.bf16.mxu0 %v800_v0 }
 0x2c0   : > { %2364 = vmatpush3.bf16.msra.mxu0 %v800_v0  ;;  %2562 = vpow2.f32 %v769_v62 }
 0x2c1   : > { %2365 = vmatprep.subr.bf16.mxu0 %v798_v1 }
 0x2c2   : > { %v2557_v4 = vpop.eup %2556 }
 0x2c3   : > { %v781_v5 = vsel %vm603_vm0, %v2557_v4, 0.0 }
 0x2c4   : > { %v2559_v6 = vpop.eup %2558  ;;  %782 = vadd.xlane.f32.xlu1 %v781_v5  ;;  %2366 = vmatpush3.bf16.msra.mxu0 %v798_v1 }
 0x2c5   : > { %v775_v7 = vsel %vm603_vm0, %v2559_v6, 0.0 }
 0x2c8   : > { %776 = vadd.xlane.f32.xlu1 %v775_v7 }
 0x2cc   : > { %v2561_v8 = vpop.eup %2560 }
 0x2cd   : > { %v784_v9 = vsel %vm603_vm0, %v2561_v8, 0.0  ;;  %v2563_v10 = vpop.eup %2562 }
 0x2ce   : > { %785 = vadd.xlane.f32.xlu1 %v784_v9  ;;  %v778_v11 = vsel %vm603_vm0, %v2563_v10, 0.0 }
 0x2d2   : > { %779 = vadd.xlane.f32.xlu1 %v778_v11 }
 0x2e3   : > { %871 = vrot.lane.b32.xlu1 %v2739_v14, %s2614_s20 }
 0x2e7   : > { %869 = vrot.lane.b32.xlu1 %v2746_v20, %s2614_s20 }
 0x2eb   : > { %865 = vrot.lane.b32.xlu1 %v2744_v19, %s2615_s23 }
 0x2ef   : > { %867 = vrot.lane.b32.xlu1 %v2741_v17, %s2615_s23 }
 0x34d   : > { %v783_v12 = vpop.xlane.xlu1 %782 }
 0x351   : > { %v777_v13 = vpop.xlane.xlu1 %776 }
 0x357   : > { %v786_v15 = vpop.xlane.xlu1 %785 }
 0x358   : > { %2564 = vrcp.f32 %v786_v15 }
 0x359   : > { %2566 = vrcp.f32 %v777_v13 }
 0x35a   : > { %2568 = vrcp.f32 %v783_v12 }
 0x35b   : > { %v780_v16 = vpop.xlane.xlu1 %779 }
 0x35c   : > { %2570 = vrcp.f32 %v780_v16 }
 0x35f   : > { %v872_v18 = vpop.permute.xlu1 %871 }
 0x360   : > { %2469 = vmatprep.subr.msk.bf16.mxu0 %vm679_vm1, %v872_v18  ;;  %v883_v33 = vsel %vm679_vm1, %v872_v18, 0 }
 0x363   : > { %v870_v26 = vpop.permute.xlu1 %869 }
 0x364   : > { %v880_v35 = vsel %vm679_vm1, %v870_v26, 0 }
 0x365   : > { %v2565_v21 = vpop.eup %2564 }
 0x366   : > { %v2567_v22 = vpop.eup %2566  ;;  %v794_v27 = vmul.f32 %v2565_v21, %v2561_v8 }
 0x367   : > { %v2569_v23 = vpop.eup %2568  ;;  %v791_v19 = vmul.f32 %v2567_v22, %v2559_v6  ;;  %v866_v34 = vpop.permute.xlu1 %865 }
 0x368   : > { %v793_v17 = vmul.f32 %v2569_v23, %v2557_v4 }
 0x369   : > { %v2571_v24 = vpop.eup %2570 }
 0x36a   : > { %v792_v29 = vmul.f32 %v2571_v24, %v2563_v10  ;;  %v796_v31 = vpack.c.bf16 %v794_v27, %v793_v17 }
 0x36b   : > { %v868_v36 = vpop.permute.xlu1 %867 }
 0x36c   : > { %v795_v30 = vpack.c.bf16 %v792_v29, %v791_v19 }
 0x36e   : > { %2367 = vmatprep.mubr.msk.bf16.mxu0 %vm603_vm0, %v795_v30 }
 0x36f   : > { %2368 = vmatmul.mubr.msk.bf16.vlgmr.msra.gmra.mxu0 %vm603_vm0, %v796_v31 }
 0x370   : > { %2372 = vmatpush3.bf16.xpose.msra.mxu0 %v883_v33  ;;  %2375 = vmatprep.mubr.msk.bf16.mxu0 %vm679_vm1, %v866_v34 }
 0x371   : > { %2470 = vmatprep.subr.msk.bf16.mxu0 %vm679_vm1, %v870_v26 }
 0x378   : > { %2374 = vmatpush3.bf16.xpose.msra.mxu0 %v880_v35 }
 0x37f   : > { %2376 = vmatmul.mubr.msk.bf16.vlgmr.msra.gmra.mxu0 %vm679_vm1, %v868_v36 }
 0x42f   : > { %v2807_v37 = vpop.f32.mrf.mxu0 }
 0x431   : > { %v2809_v38 = vpop.f32.mrf.mxu0 }
 0x433   : > { %v2811_v39 = vpop.f32.mrf.mxu0 }
 0x435   : > { %v2813_v40 = vpop.f32.mrf.mxu0 }
 0x43f   : > { %v2377_v42 = vpop.f32.mrf.mxu0 }
 0x440   : > { %v928_v45 = vadd.f32 %v2377_v42, %v2207_v41  ;;  %v2534_v41 = vld [vmem:[%s3142_s6 + $0x8] sm:$0xff]  }
 0x441   : > { %v919_v44 = vpop.f32.mrf.mxu0  ;;  %2387 = vmatprep.subr.bf16.mxu1 %v2534_v41 }
 0x442   : > { %v920_v46 = vadd.f32 %v2205_v43, %v919_v44  ;;  %v936_v55 = vadd.f32 %v928_v45, %v2768_v32  ;;  %2388 = vmatpush3.bf16.msra.mxu1 %v2534_v41  ;;  %v2535_v43 = vld [vmem:[%s3142_s6] sm:$0xff]  }
 0x443   : > { %v2378_v48 = vpop.f32.mrf.mxu0  ;;  %2389 = vmatprep.subr.bf16.mxu1 %v2535_v43 }
 0x444   : > { %v934_v50 = vadd.f32 %v920_v46, %v2768_v32  ;;  %v931_v52 = vadd.f32 %v2378_v48, %v2208_v47  ;;  %v944_v58 = vsel %vm603_vm0, %v936_v55, -inf  ;;  %v2617_v47 = vmov 0  }
 0x445   : > { %v922_v51 = vpop.f32.mrf.mxu0  ;;  %2498 = vset.pattern.permute.xlu0 %v2617_v47  ;;  %2499 = vset.pattern.permute.xlu1 %v2617_v47 }
 0x446   : > { %v923_v53 = vadd.f32 %v2206_v49, %v922_v51  ;;  %v938_v54 = vsel %vm603_vm0, %v934_v50, -inf  ;;  %v937_v59 = vadd.f32 %v931_v52, %v2768_v32  ;;  %2390 = vmatpush3.bf16.msra.mxu1 %v2535_v43  ;;  %v568_v49 = vld [vmem:[%s547_s30 + $0x18] sm:$0xff]  ;;  %v567_v52 = vld [vmem:[%s547_s30 + $0x10] sm:$0xff] }
 0x447   : > { %939 = vmax.xlane.f32.xlu0 %v938_v54 }
 0x448   : > { %v935_v56 = vadd.f32 %v923_v53, %v2768_v32  ;;  %v947_v60 = vsel %vm603_vm0, %v937_v59, -inf  ;;  %v566_v53 = vld [vmem:[%s547_s30 + $0x8] sm:$0xff] }
 0x44a   : > { %v941_v57 = vsel %vm603_vm0, %v935_v56, -inf }
 0x44b   : > { %942 = vmax.xlane.f32.xlu1 %v941_v57  ;;  %945 = vmax.xlane.f32.xlu0 %v944_v58 }
 0x44f   : > { %948 = vmax.xlane.f32.xlu0 %v947_v60 }
 0x4d0   : > { %v940_v61 = vpop.xlane.xlu0 %939 }
 0x4d1   : > { %v950_v62 = vsub.f32 %v934_v50, %v940_v61  ;;  %v565_v50 = vld [vmem:[%s547_s30] sm:$0xff] }
 0x4d3   : > { %v954_v6 = vmul.f32 1.442695, %v950_v62 }
 0x4d4   : > { %v943_v63 = vpop.xlane.xlu1 %942  ;;  %v946_v0 = vpop.xlane.xlu0 %945 }
 0x4d5   : > { %v952_v1 = vsub.f32 %v936_v55, %v946_v0  ;;  %v951_v4 = vsub.f32 %v935_v56, %v943_v63 }
 0x4d7   : > { %v958_v5 = vmul.f32 1.442695, %v952_v1  ;;  %v956_v9 = vmul.f32 1.442695, %v951_v4 }
 0x4d8   : > { %v949_v7 = vpop.xlane.xlu0 %948 }
 0x4d9   : > { %v953_v8 = vsub.f32 %v937_v59, %v949_v7  ;;  %2572 = vpow2.f32 %v958_v5  ;;  %v563_v7 = vunpack.c.l.bf16 %v2730_v3 }
 0x4da   : > { %2574 = vpow2.f32 %v954_v6 }
 0x4db   : > { %v960_v10 = vmul.f32 1.442695, %v953_v8 }
 0x4dd   : > { %2576 = vpow2.f32 %v960_v10 }
 0x4de   : > { %2578 = vpow2.f32 %v956_v9 }
 0x4e6   : > { %v2573_v32 = vpop.eup %2572 }
 0x4e7   : > { %v968_v11 = vsel %vm603_vm0, %v2573_v32, 0.0  ;;  %v2575_v12 = vpop.eup %2574 }
 0x4e8   : > { %969 = vadd.xlane.f32.xlu1 %v968_v11  ;;  %v962_v18 = vsel %vm603_vm0, %v2575_v12, 0.0 }
 0x4ea   : > { %v2577_v13 = vpop.eup %2576 }
 0x4eb   : > { %v971_v15 = vsel %vm603_vm0, %v2577_v13, 0.0  ;;  %v2579_v16 = vpop.eup %2578 }
 0x4ec   : > { %972 = vadd.xlane.f32.xlu0 %v971_v15  ;;  %963 = vadd.xlane.f32.xlu1 %v962_v18  ;;  %v965_v21 = vsel %vm603_vm0, %v2579_v16, 0.0  ;;  %v562_v15 = vunpack.c.h.bf16 %v2728_v2 }
 0x4f0   : > { %966 = vadd.xlane.f32.xlu0 %v965_v21 }
 0x4fd   : > { %986 = vrot.lane.b32.xlu1 %v2739_v14, %s2616_s18 }
 0x506   : > { %984 = vrot.lane.b32.xlu0 %v2746_v20, %s2616_s18 }
 0x50a   : > { %1162 = vperm.xlu0 %2498, %v568_v49  }
 0x50e   : > { %1147 = vperm.xlu0 %2498, %v565_v50  }
 0x571   : > { %v970_v22 = vpop.xlane.xlu1 %969 }
 0x575   : > { %v973_v23 = vpop.xlane.xlu0 %972  ;;  %v964_v24 = vpop.xlane.xlu1 %963 }
 0x576   : > { %2580 = vrcp.f32 %v973_v23 }
 0x577   : > { %2582 = vrcp.f32 %v964_v24 }
 0x578   : > { %2584 = vrcp.f32 %v970_v22 }
 0x579   : > { %v967_v26 = vpop.xlane.xlu0 %966  ;;  %v987_v27 = vpop.permute.xlu1 %986 }
 0x57a   : > { %2586 = vrcp.f32 %v967_v26  ;;  %2379 = vmatprep.subr.bf16.mxu0 %v987_v27 }
 0x57b   : > { %2380 = vmatpush3.bf16.msra.mxu0 %v987_v27 }
 0x57d   : > { %v985_v19 = vpop.permute.xlu0 %984 }
 0x57e   : > { %2381 = vmatprep.subr.bf16.mxu0 %v985_v19 }
 0x57f   : > { %2382 = vmatpush3.bf16.msra.mxu0 %v985_v19 }
 0x583   : > { %v2581_v29 = vpop.eup %2580 }
 0x584   : > { %v2583_v17 = vpop.eup %2582  ;;  %v981_v31 = vmul.f32 %v2581_v29, %v2577_v13  ;;  %v561_v13 = vunpack.c.l.bf16 %v2728_v2 }
 0x585   : > { %v2585_v30 = vpop.eup %2584  ;;  %v978_v20 = vmul.f32 %v2583_v17, %v2575_v12  ;;  %v564_v12 = vunpack.c.h.bf16 %v2730_v3 }
 0x586   : > { %v980_v34 = vmul.f32 %v2585_v30, %v2573_v32 }
 0x587   : > { %v2587_v14 = vpop.eup %2586 }
 0x588   : > { %v979_v33 = vmul.f32 %v2587_v14, %v2579_v16  ;;  %v983_v36 = vpack.c.bf16 %v981_v31, %v980_v34 }
 0x58a   : > { %v982_v35 = vpack.c.bf16 %v979_v33, %v978_v20 }
 0x58c   : > { %2383 = vmatprep.mubr.msk.bf16.mxu0 %vm603_vm0, %v982_v35 }
 0x58d   : > { %2384 = vmatmul.mubr.msk.bf16.vlgmr.msra.gmra.mxu0 %vm603_vm0, %v983_v36 }
 0x64d   : > { %v2385_v42 = vpop.f32.mrf.mxu0 }
 0x64f   : > { %v1030_v44 = vpop.f32.mrf.mxu0 }
 0x651   : > { %v2386_v45 = vpop.f32.mrf.mxu0 }
 0x652   : > { %v2493_v51 = vpack.i.bf16 %v2386_v45, %v2385_v42 }
 0x653   : > { %v1033_v46 = vpop.f32.mrf.mxu0 }
 0x654   : > { %v2488_v48 = vpack.i.bf16 %v1033_v46, %v1030_v44 }
 0x656   : > { %2489 = vrot.lane.b32.xlu1 %v2488_v48, %s2618_s0 }
 0x65a   : > { %2494 = vrot.lane.b32.xlu1 %v2493_v51, %s2618_s0 }
 0x65e   : > { %1157 = vperm.xlu1 %2499, %v567_v52  }
 0x662   : > { %1152 = vperm.xlu1 %2499, %v566_v53  }
 0x6c8   : > { %v2490_v54 = vpop.permute.xlu1 %2489 }
 0x6c9   : > { %v2492_v55 = vunpack.i.h.bf16 %v2490_v54  ;;  %v2491_v56 = vunpack.i.l.bf16 %v2490_v54  ;;  %v1254_v54 = vadd.s32 8, %v2762_v28 }
 0x6cb   : > { %v1061_v57 = vsel %vm679_vm1, %v2809_v38, %v2491_v56  ;;  %v1062_v58 = vsel %vm679_vm1, %v2813_v40, %v2492_v55  ;;  %v2213_v38 = vld [vmem:[%s3143_s7] ss:$0 sm:$0xff]  ;;  %v2868_v40 = vpop.permute.xlu0 %1162  ;;  %v1258_v55 = vand.u32 127, %v742_v25  ;;  %v1259_v56 = vadd.s32 4294967295, %v2762_v28 }
 0x6cc   : > { %v2495_v59 = vpop.permute.xlu1 %2494  ;;  %v1065_v60 = vpack.c.bf16 %v1062_v58, %v1061_v57  ;;  %v1372_v57 = vadd.s32 1, %v2762_v28  ;;  %v1260_v58 = vadd.s32 4294967295, %v1254_v54 }
 0x6cd   : > { %v2497_v61 = vunpack.i.h.bf16 %v2495_v59  ;;  %v2496_v62 = vunpack.i.l.bf16 %v2495_v59  ;;  %v1373_v59 = vadd.s32 1, %v1254_v54  ;;  %vm1263_vm2 = vcmp.eq.s32.totalorder %v1258_v55, %v1259_v56  ;;  %v2538_v54 = vld [vmem:[%s3146_s10 + $0x18] sm:$0xff]   ;;  %v2540_v56 = vld [vmem:[%s3146_s10 + $0x8] sm:$0xff]  }
 0x6ce   : > { %2391 = vmatprep.mubr.msk.bf16.mxu1 %vm603_vm0, %v1065_v60  ;;  %vm1376_vm3 = vcmp.eq.s32.totalorder %v1258_v55, %v1372_v57  ;;  %v1255_v60 = vadd.s32 16, %v2762_v28  ;;  %vm1264_vm4 = vcmp.eq.s32.totalorder %v1258_v55, %v1260_v58  ;;  %v2541_v57 = vld [vmem:[%s3146_s10] sm:$0xff]  }
 0x6cf   : > { %v1064_v63 = vsel %vm679_vm1, %v2811_v39, %v2497_v61  ;;  %v1063_v0 = vsel %vm679_vm1, %v2807_v37, %v2496_v62  ;;  %v2874_v10 = vpop.permute.xlu0 %1147  ;;  %v2619_v61 = vmov 0.0   ;;  %vm1377_vm5 = vcmp.eq.s32.totalorder %v1258_v55, %v1373_v59 }
 0x6d0   : > { %v1066_v1 = vpack.c.bf16 %v1064_v63, %v1063_v0  ;;  %v2913_v62 = vsel %vm1263_vm2, 1.0, %v2619_v61  ;;  %v2915_v63 = vsel %vm1376_vm3, 1.0, %v2619_v61  ;;  %v2921_v25 = vsel %vm1264_vm4, 1.0, %v2619_v61 }
 0x6d1   : > { %2403 = vmatprep.mubr.msk.f32.mxu0 %vm603_vm0, %v2913_v62  ;;  %v2923_v0 = vsel %vm1377_vm5, 1.0, %v2619_v61 }
 0x6d2   : > { %2392 = vmatmul.mubr.msk.bf16.vlgmr.msra.gmra.mxu1 %vm603_vm0, %v1066_v1  ;;  %v1261_v1 = vadd.s32 4294967295, %v1255_v60 }
 0x6d3   : > { %2417 = vmatprep.mubr.msk.f32.mxu1 %vm603_vm0, %v2915_v63 }
 0x6d4   : > { %vm1265_vm6 = vcmp.eq.s32.totalorder %v1258_v55, %v1261_v1 }
 0x6d9   : > { %v2870_v5 = vpop.permute.xlu1 %1157 }
 0x6dd   : > { %v2882_v24 = vpop.permute.xlu1 %1152 }
 0x792   : > { %v2393_v4 = vpop.f32.mrf.mxu1 }
 0x793   : > { %v1139_v6 = vadd.f32 %v2393_v4, %v2213_v38  ;;  %v1256_v4 = vadd.s32 24, %v2762_v28 }
 0x794   : > { %v1130_v8 = vpop.f32.mrf.mxu1 }
 0x795   : > { %v1131_v39 = vadd.f32 %v2213_v38, %v1130_v8  ;;  %v1167_v9 = vmul.f32 %v2870_v5, %v1139_v6  ;;  %v2926_v6 = vsel %vm1265_vm6, 1.0, %v2619_v61  ;;  %v1262_v8 = vadd.s32 4294967295, %v1256_v4 }
 0x796   : > { %v2394_v37 = vpop.f32.mrf.mxu1 }
 0x797   : > { %v1142_v32 = vadd.f32 %v2394_v37, %v2213_v38  ;;  %v1171_v11 = vadd.f32 %v1167_v9, %v563_v7  ;;  %v1165_v23 = vmul.f32 %v2874_v10, %v1131_v39  ;;  %v1375_v39 = vadd.s32 1, %v1256_v4 }
 0x798   : > { %v1133_v16 = vpop.f32.mrf.mxu1  ;;  %vm1266_vm8 = vcmp.eq.s32.totalorder %v1258_v55, %v1262_v8 }
 0x799   : > { %v1168_v18 = vmul.f32 %v2868_v40, %v1142_v32  ;;  %v1134_v21 = vadd.f32 %v2213_v38, %v1133_v16  ;;  %v1181_v22 = vsel %vm603_vm0, %v1171_v11, 0.0  ;;  %v1169_v29 = vadd.f32 %v1165_v23, %v561_v13 }
 0x79a   : > { %1182 = vadd.xlane.f32.xlu0 %v1181_v22  ;;  %v1374_v38 = vadd.s32 1, %v1255_v60  ;;  %vm1379_vm9 = vcmp.eq.s32.totalorder %v1258_v55, %v1375_v39  ;;  %v2930_v9 = vsel %vm1266_vm8, 1.0, %v2619_v61 }
 0x79b   : > { %v1166_v26 = vmul.f32 %v2882_v24, %v1134_v21  ;;  %v1172_v27 = vadd.f32 %v1168_v18, %v564_v12  ;;  %v1175_v17 = vsel %vm603_vm0, %v1169_v29, 0.0  ;;  %v2932_v37 = vsel %vm1379_vm9, 1.0, %v2619_v61 }
 0x79c   : > { %vm1378_vm7 = vcmp.eq.s32.totalorder %v1258_v55, %v1374_v38  ;;  %v2539_v55 = vld [vmem:[%s3146_s10 + $0x10] sm:$0xff]  }
 0x79d   : > { %v1184_v3 = vsel %vm603_vm0, %v1172_v27, 0.0  ;;  %v1170_v19 = vadd.f32 %v1166_v26, %v562_v15  ;;  %v2928_v7 = vsel %vm1378_vm7, 1.0, %v2619_v61 }
 0x79e   : > { %1185 = vadd.xlane.f32.xlu1 %v1184_v3  ;;  %v2218_v3 = vld [vmem:[%s3144_s8] ss:$0 sm:$0xff] }
 0x79f   : > { %v1178_v2 = vsel %vm603_vm0, %v1170_v19, 0.0 }
 0x7a0   : > { %1179 = vadd.xlane.f32.xlu0 %v1178_v2 }
 0x7a2   : > { %1176 = vadd.xlane.f32.xlu1 %v1175_v17  ;;  %v2219_v17 = vld [vmem:[%s3145_s9] ss:$0 sm:$0xff] }
 0x823   : > { %v1183_v30 = vpop.xlane.xlu0 %1182 }
 0x824   : > { %v1190_v14 = vmul.f32 0.03125, %v1183_v30 }
 0x826   : > { %v2888_v31 = vsub.f32 %v1171_v11, %v1190_v14 }
 0x827   : > { %v1186_v20 = vpop.xlane.xlu1 %1185 }
 0x828   : > { %v1191_v33 = vmul.f32 0.03125, %v1186_v20  ;;  %v1198_v34 = vmul.f32 %v2888_v31, %v2888_v31 }
 0x829   : > { %v1180_v35 = vpop.xlane.xlu0 %1179 }
 0x82a   : > { %v2892_v36 = vsub.f32 %v1172_v27, %v1191_v33  ;;  %v1189_v41 = vmul.f32 0.03125, %v1180_v35  ;;  %v1206_v42 = vsel %vm603_vm0, %v1198_v34, 0.0 }
 0x82b   : > { %1207 = vadd.xlane.f32.xlu1 %v1206_v42  ;;  %v1177_v43 = vpop.xlane.xlu1 %1176 }
 0x82c   : > { %v2895_v44 = vsub.f32 %v1170_v19, %v1189_v41  ;;  %v1188_v45 = vmul.f32 0.03125, %v1177_v43  ;;  %v1199_v46 = vmul.f32 %v2892_v36, %v2892_v36 }
 0x82e   : > { %v2899_v48 = vsub.f32 %v1169_v29, %v1188_v45  ;;  %v1209_v49 = vsel %vm603_vm0, %v1199_v46, 0.0  ;;  %v1197_v50 = vmul.f32 %v2895_v44, %v2895_v44 }
 0x82f   : > { %1210 = vadd.xlane.f32.xlu0 %v1209_v49 }
 0x830   : > { %v1196_v51 = vmul.f32 %v2899_v48, %v2899_v48  ;;  %v1203_v52 = vsel %vm603_vm0, %v1197_v50, 0.0 }
 0x832   : > { %v1200_v53 = vsel %vm603_vm0, %v1196_v51, 0.0 }
 0x833   : > { %1204 = vadd.xlane.f32.xlu0 %v1203_v52  ;;  %1201 = vadd.xlane.f32.xlu1 %v1200_v53  ;;  %v2536_v52 = vld [vmem:[%s3146_s10 + $0x28] sm:$0xff]   ;;  %v2537_v53 = vld [vmem:[%s3146_s10 + $0x20] sm:$0xff]  }
 0x8b4   : > { %v1208_v32 = vpop.xlane.xlu1 %1207 }
 0x8b5   : > { %v1214_v11 = vmul.f32 0.03125, %v1208_v32 }
 0x8b7   : > { %v1218_v12 = vadd.f32 1e-05, %v1214_v11 }
 0x8b8   : > { %v1211_v13 = vpop.xlane.xlu0 %1210 }
 0x8b9   : > { %2588 = vrsqrt.f32 %v1218_v12  ;;  %v1215_v28 = vmul.f32 0.03125, %v1211_v13 }
 0x8bb   : > { %v1219_v15 = vadd.f32 1e-05, %v1215_v28 }
 0x8bc   : > { %v1205_v16 = vpop.xlane.xlu0 %1204  ;;  %v1202_v18 = vpop.xlane.xlu1 %1201 }
 0x8bd   : > { %2590 = vrsqrt.f32 %v1219_v15  ;;  %v1213_v21 = vmul.f32 0.03125, %v1205_v16  ;;  %v1212_v22 = vmul.f32 0.03125, %v1202_v18 }
 0x8bf   : > { %v1217_v23 = vadd.f32 1e-05, %v1213_v21  ;;  %v1216_v26 = vadd.f32 1e-05, %v1212_v22 }
 0x8c1   : > { %2592 = vrsqrt.f32 %v1217_v23 }
 0x8c2   : > { %2594 = vrsqrt.f32 %v1216_v26 }
 0x8c6   : > { %v2589_v27 = vpop.eup %2588 }
 0x8c7   : > { %v1226_v19 = vmul.f32 %v2589_v27, %v2888_v31 }
 0x8c9   : > { %v1236_v29 = vmul.f32 %v2218_v3, %v1226_v19 }
 0x8ca   : > { %v2591_v2 = vpop.eup %2590 }
 0x8cb   : > { %v1227_v30 = vmul.f32 %v2591_v2, %v2892_v36  ;;  %v1246_v14 = vadd.f32 %v2219_v17, %v1236_v29 }
 0x8cd   : > { %v1237_v20 = vmul.f32 %v2218_v3, %v1227_v30  ;;  %v2945_v43 = vmul.f32 %v1246_v14, %v2870_v5 }
 0x8ce   : > { %v2593_v33 = vpop.eup %2592 }
 0x8cf   : > { %v2595_v34 = vpop.eup %2594  ;;  %v1225_v35 = vmul.f32 %v2593_v33, %v2895_v44  ;;  %v1247_v41 = vadd.f32 %v2219_v17, %v1237_v20 }
 0x8d0   : > { %v1224_v42 = vmul.f32 %v2595_v34, %v2899_v48  ;;  %v2236_v34 = vld [vmem:[%s3147_s11] ss:$0 sm:$0xff] }
 0x8d1   : > { %v1235_v31 = vmul.f32 %v2218_v3, %v1225_v35  ;;  %v2948_v45 = vmul.f32 %v1247_v41, %v2868_v40 }
 0x8d2   : > { %v1234_v46 = vmul.f32 %v2218_v3, %v1224_v42 }
 0x8d3   : > { %2395 = vmatprep.subr.mxu0 %v2948_v45  ;;  %2409 = vmatprep.subr.mxu1 %v2948_v45  ;;  %v2500_v36 = vpack.i.bf16 %v2948_v45, %v2945_v43  ;;  %v1245_v49 = vadd.f32 %v2219_v17, %v1235_v31 }
 0x8d4   : > { %v1244_v44 = vadd.f32 %v2219_v17, %v1234_v46  ;;  %2396 = vmatpush3.msra.mxu0 %v2948_v45  ;;  %2410 = vmatpush3.msra.mxu1 %v2948_v45 }
 0x8d5   : > { %2501 = vrot.lane.b32.xlu1 %v2500_v36, %s2620_s26  ;;  %2397 = vmatprep.subr.mxu0 %v2945_v43  ;;  %v2958_v48 = vmul.f32 %v1245_v49, %v2882_v24 }
 0x8d6   : > { %v2961_v50 = vmul.f32 %v1244_v44, %v2874_v10  ;;  %2411 = vmatprep.subr.mxu1 %v2945_v43  ;;  %2398 = vmatpush3.msra.mxu0 %v2945_v43 }
 0x8d7   : > { %2412 = vmatpush3.msra.mxu1 %v2945_v43  ;;  %2399 = vmatprep.subr.mxu0 %v2958_v48 }
 0x8d8   : > { %2413 = vmatprep.subr.mxu1 %v2958_v48  ;;  %2400 = vmatpush3.msra.mxu0 %v2958_v48  ;;  %v2505_v51 = vpack.i.bf16 %v2958_v48, %v2961_v50 }
 0x8d9   : > { %2414 = vmatpush3.msra.mxu1 %v2958_v48  ;;  %2401 = vmatprep.subr.mxu0 %v2961_v50 }
 0x8da   : > { %2506 = vrot.lane.b32.xlu0 %v2505_v51, %s2620_s26  ;;  %2415 = vmatprep.subr.mxu1 %v2961_v50  ;;  %s555_s26 = scalar_lea.vmem %s3152_s16, %s2276_s27 }
 0x8db   : > { %2402 = vmatpush3.msra.mxu0 %v2961_v50  ;;  %2416 = vmatpush3.msra.mxu1 %v2961_v50 }
 0x8dc   : > { %2404 = vmatmul.mubr.msk.f32.vlgmr.msra.gmra.mxu0 %vm603_vm0, %v2921_v25  ;;  %2418 = vmatmul.mubr.msk.f32.vlgmr.msra.gmra.mxu1 %vm603_vm0, %v2923_v0 }
 0x8dd   : > { %2406 = vmatprep.mubr.msk.f32.mxu0 %vm603_vm0, %v2926_v6  ;;  %2420 = vmatprep.mubr.msk.f32.mxu1 %vm603_vm0, %v2928_v7 }
 0x8de   : > { %2423 = vmatprep.subr.bf16.mxu0 %v2536_v52 }
 0x8df   : > { %2424 = vmatpush3.bf16.msra.mxu0 %v2536_v52 }
 0x8e0   : > { %2407 = vmatmul.mubr.msk.f32.gmra.mxu0 %vm603_vm0, %v2930_v9  ;;  %2421 = vmatmul.mubr.msk.f32.gmra.mxu1 %vm603_vm0, %v2932_v37 }
 0x8e1   : > { %2447 = vmatprep.mubr.msk.f32.mxu1 %vm603_vm0, %v2913_v62  ;;  %2425 = vmatprep.subr.bf16.mxu0 %v2537_v53 }
 0x8e3   : > { %2426 = vmatpush3.bf16.msra.mxu0 %v2537_v53 }
 0x8e4   : > { %2427 = vmatprep.subr.bf16.mxu0 %v2538_v54 }
 0x8e7   : > { %2428 = vmatpush3.bf16.msra.mxu0 %v2538_v54 }
 0x8e8   : > { %2429 = vmatprep.subr.bf16.mxu0 %v2539_v55 }
 0x8eb   : > { %2430 = vmatpush3.bf16.msra.mxu0 %v2539_v55 }
 0x8ec   : > { %2431 = vmatprep.subr.bf16.mxu0 %v2540_v56 }
 0x8ef   : > { %2432 = vmatpush3.bf16.msra.mxu0 %v2540_v56 }
 0x8f0   : > { %2433 = vmatprep.subr.bf16.mxu0 %v2541_v57 }
 0x8f3   : > { %2434 = vmatpush3.bf16.msra.mxu0 %v2541_v57 }
 0x947   : > { %v2502_v8 = vpop.permute.xlu1 %2501 }
 0x948   : > { %v2504_v26 = vunpack.i.h.bf16 %v2502_v8  ;;  %v2503_v27 = vunpack.i.l.bf16 %v2502_v8 }
 0x94c   : > { %v2507_v39 = vpop.permute.xlu0 %2506 }
 0x94d   : > { %v2509_v11 = vunpack.i.h.bf16 %v2507_v39  ;;  %v2508_v12 = vunpack.i.l.bf16 %v2507_v39 }
 0x99c   : > { %v2419_v58 = vpop.f32.mrf.mxu1  ;;  %v2405_v38 = vpop.f32.mrf.mxu0 }
 0x99d   : > { %v1518_v16 = vsel %vm603_vm0, %v2405_v38, %v2509_v11  ;;  %v2552_v38 = vld [vmem:[%s3148_s12 + $0x48] sm:$0xff]  }
 0x99e   : > { %v1466_v59 = vpop.f32.mrf.mxu1  ;;  %v1353_v4 = vpop.f32.mrf.mxu0 }
 0x99f   : > { %v2510_v60 = vpack.i.bf16 %v2419_v58, %v1466_v59  ;;  %v1517_v18 = vsel %vm603_vm0, %v1353_v4, %v2508_v12  ;;  %v2553_v4 = vld [vmem:[%s3148_s12 + $0x40] sm:$0xff]  }
 0x9a0   : > { %v2422_v61 = vpop.f32.mrf.mxu1  ;;  %v2408_v32 = vpop.f32.mrf.mxu0 }
 0x9a1   : > { %2511 = vrot.lane.b32.xlu1 %v2510_v60, %s2613_s19  ;;  %v1520_v17 = vsel %vm603_vm0, %v2408_v32, %v2504_v26 }
 0x9a2   : > { %v1476_v62 = vpop.f32.mrf.mxu1  ;;  %v1363_v21 = vpop.f32.mrf.mxu0 }
 0x9a3   : > { %v2515_v1 = vpack.i.bf16 %v2422_v61, %v1476_v62  ;;  %v1519_v30 = vsel %vm603_vm0, %v1363_v21, %v2503_v27  ;;  %v2542_v61 = vld [vmem:[%s3148_s12 + $0x38] sm:$0xff]  }
 0x9a4   : > { %v2550_v62 = vld [vmem:[%s3148_s12 + $0x58] sm:$0xff]  }
 0x9a5   : > { %2516 = vrot.lane.b32.xlu0 %v2515_v1, %s2613_s19  ;;  %v2551_v1 = vld [vmem:[%s3148_s12 + $0x50] sm:$0xff]  }
 0xa13   : > { %v2512_v13 = vpop.permute.xlu1 %2511 }
 0xa14   : > { %v2514_v28 = vunpack.i.h.bf16 %v2512_v13  ;;  %v2513_v15 = vunpack.i.l.bf16 %v2512_v13 }
 0xa16   : > { %v1523_v22 = vsel %vm1521_vm10, %v1518_v16, %v2514_v28  ;;  %v1522_v23 = vsel %vm1521_vm10, %v1517_v18, %v2513_v15 }
 0xa17   : > { %v1526_v3 = vpack.c.bf16 %v1523_v22, %v1522_v23  ;;  %v2517_v19 = vpop.permute.xlu0 %2516 }
 0xa18   : > { %v2519_v29 = vunpack.i.h.bf16 %v2517_v19  ;;  %v2518_v2 = vunpack.i.l.bf16 %v2517_v19 }
 0xa19   : > { %2435 = vmatprep.mubr.msk.bf16.mxu0 %vm1583_vm11, %v1526_v3 }
 0xa1a   : > { %v1524_v14 = vsel %vm1521_vm10, %v1519_v30, %v2518_v2  ;;  %v1525_v20 = vsel %vm1521_vm10, %v1520_v17, %v2519_v29 }
 0xa1b   : > { %v1527_v33 = vpack.c.bf16 %v1525_v20, %v1524_v14  ;;  %v2253_v14 = vld [vmem:[%s3149_s13] ss:$0 sm:$0xff] }
 0xa1d   : > { %2436 = vmatmul.mubr.msk.bf16.vlgmr.msra.gmra.mxu0 %vm1583_vm11, %v1527_v33 }
 0xadd   : > { %v2437_v35 = vpop.f32.mrf.mxu0 }
 0xade   : > { %v1633_v41 = vadd.f32 %v2437_v35, %v2236_v34 }
 0xadf   : > { %v1624_v42 = vpop.f32.mrf.mxu0 }
 0xae0   : > { %v1625_v31 = vadd.f32 %v2236_v34, %v1624_v42  ;;  %v1641_v36 = vmax.f32 %v1633_v41, 0.0 }
 0xae1   : > { %v2438_v46 = vpop.f32.mrf.mxu0 }
 0xae2   : > { %v1636_v49 = vadd.f32 %v2438_v46, %v2236_v34  ;;  %v1639_v51 = vmax.f32 %v1625_v31, 0.0  ;;  %v1645_v54 = vmul.f32 %v1641_v36, %v2870_v5 }
 0xae3   : > { %v1627_v44 = vpop.f32.mrf.mxu0 }
 0xae4   : > { %v1642_v52 = vmax.f32 %v1636_v49, 0.0  ;;  %v1628_v53 = vadd.f32 %v2236_v34, %v1627_v44  ;;  %v1643_v57 = vmul.f32 %v1639_v51, %v2874_v10 }
 0xae6   : > { %v1646_v55 = vmul.f32 %v1642_v52, %v2868_v40  ;;  %v1640_v56 = vmax.f32 %v1628_v53, 0.0 }
 0xae8   : > { %v1644_v58 = vmul.f32 %v1640_v56, %v2882_v24  ;;  %2439 = vmatprep.subr.mxu1 %v1646_v55  ;;  %v2525_v59 = vpack.i.bf16 %v1646_v55, %v1645_v54 }
 0xae9   : > { %2440 = vmatpush3.msra.mxu1 %v1646_v55 }
 0xaea   : > { %2526 = vrot.lane.b32.xlu0 %v2525_v59, %s2613_s19  ;;  %2441 = vmatprep.subr.mxu1 %v1645_v54  ;;  %v2520_v60 = vpack.i.bf16 %v1644_v58, %v1643_v57 }
 0xaeb   : > { %2442 = vmatpush3.msra.mxu1 %v1645_v54 }
 0xaec   : > { %2443 = vmatprep.subr.mxu1 %v1644_v58  ;;  %2521 = vrot.lane.b32.xlu1 %v2520_v60, %s2613_s19 }
 0xaed   : > { %2444 = vmatpush3.msra.mxu1 %v1644_v58 }
 0xaee   : > { %2445 = vmatprep.subr.mxu1 %v1643_v57 }
 0xaef   : > { %2446 = vmatpush3.msra.mxu1 %v1643_v57 }
 0xaf0   : > { %2448 = vmatmul.mubr.msk.f32.vlgmr.msra.gmra.mxu1 %vm603_vm0, %v2921_v25  ;;  %2453 = vmatprep.subr.mxu1 %v1646_v55  ;;  %v2543_v25 = vld [vmem:[%s3148_s12 + $0x30] sm:$0xff]  }
 0xaf1   : > { %2454 = vmatpush3.msra.mxu1 %v1646_v55  ;;  %2450 = vmatprep.mubr.msk.f32.mxu1 %vm603_vm0, %v2926_v6  ;;  %v2546_v6 = vld [vmem:[%s3148_s12 + $0x18] sm:$0xff]  }
 0xaf2   : > { %2455 = vmatprep.subr.mxu1 %v1645_v54 }
 0xaf3   : > { %2456 = vmatpush3.msra.mxu1 %v1645_v54 }
 0xaf4   : > { %2451 = vmatmul.mubr.msk.f32.gmra.mxu1 %vm603_vm0, %v2930_v9  ;;  %2457 = vmatprep.subr.mxu1 %v1644_v58  ;;  %v2548_v9 = vld [vmem:[%s3148_s12 + $0x8] sm:$0xff]  }
 0xaf5   : > { %2458 = vmatpush3.msra.mxu1 %v1644_v58  ;;  %2461 = vmatprep.mubr.msk.f32.mxu1 %vm603_vm0, %v2915_v63  ;;  %v2544_v63 = vld [vmem:[%s3148_s12 + $0x28] sm:$0xff]  }
 0xaf6   : > { %2459 = vmatprep.subr.mxu1 %v1643_v57 }
 0xaf7   : > { %2460 = vmatpush3.msra.mxu1 %v1643_v57 }
 0xaf8   : > { %2462 = vmatmul.mubr.msk.f32.vlgmr.msra.gmra.mxu1 %vm603_vm0, %v2923_v0  ;;  %1950 = vmatprep.subr.bf16.mxu1 %v2617_v47  ;;  %v2545_v0 = vld [vmem:[%s3148_s12 + $0x20] sm:$0xff]  }
 0xaf9   : > { %2464 = vmatprep.mubr.msk.f32.mxu1 %vm603_vm0, %v2928_v7  ;;  %1951 = vmatpush1.bf16.msra.mxu1 %v2542_v61  ;;  %v2547_v7 = vld [vmem:[%s3148_s12 + $0x10] sm:$0xff]  }
 0xafa   : > { %1952 = vmatprep.subr.bf16.mxu1 %v2617_v47 }
 0xafc   : > { %2465 = vmatmul.mubr.msk.f32.gmra.mxu1 %vm603_vm0, %v2932_v37  ;;  %v2549_v37 = vld [vmem:[%s3148_s12] sm:$0xff]  }
 0xafd   : > { %1953 = vmatpush1.bf16.msra.mxu1 %v2543_v25 }
 0xafe   : > { %1954 = vmatprep.subr.bf16.mxu1 %v2617_v47 }
 0xb01   : > { %1955 = vmatpush1.bf16.msra.mxu1 %v2544_v63 }
 0xb02   : > { %1956 = vmatprep.subr.bf16.mxu1 %v2617_v47 }
 0xb05   : > { %1957 = vmatpush1.bf16.msra.mxu1 %v2545_v0 }
 0xb06   : > { %1958 = vmatprep.subr.bf16.mxu1 %v2617_v47 }
 0xb09   : > { %1959 = vmatpush1.bf16.msra.mxu1 %v2546_v6 }
 0xb0a   : > { %1960 = vmatprep.subr.bf16.mxu1 %v2617_v47 }
 0xb0d   : > { %1961 = vmatpush1.bf16.msra.mxu1 %v2547_v7 }
 0xb0e   : > { %1962 = vmatprep.subr.bf16.mxu1 %v2617_v47 }
 0xb11   : > { %1963 = vmatpush1.bf16.msra.mxu1 %v2548_v9 }
 0xb12   : > { %1964 = vmatprep.subr.bf16.mxu1 %v2617_v47 }
 0xb15   : > { %1965 = vmatpush1.bf16.msra.mxu1 %v2549_v37 }
 0xb16   : > { %1974 = vmatprep.subr.bf16.mxu1 %v2617_v47 }
 0xb19   : > { %1975 = vmatpush2.bf16.msra.mxu1 %v2550_v62 }
 0xb1a   : > { %1976 = vmatprep.subr.bf16.mxu1 %v2617_v47 }
 0xb1d   : > { %1977 = vmatpush2.bf16.msra.mxu1 %v2551_v1 }
 0xb1e   : > { %1978 = vmatprep.subr.bf16.mxu1 %v2617_v47 }
 0xb21   : > { %1979 = vmatpush2.bf16.msra.mxu1 %v2552_v38 }
 0xb22   : > { %1980 = vmatprep.subr.bf16.mxu1 %v2617_v47 }
 0xb25   : > { %1981 = vmatpush2.bf16.msra.mxu1 %v2553_v4 }
 0xb5c   : > { %v2527_v47 = vpop.permute.xlu0 %2526 }
 0xb5d   : > { %v2528_v3 = vunpack.i.l.bf16 %v2527_v47  ;;  %v2529_v29 = vunpack.i.h.bf16 %v2527_v47 }
 0xb5e   : > { %v2522_v32 = vpop.permute.xlu1 %2521 }
 0xb5f   : > { %v2523_v13 = vunpack.i.l.bf16 %v2522_v32  ;;  %v2524_v15 = vunpack.i.h.bf16 %v2522_v32 }
 0xbb0   : > { %v2449_v8 = vpop.f32.mrf.mxu1 }
 0xbb1   : > { %v1834_v21 = vsel %vm1521_vm10, %v2449_v8, %v2524_v15 }
 0xbb2   : > { %v1713_v39 = vpop.f32.mrf.mxu1 }
 0xbb3   : > { %v1833_v16 = vsel %vm1521_vm10, %v1713_v39, %v2523_v13 }
 0xbb4   : > { %v2452_v11 = vpop.f32.mrf.mxu1  ;;  %v1837_v23 = vpack.c.bf16 %v1834_v21, %v1833_v16 }
 0xbb5   : > { %v1836_v17 = vsel %vm1521_vm10, %v2452_v11, %v2529_v29 }
 0xbb6   : > { %v1723_v12 = vpop.f32.mrf.mxu1 }
 0xbb7   : > { %v1835_v2 = vsel %vm1521_vm10, %v1723_v12, %v2528_v3 }
 0xbb8   : > { %v2463_v28 = vpop.f32.mrf.mxu1  ;;  %v1839_v30 = vpack.c.bf16 %v1836_v17, %v1835_v2  ;;  %v2268_v17 = vld [vmem:[%s3150_s14] ss:$0 sm:$0xff] }
 0xbba   : > { %v1798_v18 = vpop.f32.mrf.mxu1 }
 0xbbb   : > { %v1838_v22 = vpack.c.bf16 %v2463_v28, %v1798_v18 }
 0xbbc   : > { %v2466_v26 = vpop.f32.mrf.mxu1 }
 0xbbd   : > { %2266 = vmatprep.mubr.msk.bf16.mxu1 %vm1521_vm10, %v1838_v22 }
 0xbbe   : > { %1983 = vmatmul.mubr.bf16.vlgmr.msra.gmra.mxu1 %v1837_v23  ;;  %v1808_v27 = vpop.f32.mrf.mxu1 }
 0xbbf   : > { %v1840_v19 = vpack.c.bf16 %v2466_v26, %v1808_v27 }
 0xbc1   : > { %2267 = vmatprep.mubr.msk.bf16.mxu1 %vm1521_vm10, %v1840_v19 }
 0xbc6   : > { %1991 = vmatmul.mubr.bf16.gmra.mxu1 %v1839_v30 }
 0xc7e   : > { %v1984_v20 = vpop.f32.mrf.mxu1 }
 0xc7f   : > { %v1985_v33 = vadd.f32 %v2253_v14, %v1984_v20 }
 0xc80   : > { %v1986_v34 = vpop.f32.mrf.mxu1 }
 0xc81   : > { %v1999_v35 = vmul.f32 %v1985_v33, %v2874_v10 }
 0xc82   : > { %v1987_v41 = vpop.f32.mrf.mxu1 }
 0xc83   : > { %v1988_v42 = vadd.f32 %v2253_v14, %v1987_v41  ;;  %v2003_v31 = vadd.f32 %v1999_v35, %v2961_v50 }
 0xc84   : > { %v1989_v46 = vpop.f32.mrf.mxu1 }
 0xc85   : > { %v2000_v36 = vmul.f32 %v1988_v42, %v2882_v24  ;;  %v2009_v49 = vsel %vm603_vm0, %v2003_v31, 0.0 }
 0xc86   : > { %2010 = vadd.xlane.f32.xlu1 %v2009_v49  ;;  %v1992_v44 = vpop.f32.mrf.mxu1 }
 0xc87   : > { %v1993_v51 = vadd.f32 %v2253_v14, %v1992_v44  ;;  %v2004_v52 = vadd.f32 %v2000_v36, %v2958_v48 }
 0xc88   : > { %v1994_v53 = vpop.f32.mrf.mxu1 }
 0xc89   : > { %v2001_v54 = vmul.f32 %v1993_v51, %v2870_v5  ;;  %v2012_v55 = vsel %vm603_vm0, %v2004_v52, 0.0 }
 0xc8a   : > { %2013 = vadd.xlane.f32.xlu0 %v2012_v55  ;;  %v1995_v56 = vpop.f32.mrf.mxu1 }
 0xc8b   : > { %v1996_v57 = vadd.f32 %v2253_v14, %v1995_v56  ;;  %v2005_v50 = vadd.f32 %v2001_v54, %v2945_v43  ;;  %v2269_v14 = vld [vmem:[%s3151_s15] ss:$0 sm:$0xff] }
 0xc8c   : > { %v1997_v58 = vpop.f32.mrf.mxu1 }
 0xc8d   : > { %v2002_v59 = vmul.f32 %v1996_v57, %v2868_v40  ;;  %v2015_v60 = vsel %vm603_vm0, %v2005_v50, 0.0 }
 0xc8e   : > { %2016 = vadd.xlane.f32.xlu0 %v2015_v60 }
 0xc8f   : > { %v2006_v61 = vadd.f32 %v2002_v59, %v2948_v45 }
 0xc91   : > { %v2018_v48 = vsel %vm603_vm0, %v2006_v61, 0.0 }
 0xc92   : > { %2019 = vadd.xlane.f32.xlu1 %v2018_v48 }
 0xd0f   : > { %v2011_v25 = vpop.xlane.xlu1 %2010 }
 0xd10   : > { %v2021_v63 = vmul.f32 0.03125, %v2011_v25 }
 0xd12   : > { %v2025_v0 = vsub.f32 %v2003_v31, %v2021_v63 }
 0xd13   : > { %v2014_v6 = vpop.xlane.xlu0 %2013 }
 0xd14   : > { %v2022_v7 = vmul.f32 0.03125, %v2014_v6  ;;  %v2029_v9 = vmul.f32 %v2025_v0, %v2025_v0 }
 0xd16   : > { %v2026_v37 = vsub.f32 %v2004_v52, %v2022_v7  ;;  %v2033_v43 = vsel %vm603_vm0, %v2029_v9, 0.0 }
 0xd17   : > { %2034 = vadd.xlane.f32.xlu0 %v2033_v43  ;;  %v2017_v62 = vpop.xlane.xlu0 %2016 }
 0xd18   : > { %v2023_v1 = vmul.f32 0.03125, %v2017_v62  ;;  %v2030_v38 = vmul.f32 %v2026_v37, %v2026_v37 }
 0xd1a   : > { %v2027_v4 = vsub.f32 %v2005_v50, %v2023_v1  ;;  %v2036_v8 = vsel %vm603_vm0, %v2030_v38, 0.0 }
 0xd1b   : > { %2037 = vadd.xlane.f32.xlu1 %v2036_v8  ;;  %v2020_v45 = vpop.xlane.xlu1 %2019 }
 0xd1c   : > { %v2024_v39 = vmul.f32 0.03125, %v2020_v45  ;;  %v2031_v32 = vmul.f32 %v2027_v4, %v2027_v4 }
 0xd1e   : > { %v2028_v11 = vsub.f32 %v2006_v61, %v2024_v39  ;;  %v2039_v12 = vsel %vm603_vm0, %v2031_v32, 0.0 }
 0xd1f   : > { %2040 = vadd.xlane.f32.xlu0 %v2039_v12 }
 0xd20   : > { %v2032_v13 = vmul.f32 %v2028_v11, %v2028_v11 }
 0xd22   : > { %v2042_v28 = vsel %vm603_vm0, %v2032_v13, 0.0 }
 0xd23   : > { %2043 = vadd.xlane.f32.xlu1 %v2042_v28 }
 0xda0   : > { %v2035_v15 = vpop.xlane.xlu0 %2034 }
 0xda1   : > { %v2045_v16 = vmul.f32 0.03125, %v2035_v15 }
 0xda3   : > { %v2049_v18 = vadd.f32 1e-05, %v2045_v16 }
 0xda4   : > { %v2038_v21 = vpop.xlane.xlu1 %2037 }
 0xda5   : > { %2596 = vrsqrt.f32 %v2049_v18  ;;  %v2046_v22 = vmul.f32 0.03125, %v2038_v21 }
 0xda7   : > { %v2050_v47 = vadd.f32 1e-05, %v2046_v22 }
 0xda8   : > { %v2041_v23 = vpop.xlane.xlu0 %2040 }
 0xda9   : > { %2598 = vrsqrt.f32 %v2050_v47  ;;  %v2047_v26 = vmul.f32 0.03125, %v2041_v23 }
 0xdab   : > { %v2051_v27 = vadd.f32 1e-05, %v2047_v26 }
 0xdac   : > { %v2044_v3 = vpop.xlane.xlu1 %2043 }
 0xdad   : > { %2600 = vrsqrt.f32 %v2051_v27  ;;  %v2048_v19 = vmul.f32 0.03125, %v2044_v3 }
 0xdaf   : > { %v2052_v29 = vadd.f32 1e-05, %v2048_v19 }
 0xdb1   : > { %2602 = vrsqrt.f32 %v2052_v29 }
 0xdb2   : > { %v2597_v2 = vpop.eup %2596 }
 0xdb3   : > { %v2057_v30 = vmul.f32 %v2597_v2, %v2025_v0 }
 0xdb5   : > { %v2067_v20 = vmul.f32 %v2268_v17, %v2057_v30 }
 0xdb6   : > { %v2599_v33 = vpop.eup %2598 }
 0xdb7   : > { %v2077_v34 = vadd.f32 %v2269_v14, %v2067_v20  ;;  %v2058_v35 = vmul.f32 %v2599_v33, %v2026_v37 }
 0xdb9   : > { %v2081_v41 = vmul.f32 %v2077_v34, %v2874_v10  ;;  %v2068_v42 = vmul.f32 %v2268_v17, %v2058_v35 }
 0xdba   : > { %v2601_v31 = vpop.eup %2600 }
 0xdbb   : > { %v2279_v46 = vpack.c.bf16 %v2081_v41, %v2081_v41  ;;  %v2078_v36 = vadd.f32 %v2269_v14, %v2068_v42  ;;  %v2059_v49 = vmul.f32 %v2601_v31, %v2027_v4 }
 0xdbd   : > { %2102 = vst.msk [vmem:[%s555_s26] sm:$0xf] %vm2101_vm12, %v2279_v46  ;;  %v2082_v44 = vmul.f32 %v2078_v36, %v2882_v24  ;;  %v2069_v51 = vmul.f32 %v2268_v17, %v2059_v49 }
 0xdbe   : > { %v2603_v52 = vpop.eup %2602 }
 0xdbf   : > { %v2280_v53 = vpack.c.bf16 %v2082_v44, %v2082_v44  ;;  %v2079_v54 = vadd.f32 %v2269_v14, %v2069_v51  ;;  %v2060_v10 = vmul.f32 %v2603_v52, %v2028_v11 }
 0xdc1   : > { %2103 = vst.msk [vmem:[%s555_s26 + $0x4] sm:$0xf] %vm2101_vm12, %v2280_v53  ;;  %v2083_v55 = vmul.f32 %v2079_v54, %v2870_v5  ;;  %v2070_v56 = vmul.f32 %v2268_v17, %v2060_v10 }
 0xdc3   : > { %v2281_v57 = vpack.c.bf16 %v2083_v55, %v2083_v55  ;;  %v2080_v50 = vadd.f32 %v2269_v14, %v2070_v56 }
 0xdc5   : > { %2104 = vst.msk [vmem:[%s555_s26 + $0x8] sm:$0xf] %vm2101_vm12, %v2281_v57  ;;  %v2084_v58 = vmul.f32 %v2080_v50, %v2868_v40 }
 0xdc7   : > { %v2282_v59 = vpack.c.bf16 %v2084_v58, %v2084_v58 }
 0xdc9   : > { %2105 = vst.msk [vmem:[%s555_s26 + $0xc] sm:$0xf] %vm2101_vm12, %v2282_v59 }
 0xdca PF: > { %s26_s21 = sadd.s32 1, %s2610_s21  }
 0xdcb   : > { %p23_p4 = scmp.ge.s32.totalorder %s26_s21, 4  }
 0xdcd   :  { %25 = sbr.rel (!%p23_p4) target bundleno = 2 (0x2), region = 121 }

</bundles_post_ra>
